<compile_context>
chip_gen: v7x
topology: tpu7x:2x2x1
jax: 0.10.0
libtpu: 0.0.40
codegen_flags: <defaults>
</compile_context>

<pallas_src>
import functools

import jax
import jax.numpy as jnp
from jax.experimental import pallas as pl
from jax.experimental.pallas import tpu as pltpu


# ----------------------------------------------------------------------------
# Pallas kernels
# ----------------------------------------------------------------------------
def matmul_bias_act_kernel(x_ref, w_ref, b_ref, o_ref, *, apply_relu):
    """o = relu?(x @ w + b) on one (TM, K) row tile; f32 accumulation."""
    acc = jnp.dot(x_ref[...], w_ref[...], preferred_element_type=jnp.float32)
    acc = acc + b_ref[...]
    if apply_relu:
        acc = jnp.maximum(acc, 0.0)
    o_ref[...] = acc.astype(o_ref.dtype)


def fc_head_kernel(x_ref, w1_ref, b1_ref, w2_ref, b2_ref, o_ref):
    """Fused Linear(3136,128) + ReLU + Linear(128,10) on one row tile."""
    h = jnp.dot(x_ref[...], w1_ref[...], preferred_element_type=jnp.float32)
    h = jnp.maximum(h + b1_ref[...], 0.0)
    out = jnp.dot(h.astype(jnp.bfloat16), w2_ref[...],
                  preferred_element_type=jnp.float32)
    o_ref[...] = (out + b2_ref[...]).astype(o_ref.dtype)


def max4_kernel(a_ref, b_ref, c_ref, d_ref, o_ref):
    """Elementwise max of four equally-shaped lane-dense slabs (2x2 max-pool)."""
    o_ref[...] = jnp.maximum(jnp.maximum(a_ref[...], b_ref[...]),
                             jnp.maximum(c_ref[...], d_ref[...]))


# ----------------------------------------------------------------------------
# Pallas wrappers
# ----------------------------------------------------------------------------
def _row_tile(m, max_tile):
    """Whole array if it fits in one tile (full-dim block is always legal),
    otherwise a fixed 8-aligned tile with a masked partial last block."""
    return m if m <= max_tile else max_tile


def mm_bias_act(x, w, b, *, relu, out_dtype=jnp.float32, max_tile=512):
    """relu?(x @ w + b), tiled along rows of x; bf16 operands, f32 accumulate."""
    M, K = x.shape
    K2, N = w.shape
    assert K == K2
    x = x.astype(jnp.bfloat16)
    w = w.astype(jnp.bfloat16)
    b = b.reshape(1, N).astype(jnp.float32)
    tm = _row_tile(M, max_tile)
    grid = (pl.cdiv(M, tm),)
    cost = pl.CostEstimate(
        flops=int(2 * M * K * N),
        transcendentals=0,
        bytes_accessed=int(2 * (M * K + K * N) + 4 * N
                           + jnp.dtype(out_dtype).itemsize * M * N),
    )
    kern = functools.partial(matmul_bias_act_kernel, apply_relu=relu)
    return pl.pallas_call(
        kern,
        out_shape=jax.ShapeDtypeStruct((M, N), out_dtype),
        grid=grid,
        in_specs=[
            pl.BlockSpec((tm, K), lambda i: (i, 0)),   # activations: tiled rows
            pl.BlockSpec((K, N), lambda i: (0, 0)),    # weight: VMEM-resident
            pl.BlockSpec((1, N), lambda i: (0, 0)),    # bias:   VMEM-resident
        ],
        out_specs=pl.BlockSpec((tm, N), lambda i: (i, 0)),
        compiler_params=pltpu.CompilerParams(
            dimension_semantics=("parallel",)),
        cost_estimate=cost,
    )(x, w, b)


def fc_head(x, w1, b1, w2, b2, *, max_tile=256):
    """Fused fc1 + ReLU + fc2; tiled along batch rows, weights resident."""
    M, K = x.shape
    K1, H = w1.shape
    H2, N = w2.shape
    assert K == K1 and H == H2
    x = x.astype(jnp.bfloat16)
    w1 = w1.astype(jnp.bfloat16)
    w2 = w2.astype(jnp.bfloat16)
    b1 = b1.reshape(1, H).astype(jnp.float32)
    b2 = b2.reshape(1, N).astype(jnp.float32)
    tm = _row_tile(M, max_tile)
    grid = (pl.cdiv(M, tm),)
    cost = pl.CostEstimate(
        flops=int(2 * M * K * H + 2 * M * H * N),
        transcendentals=0,
        bytes_accessed=int(2 * (M * K + K * H + H * N) + 4 * (H + N) + 4 * M * N),
    )
    return pl.pallas_call(
        fc_head_kernel,
        out_shape=jax.ShapeDtypeStruct((M, N), jnp.float32),
        grid=grid,
        in_specs=[
            pl.BlockSpec((tm, K), lambda i: (i, 0)),
            pl.BlockSpec((K, H), lambda i: (0, 0)),
            pl.BlockSpec((1, H), lambda i: (0, 0)),
            pl.BlockSpec((H, N), lambda i: (0, 0)),
            pl.BlockSpec((1, N), lambda i: (0, 0)),
        ],
        out_specs=pl.BlockSpec((tm, N), lambda i: (i, 0)),
        compiler_params=pltpu.CompilerParams(
            dimension_semantics=("parallel",)),
        cost_estimate=cost,
    )(x, w1, b1, w2, b2)


def maxpool_2x2(x_nhwc, *, max_tile=512):
    """2x2 non-overlapping max pool via an elementwise max-of-4 Pallas kernel."""
    B, H, W, C = x_nhwc.shape
    OH, OW = H // 2, W // 2
    # Four lane-dense (B*OH, OW*C) slabs: TL / TR / BL / BR of each 2x2 window.
    slabs = [
        x_nhwc[:, 0::2, 0::2, :].reshape(B * OH, OW * C),
        x_nhwc[:, 0::2, 1::2, :].reshape(B * OH, OW * C),
        x_nhwc[:, 1::2, 0::2, :].reshape(B * OH, OW * C),
        x_nhwc[:, 1::2, 1::2, :].reshape(B * OH, OW * C),
    ]
    R, Ccols = B * OH, OW * C
    tr = _row_tile(R, max_tile)
    grid = (pl.cdiv(R, tr),)
    spec = pl.BlockSpec((tr, Ccols), lambda i: (i, 0))
    out = pl.pallas_call(
        max4_kernel,
        out_shape=jax.ShapeDtypeStruct((R, Ccols), x_nhwc.dtype),
        grid=grid,
        in_specs=[spec, spec, spec, spec],
        out_specs=spec,
        compiler_params=pltpu.CompilerParams(
            dimension_semantics=("parallel",)),
    )(*slabs)
    return out.reshape(B, OH, OW, C)


# ----------------------------------------------------------------------------
# Plain-JAX glue: im2col + parameter conversion
# ----------------------------------------------------------------------------
def im2col_3x3_pad1(x_nhwc):
    """(B, H, W, C) -> (B*H*W, 9*C) in bf16; feature order (kh, kw, cin)."""
    # TODO(synk): fuse this patch construction into the conv matmul kernel
    # (halo-tile DMA + in-kernel shifted slices) to avoid the 9x-expanded HBM
    # round-trip; for now it stays as XLA glue but in bf16 (half the traffic).
    B, H, W, C = x_nhwc.shape
    xp = jnp.pad(x_nhwc, ((0, 0), (1, 1), (1, 1), (0, 0)))
    cols = []
    for dh in range(3):
        for dw in range(3):
            cols.append(xp[:, dh:dh + H, dw:dw + W, :])
    patches = jnp.stack(cols, axis=3)            # (B, H, W, 9, C)
    return patches.reshape(B * H * W, 9 * C)


def conv_weight_to_matrix(w_oihw):
    """PyTorch (Cout, Cin, 3, 3) -> (9*Cin, Cout), matching im2col (kh,kw,cin)."""
    Cout, Cin, KH, KW = w_oihw.shape
    return w_oihw.transpose(2, 3, 1, 0).reshape(KH * KW * Cin, Cout)


def init_torch_params(key):
    """Deterministic synthetic parameters in PyTorch layout."""
    ks = jax.random.split(key, 8)
    s = 0.05
    return {
        "conv1_w": s * jax.random.normal(ks[0], (32, 1, 3, 3), jnp.float32),
        "conv1_b": s * jax.random.normal(ks[1], (32,), jnp.float32),
        "conv2_w": s * jax.random.normal(ks[2], (64, 32, 3, 3), jnp.float32),
        "conv2_b": s * jax.random.normal(ks[3], (64,), jnp.float32),
        # torch Linear weight is (out, in); fc1 input index = c*49 + h*7 + w
        "fc1_w": s * jax.random.normal(ks[4], (128, 64 * 7 * 7), jnp.float32),
        "fc1_b": s * jax.random.normal(ks[5], (128,), jnp.float32),
        "fc2_w": s * jax.random.normal(ks[6], (10, 128), jnp.float32),
        "fc2_b": s * jax.random.normal(ks[7], (10,), jnp.float32),
    }


def prepare_params(p):
    """One-time conversion of PyTorch-layout params to kernel-friendly form.

    - conv weights -> (9*Cin, Cout) bf16 matmul matrices
    - fc1 weight   -> (3136, 128) bf16 with rows permuted from PyTorch's CHW
      flatten order to our NHWC flatten order (kills the runtime transpose)
    - fc2 weight   -> (128, 10) bf16; biases stay f32.
    """
    fc1 = p["fc1_w"].T                                     # (3136, 128), rows (c, h, w)
    fc1 = fc1.reshape(64, 7, 7, 128).transpose(1, 2, 0, 3) # -> (h, w, c, out)
    fc1 = fc1.reshape(64 * 7 * 7, 128)
    return {
        "conv1_w": conv_weight_to_matrix(p["conv1_w"]).astype(jnp.bfloat16),
        "conv1_b": p["conv1_b"].astype(jnp.float32),
        "conv2_w": conv_weight_to_matrix(p["conv2_w"]).astype(jnp.bfloat16),
        "conv2_b": p["conv2_b"].astype(jnp.float32),
        "fc1_w": fc1.astype(jnp.bfloat16),
        "fc1_b": p["fc1_b"].astype(jnp.float32),
        "fc2_w": p["fc2_w"].T.astype(jnp.bfloat16),        # (128, 10)
        "fc2_b": p["fc2_b"].astype(jnp.float32),
    }


# ----------------------------------------------------------------------------
# Forward pass
# ----------------------------------------------------------------------------
@jax.jit
def simple_cnn_forward(params, x_nchw):
    B = x_nchw.shape[0]
    x = jnp.transpose(x_nchw, (0, 2, 3, 1)).astype(jnp.bfloat16)   # NHWC (B,28,28,1)

    # Conv1 (1->32, 3x3, pad=1) + ReLU      [tiled Pallas matmul kernel]
    p1 = im2col_3x3_pad1(x)                                        # (B*784, 9)
    y1 = mm_bias_act(p1, params["conv1_w"], params["conv1_b"],
                     relu=True, out_dtype=jnp.bfloat16, max_tile=1024)
    y1 = y1.reshape(B, 28, 28, 32)

    # MaxPool 2x2                           [Pallas lane-dense max kernel]
    y1p = maxpool_2x2(y1)                                          # (B,14,14,32)

    # Conv2 (32->64, 3x3, pad=1) + ReLU     [tiled Pallas matmul kernel]
    p2 = im2col_3x3_pad1(y1p)                                      # (B*196, 288)
    y2 = mm_bias_act(p2, params["conv2_w"], params["conv2_b"],
                     relu=True, out_dtype=jnp.bfloat16, max_tile=512)
    y2 = y2.reshape(B, 14, 14, 64)

    # MaxPool 2x2                           [Pallas lane-dense max kernel]
    y2p = maxpool_2x2(y2)                                          # (B,7,7,64)

    # NHWC flatten (fc1 weight rows were pre-permuted to match PyTorch Flatten).
    flat = y2p.reshape(B, 7 * 7 * 64)

    # FC1 + ReLU + FC2 fused                [single Pallas kernel]
    return fc_head(flat, params["fc1_w"], params["fc1_b"],
                   params["fc2_w"], params["fc2_b"])               # (B, 10) f32


if __name__ == "__main__":
    key = jax.random.PRNGKey(0)
    pkey, xkey = jax.random.split(key)
    params = prepare_params(init_torch_params(pkey))
    # Input: batch=2, NCHW like PyTorch, 1x28x28 (Linear(64*7*7) implies 28x28).
    x = jax.random.normal(xkey, (2, 1, 28, 28), jnp.float32)
    logits = simple_cnn_forward(params, x)
    jax.block_until_ready(logits)
    assert logits.shape == (2, 10) and logits.dtype == jnp.float32
    print("KERNEL_OK")
</pallas_src>

<mosaic_0001>
module attributes {stable_mosaic.version = 11 : i64} {
  func.func @matmul_bias_act_kernel(%arg0: i32, %arg1: memref<1024x9xbf16, #tpu.memory_space<vmem>>, %arg2: memref<9x32xbf16, #tpu.memory_space<vmem>>, %arg3: memref<1x32xf32, #tpu.memory_space<vmem>>, %arg4: memref<1024x32xbf16, #tpu.memory_space<vmem>>) attributes {dimension_semantics = [#tpu.dimension_semantics<parallel>], iteration_bounds = array<i64: 2>, scalar_prefetch = 0 : i64, scratch_operands = 0 : i64, tpu.core_type = #tpu.core_type<tc>, window_params = [{transform_indices = @transform_0, window_bounds = array<i64: 1024, 9>}, {pipeline_mode = #tpu.pipeline_mode<synchronous>, transform_indices = @transform_1, window_bounds = array<i64: 9, 32>}, {pipeline_mode = #tpu.pipeline_mode<synchronous>, transform_indices = @transform_2, window_bounds = array<i64: 1, 32>}, {transform_indices = @transform_3, window_bounds = array<i64: 1024, 32>}]} {
    %c0 = arith.constant 0 : index
    %c0_0 = arith.constant 0 : index
    %0 = vector.load %arg1[%c0, %c0_0] : memref<1024x9xbf16, #tpu.memory_space<vmem>>, vector<1024x9xbf16>
    %c0_1 = arith.constant 0 : index
    %c0_2 = arith.constant 0 : index
    %1 = vector.load %arg2[%c0_1, %c0_2] : memref<9x32xbf16, #tpu.memory_space<vmem>>, vector<9x32xbf16>
    %cst = arith.constant dense<0.000000e+00> : vector<1024x32xf32>
    %2 = tpu.matmul %0, %1, %cst {dimension_numbers = #tpu.dot_dimension_numbers<[1], [0], [0], [1], [0, 0, 1, 1], [], []>} : vector<1024x9xbf16>, vector<9x32xbf16>, vector<1024x32xf32> -> vector<1024x32xf32>
    %c0_3 = arith.constant 0 : index
    %c0_4 = arith.constant 0 : index
    %3 = vector.load %arg3[%c0_3, %c0_4] : memref<1x32xf32, #tpu.memory_space<vmem>>, vector<1x32xf32>
    %4 = vector.broadcast %3 : vector<1x32xf32> to vector<1024x32xf32>
    %5 = arith.addf %2, %4 : vector<1024x32xf32>
    %cst_5 = arith.constant 0.000000e+00 : f32
    %6 = vector.broadcast %cst_5 : f32 to vector<1024x32xf32>
    %7 = arith.maximumf %5, %6 : vector<1024x32xf32>
    %8 = arith.truncf %7 : vector<1024x32xf32> to vector<1024x32xbf16>
    %c0_6 = arith.constant 0 : index
    %c0_7 = arith.constant 0 : index
    %9 = vector.load %arg4[%c0_6, %c0_7] : memref<1024x32xbf16, #tpu.memory_space<vmem>>, vector<1024x32xbf16>
    tpu.vector_store %arg4[%c0_6, %c0_7], %8 {strides = array<i32>} : memref<1024x32xbf16, #tpu.memory_space<vmem>>, vector<1024x32xbf16>,
    return
  }
  func.func @transform_0(%arg0: i32) -> (i32, i32) {
    %c0_i32 = arith.constant 0 : i32
    %c0_i32_0 = arith.constant 0 : i32
    return %arg0, %c0_i32 : i32, i32
  }
  func.func @transform_1(%arg0: i32) -> (i32, i32) {
    %c0_i32 = arith.constant 0 : i32
    %c0_i32_0 = arith.constant 0 : i32
    %c0_i32_1 = arith.constant 0 : i32
    return %c0_i32, %c0_i32_0 : i32, i32
  }
  func.func @transform_2(%arg0: i32) -> (i32, i32) {
    %c0_i32 = arith.constant 0 : i32
    %c0_i32_0 = arith.constant 0 : i32
    %c0_i32_1 = arith.constant 0 : i32
    return %c0_i32, %c0_i32_0 : i32, i32
  }
  func.func @transform_3(%arg0: i32) -> (i32, i32) {
    %c0_i32 = arith.constant 0 : i32
    %c0_i32_0 = arith.constant 0 : i32
    return %arg0, %c0_i32 : i32, i32
  }
}

module attributes {stable_mosaic.version = 11 : i64} {
  func.func @max4_kernel(%arg0: i32, %arg1: memref<28x448xbf16, #tpu.memory_space<vmem>>, %arg2: memref<28x448xbf16, #tpu.memory_space<vmem>>, %arg3: memref<28x448xbf16, #tpu.memory_space<vmem>>, %arg4: memref<28x448xbf16, #tpu.memory_space<vmem>>, %arg5: memref<28x448xbf16, #tpu.memory_space<vmem>>) attributes {dimension_semantics = [#tpu.dimension_semantics<parallel>], iteration_bounds = array<i64: 1>, scalar_prefetch = 0 : i64, scratch_operands = 0 : i64, tpu.core_type = #tpu.core_type<tc>, window_params = [{transform_indices = @transform_0, window_bounds = array<i64: 28, 448>}, {transform_indices = @transform_1, window_bounds = array<i64: 28, 448>}, {transform_indices = @transform_2, window_bounds = array<i64: 28, 448>}, {transform_indices = @transform_3, window_bounds = array<i64: 28, 448>}, {transform_indices = @transform_4, window_bounds = array<i64: 28, 448>}]} {
    %c0 = arith.constant 0 : index
    %c0_0 = arith.constant 0 : index
    %0 = vector.load %arg1[%c0, %c0_0] : memref<28x448xbf16, #tpu.memory_space<vmem>>, vector<28x448xbf16>
    %c0_1 = arith.constant 0 : index
    %c0_2 = arith.constant 0 : index
    %1 = vector.load %arg2[%c0_1, %c0_2] : memref<28x448xbf16, #tpu.memory_space<vmem>>, vector<28x448xbf16>
    %2 = arith.maximumf %0, %1 : vector<28x448xbf16>
    %c0_3 = arith.constant 0 : index
    %c0_4 = arith.constant 0 : index
    %3 = vector.load %arg3[%c0_3, %c0_4] : memref<28x448xbf16, #tpu.memory_space<vmem>>, vector<28x448xbf16>
    %c0_5 = arith.constant 0 : index
    %c0_6 = arith.constant 0 : index
    %4 = vector.load %arg4[%c0_5, %c0_6] : memref<28x448xbf16, #tpu.memory_space<vmem>>, vector<28x448xbf16>
    %5 = arith.maximumf %3, %4 : vector<28x448xbf16>
    %6 = arith.maximumf %2, %5 : vector<28x448xbf16>
    %c0_7 = arith.constant 0 : index
    %c0_8 = arith.constant 0 : index
    %7 = vector.load %arg5[%c0_7, %c0_8] : memref<28x448xbf16, #tpu.memory_space<vmem>>, vector<28x448xbf16>
    tpu.vector_store %arg5[%c0_7, %c0_8], %6 {strides = array<i32>} : memref<28x448xbf16, #tpu.memory_space<vmem>>, vector<28x448xbf16>,
    return
  }
  func.func @transform_0(%arg0: i32) -> (i32, i32) {
    %c0_i32 = arith.constant 0 : i32
    %c0_i32_0 = arith.constant 0 : i32
    return %arg0, %c0_i32 : i32, i32
  }
  func.func @transform_1(%arg0: i32) -> (i32, i32) {
    %c0_i32 = arith.constant 0 : i32
    %c0_i32_0 = arith.constant 0 : i32
    return %arg0, %c0_i32 : i32, i32
  }
  func.func @transform_2(%arg0: i32) -> (i32, i32) {
    %c0_i32 = arith.constant 0 : i32
    %c0_i32_0 = arith.constant 0 : i32
    return %arg0, %c0_i32 : i32, i32
  }
  func.func @transform_3(%arg0: i32) -> (i32, i32) {
    %c0_i32 = arith.constant 0 : i32
    %c0_i32_0 = arith.constant 0 : i32
    return %arg0, %c0_i32 : i32, i32
  }
  func.func @transform_4(%arg0: i32) -> (i32, i32) {
    %c0_i32 = arith.constant 0 : i32
    %c0_i32_0 = arith.constant 0 : i32
    return %arg0, %c0_i32 : i32, i32
  }
}

module attributes {stable_mosaic.version = 11 : i64} {
  func.func @matmul_bias_act_kernel(%arg0: i32, %arg1: memref<392x288xbf16, #tpu.memory_space<vmem>>, %arg2: memref<288x64xbf16, #tpu.memory_space<vmem>>, %arg3: memref<1x64xf32, #tpu.memory_space<vmem>>, %arg4: memref<392x64xbf16, #tpu.memory_space<vmem>>) attributes {dimension_semantics = [#tpu.dimension_semantics<parallel>], iteration_bounds = array<i64: 1>, scalar_prefetch = 0 : i64, scratch_operands = 0 : i64, tpu.core_type = #tpu.core_type<tc>, window_params = [{transform_indices = @transform_0, window_bounds = array<i64: 392, 288>}, {pipeline_mode = #tpu.pipeline_mode<synchronous>, transform_indices = @transform_1, window_bounds = array<i64: 288, 64>}, {pipeline_mode = #tpu.pipeline_mode<synchronous>, transform_indices = @transform_2, window_bounds = array<i64: 1, 64>}, {transform_indices = @transform_3, window_bounds = array<i64: 392, 64>}]} {
    %c0 = arith.constant 0 : index
    %c0_0 = arith.constant 0 : index
    %0 = vector.load %arg1[%c0, %c0_0] : memref<392x288xbf16, #tpu.memory_space<vmem>>, vector<392x288xbf16>
    %c0_1 = arith.constant 0 : index
    %c0_2 = arith.constant 0 : index
    %1 = vector.load %arg2[%c0_1, %c0_2] : memref<288x64xbf16, #tpu.memory_space<vmem>>, vector<288x64xbf16>
    %cst = arith.constant dense<0.000000e+00> : vector<392x64xf32>
    %2 = tpu.matmul %0, %1, %cst {dimension_numbers = #tpu.dot_dimension_numbers<[1], [0], [0], [1], [0, 0, 1, 1], [], []>} : vector<392x288xbf16>, vector<288x64xbf16>, vector<392x64xf32> -> vector<392x64xf32>
    %c0_3 = arith.constant 0 : index
    %c0_4 = arith.constant 0 : index
    %3 = vector.load %arg3[%c0_3, %c0_4] : memref<1x64xf32, #tpu.memory_space<vmem>>, vector<1x64xf32>
    %4 = vector.broadcast %3 : vector<1x64xf32> to vector<392x64xf32>
    %5 = arith.addf %2, %4 : vector<392x64xf32>
    %cst_5 = arith.constant 0.000000e+00 : f32
    %6 = vector.broadcast %cst_5 : f32 to vector<392x64xf32>
    %7 = arith.maximumf %5, %6 : vector<392x64xf32>
    %8 = arith.truncf %7 : vector<392x64xf32> to vector<392x64xbf16>
    %c0_6 = arith.constant 0 : index
    %c0_7 = arith.constant 0 : index
    %9 = vector.load %arg4[%c0_6, %c0_7] : memref<392x64xbf16, #tpu.memory_space<vmem>>, vector<392x64xbf16>
    tpu.vector_store %arg4[%c0_6, %c0_7], %8 {strides = array<i32>} : memref<392x64xbf16, #tpu.memory_space<vmem>>, vector<392x64xbf16>,
    return
  }
  func.func @transform_0(%arg0: i32) -> (i32, i32) {
    %c0_i32 = arith.constant 0 : i32
    %c0_i32_0 = arith.constant 0 : i32
    return %arg0, %c0_i32 : i32, i32
  }
  func.func @transform_1(%arg0: i32) -> (i32, i32) {
    %c0_i32 = arith.constant 0 : i32
    %c0_i32_0 = arith.constant 0 : i32
    %c0_i32_1 = arith.constant 0 : i32
    return %c0_i32, %c0_i32_0 : i32, i32
  }
  func.func @transform_2(%arg0: i32) -> (i32, i32) {
    %c0_i32 = arith.constant 0 : i32
    %c0_i32_0 = arith.constant 0 : i32
    %c0_i32_1 = arith.constant 0 : i32
    return %c0_i32, %c0_i32_0 : i32, i32
  }
  func.func @transform_3(%arg0: i32) -> (i32, i32) {
    %c0_i32 = arith.constant 0 : i32
    %c0_i32_0 = arith.constant 0 : i32
    return %arg0, %c0_i32 : i32, i32
  }
}

module attributes {stable_mosaic.version = 11 : i64} {
  func.func @max4_kernel(%arg0: i32, %arg1: memref<14x448xbf16, #tpu.memory_space<vmem>>, %arg2: memref<14x448xbf16, #tpu.memory_space<vmem>>, %arg3: memref<14x448xbf16, #tpu.memory_space<vmem>>, %arg4: memref<14x448xbf16, #tpu.memory_space<vmem>>, %arg5: memref<14x448xbf16, #tpu.memory_space<vmem>>) attributes {dimension_semantics = [#tpu.dimension_semantics<parallel>], iteration_bounds = array<i64: 1>, scalar_prefetch = 0 : i64, scratch_operands = 0 : i64, tpu.core_type = #tpu.core_type<tc>, window_params = [{transform_indices = @transform_0, window_bounds = array<i64: 14, 448>}, {transform_indices = @transform_1, window_bounds = array<i64: 14, 448>}, {transform_indices = @transform_2, window_bounds = array<i64: 14, 448>}, {transform_indices = @transform_3, window_bounds = array<i64: 14, 448>}, {transform_indices = @transform_4, window_bounds = array<i64: 14, 448>}]} {
    %c0 = arith.constant 0 : index
    %c0_0 = arith.constant 0 : index
    %0 = vector.load %arg1[%c0, %c0_0] : memref<14x448xbf16, #tpu.memory_space<vmem>>, vector<14x448xbf16>
    %c0_1 = arith.constant 0 : index
    %c0_2 = arith.constant 0 : index
    %1 = vector.load %arg2[%c0_1, %c0_2] : memref<14x448xbf16, #tpu.memory_space<vmem>>, vector<14x448xbf16>
    %2 = arith.maximumf %0, %1 : vector<14x448xbf16>
    %c0_3 = arith.constant 0 : index
    %c0_4 = arith.constant 0 : index
    %3 = vector.load %arg3[%c0_3, %c0_4] : memref<14x448xbf16, #tpu.memory_space<vmem>>, vector<14x448xbf16>
    %c0_5 = arith.constant 0 : index
    %c0_6 = arith.constant 0 : index
    %4 = vector.load %arg4[%c0_5, %c0_6] : memref<14x448xbf16, #tpu.memory_space<vmem>>, vector<14x448xbf16>
    %5 = arith.maximumf %3, %4 : vector<14x448xbf16>
    %6 = arith.maximumf %2, %5 : vector<14x448xbf16>
    %c0_7 = arith.constant 0 : index
    %c0_8 = arith.constant 0 : index
    %7 = vector.load %arg5[%c0_7, %c0_8] : memref<14x448xbf16, #tpu.memory_space<vmem>>, vector<14x448xbf16>
    tpu.vector_store %arg5[%c0_7, %c0_8], %6 {strides = array<i32>} : memref<14x448xbf16, #tpu.memory_space<vmem>>, vector<14x448xbf16>,
    return
  }
  func.func @transform_0(%arg0: i32) -> (i32, i32) {
    %c0_i32 = arith.constant 0 : i32
    %c0_i32_0 = arith.constant 0 : i32
    return %arg0, %c0_i32 : i32, i32
  }
  func.func @transform_1(%arg0: i32) -> (i32, i32) {
    %c0_i32 = arith.constant 0 : i32
    %c0_i32_0 = arith.constant 0 : i32
    return %arg0, %c0_i32 : i32, i32
  }
  func.func @transform_2(%arg0: i32) -> (i32, i32) {
    %c0_i32 = arith.constant 0 : i32
    %c0_i32_0 = arith.constant 0 : i32
    return %arg0, %c0_i32 : i32, i32
  }
  func.func @transform_3(%arg0: i32) -> (i32, i32) {
    %c0_i32 = arith.constant 0 : i32
    %c0_i32_0 = arith.constant 0 : i32
    return %arg0, %c0_i32 : i32, i32
  }
  func.func @transform_4(%arg0: i32) -> (i32, i32) {
    %c0_i32 = arith.constant 0 : i32
    %c0_i32_0 = arith.constant 0 : i32
    return %arg0, %c0_i32 : i32, i32
  }
}

module attributes {stable_mosaic.version = 11 : i64} {
  func.func @fc_head_kernel(%arg0: i32, %arg1: memref<2x3136xbf16, #tpu.memory_space<vmem>>, %arg2: memref<3136x128xbf16, #tpu.memory_space<vmem>>, %arg3: memref<1x128xf32, #tpu.memory_space<vmem>>, %arg4: memref<128x10xbf16, #tpu.memory_space<vmem>>, %arg5: memref<1x10xf32, #tpu.memory_space<vmem>>, %arg6: memref<2x10xf32, #tpu.memory_space<vmem>>) attributes {dimension_semantics = [#tpu.dimension_semantics<parallel>], iteration_bounds = array<i64: 1>, scalar_prefetch = 0 : i64, scratch_operands = 0 : i64, tpu.core_type = #tpu.core_type<tc>, window_params = [{transform_indices = @transform_0, window_bounds = array<i64: 2, 3136>}, {pipeline_mode = #tpu.pipeline_mode<synchronous>, transform_indices = @transform_1, window_bounds = array<i64: 3136, 128>}, {pipeline_mode = #tpu.pipeline_mode<synchronous>, transform_indices = @transform_2, window_bounds = array<i64: 1, 128>}, {pipeline_mode = #tpu.pipeline_mode<synchronous>, transform_indices = @transform_3, window_bounds = array<i64: 128, 10>}, {pipeline_mode = #tpu.pipeline_mode<synchronous>, transform_indices = @transform_4, window_bounds = array<i64: 1, 10>}, {transform_indices = @transform_5, window_bounds = array<i64: 2, 10>}]} {
    %c0 = arith.constant 0 : index
    %c0_0 = arith.constant 0 : index
    %0 = vector.load %arg1[%c0, %c0_0] : memref<2x3136xbf16, #tpu.memory_space<vmem>>, vector<2x3136xbf16>
    %c0_1 = arith.constant 0 : index
    %c0_2 = arith.constant 0 : index
    %1 = vector.load %arg2[%c0_1, %c0_2] : memref<3136x128xbf16, #tpu.memory_space<vmem>>, vector<3136x128xbf16>
    %cst = arith.constant dense<0.000000e+00> : vector<2x128xf32>
    %2 = tpu.matmul %0, %1, %cst {dimension_numbers = #tpu.dot_dimension_numbers<[1], [0], [0], [1], [0, 0, 1, 1], [], []>} : vector<2x3136xbf16>, vector<3136x128xbf16>, vector<2x128xf32> -> vector<2x128xf32>
    %c0_3 = arith.constant 0 : index
    %c0_4 = arith.constant 0 : index
    %3 = vector.load %arg3[%c0_3, %c0_4] : memref<1x128xf32, #tpu.memory_space<vmem>>, vector<1x128xf32>
    %4 = vector.broadcast %3 : vector<1x128xf32> to vector<2x128xf32>
    %5 = arith.addf %2, %4 : vector<2x128xf32>
    %cst_5 = arith.constant 0.000000e+00 : f32
    %6 = vector.broadcast %cst_5 : f32 to vector<2x128xf32>
    %7 = arith.maximumf %5, %6 : vector<2x128xf32>
    %8 = arith.truncf %7 : vector<2x128xf32> to vector<2x128xbf16>
    %c0_6 = arith.constant 0 : index
    %c0_7 = arith.constant 0 : index
    %9 = vector.load %arg4[%c0_6, %c0_7] : memref<128x10xbf16, #tpu.memory_space<vmem>>, vector<128x10xbf16>
    %cst_8 = arith.constant dense<0.000000e+00> : vector<2x10xf32>
    %10 = tpu.matmul %8, %9, %cst_8 {dimension_numbers = #tpu.dot_dimension_numbers<[1], [0], [0], [1], [0, 0, 1, 1], [], []>} : vector<2x128xbf16>, vector<128x10xbf16>, vector<2x10xf32> -> vector<2x10xf32>
    %c0_9 = arith.constant 0 : index
    %c0_10 = arith.constant 0 : index
    %11 = vector.load %arg5[%c0_9, %c0_10] : memref<1x10xf32, #tpu.memory_space<vmem>>, vector<1x10xf32>
    %12 = vector.broadcast %11 : vector<1x10xf32> to vector<2x10xf32>
    %13 = arith.addf %10, %12 : vector<2x10xf32>
    %c0_11 = arith.constant 0 : index
    %c0_12 = arith.constant 0 : index
    %14 = vector.load %arg6[%c0_11, %c0_12] : memref<2x10xf32, #tpu.memory_space<vmem>>, vector<2x10xf32>
    tpu.vector_store %arg6[%c0_11, %c0_12], %13 {strides = array<i32>} : memref<2x10xf32, #tpu.memory_space<vmem>>, vector<2x10xf32>,
    return
  }
  func.func @transform_0(%arg0: i32) -> (i32, i32) {
    %c0_i32 = arith.constant 0 : i32
    %c0_i32_0 = arith.constant 0 : i32
    return %arg0, %c0_i32 : i32, i32
  }
  func.func @transform_1(%arg0: i32) -> (i32, i32) {
    %c0_i32 = arith.constant 0 : i32
    %c0_i32_0 = arith.constant 0 : i32
    %c0_i32_1 = arith.constant 0 : i32
    return %c0_i32, %c0_i32_0 : i32, i32
  }
  func.func @transform_2(%arg0: i32) -> (i32, i32) {
    %c0_i32 = arith.constant 0 : i32
    %c0_i32_0 = arith.constant 0 : i32
    %c0_i32_1 = arith.constant 0 : i32
    return %c0_i32, %c0_i32_0 : i32, i32
  }
  func.func @transform_3(%arg0: i32) -> (i32, i32) {
    %c0_i32 = arith.constant 0 : i32
    %c0_i32_0 = arith.constant 0 : i32
    %c0_i32_1 = arith.constant 0 : i32
    return %c0_i32, %c0_i32_0 : i32, i32
  }
  func.func @transform_4(%arg0: i32) -> (i32, i32) {
    %c0_i32 = arith.constant 0 : i32
    %c0_i32_0 = arith.constant 0 : i32
    %c0_i32_1 = arith.constant 0 : i32
    return %c0_i32, %c0_i32_0 : i32, i32
  }
  func.func @transform_5(%arg0: i32) -> (i32, i32) {
    %c0_i32 = arith.constant 0 : i32
    %c0_i32_0 = arith.constant 0 : i32
    return %arg0, %c0_i32 : i32, i32
  }
}

</mosaic_0001>

<bundles_post_ra>
// kernel: simple_cnn_forward.5
= control target key start
LH: loop header
LB: loop body
LE: loop exit
PB: predicated region body
PF: predicated region fallthrough
CT: control target
= control target key end

     0   :  { %8 = vsyncpa [#allocation3], 0  ;;  %s4484_s0 = inlined_call_operand.vmem [shape: bf16[1568,9], index: 0, kind: input, shape index: {}]   ;;  %s4485_s1 = inlined_call_operand.hbm [shape: bf16[9,32], index: 1, kind: input, shape index: {}]   ;;  %s4486_s2 = inlined_call_operand.hbm [shape: f32[1,32], index: 2, kind: input, shape index: {}]   ;;  %s4487_s3 = inlined_call_operand.vmem [shape: bf16[1568,32], index: 3, kind: output, shape index: {}]  }
   0x1   :  { %9 = vsyncpa [#allocation5], 0  ;;  %s3654_s12 = smov 0   ;;  %s3656_s13 = smov 0  }
   0x2   :  { %s3658_s14 = smov 0  }
   0x3 LB: > { %s3667_s15 = sadd.s32 4294967295, %s3595_s14   ;;  %s3669_s16 = sadd.s32 1, %s3595_s14   ;;  %s3595_s14 = sphi %s3658_s14, %s4504_s14   ;;  %s3591_s13 = sphi %s3656_s13, %s4503_s13   ;;  %s3587_s12 = sphi %s3654_s12, %s4502_s12  }
   0x4   : > { %s87_s17 = ssub.s32 %s3595_s14, %s3669_s16  ;;  %s90_s18 = sadd.s32 1, %s3591_s13 }
   0x5   : > { %p88_p0 = scmp.eq.s32.totalorder %s87_s17, 0  ;;  %p100_p1 = scmp.ne.s32.totalorder %s3591_s13, %s3587_s12 }
   0x6   : > { %p101_p2 = scmp.eq.s32.totalorder %s3667_s15, 1  ;;  %p2686_p3 = scmp.ge.s32.totalorder %s3595_s14, 1 }
   0x7   : > { %s3677_s19 = scalar_select %p88_p0, %s3591_s13, %s90_s18  }
   0x8   : > { %p3679_p4 = por %p101_p2, %p100_p1  ;;  %p114_p5 = scmp.lt.s32.totalorder %s3595_s14, 3 }
   0x9   : > { %p4488_p6 = scmp.eq.s32.totalorder %s3667_s15, 0  ;;  %s3629_s22 = smov [#allocation2]  }
   0xa   : > { %s4490_s20 = scalar_select %p3679_p4, 1, 0 }
   0xb   : > { %p3684_p7 = pnand %p2686_p3, %p114_p5  ;;  %s126_s23 = sshll.u32 %s3629_s22, 4  ;;  %s127_s23 = int_to_ptr.vmem [resolvable:$true] %s126_s23 }
   0xc   : > { %s3630_s25 = smov [#allocation4]   ;;  %s3477_s29 = scalar_lea.hbm %s4485_s1, 128 }
   0xd   : > { %s4491_s21 = scalar_select %p3684_p7, 1, 0 }
   0xe   : > { %p3307_p8 = pneg %p3684_p7  ;;  %s140_s26 = sshll.u32 %s3630_s25, 4  ;;  %s3696_s26 = int_to_ptr.vmem [resolvable:$true] %s140_s26 }
   0xf   : > { %p3478_p10 = scmp.ne.s32.totalorder %s4485_s1, %s3477_s29  ;;  %p3484_p0 = scmp.lt.u32.totalorder %s3477_s29, %s4485_s1 }
  0x10   : > { %p3692_p9 = pnand %p4488_p6, %p3307_p8 }
  0x12   : > { %p3479_p11 = pneg %p3692_p9 }
  0x14   : > { %p3480_p12 = pnand %p3479_p11, %p3478_p10 }
  0x16   : > { %p3481_p13 = pneg %p3480_p12 }
  0x18   : > { %p3486_p1 = pnand %p3484_p0, %p3481_p13 }
  0x1a   : > { %3489 = shalt.err (!%p3486_p1)
}
  0x1b   : > { %s3490_s7 = scalar_lea.vmem %s127_s23, 128  ;;  %p3498_p8 = scmp.lt.s32.totalorder %s127_s23, %s127_s23 }
  0x1c   : > { %p3491_p2 = scmp.ne.s32.totalorder %s127_s23, %s3490_s7  ;;  %p3499_p6 = scmp.lt.s32.totalorder %s3490_s7, %s3490_s7 }
  0x1e   : > { %p3493_p3 = pnand %p3491_p2, %p3479_p11  ;;  %p3500_p4 = por %p3499_p6, %p3498_p8 }
  0x20   : > { %p3494_p5 = pneg %p3493_p3 }
  0x22   : > { %p3501_p7 = pnand %p3500_p4, %p3494_p5 }
  0x24   : > { %3504 = shalt.err (!%p3501_p7)
}
  0x25   : > { %s3631_s8 = smov 64   ;;  %s3632_s9 = smov 4  }
  0x26   : > { %3310 = dma.hbm_to_vmem [thread:$0]  (!%p3692_p9), %s4485_s1, 128, %s127_s23, [#allocation3], %s3631_s8, %s3631_s8, %s3632_s9  }
  0x27   : > { %s3505_s18 = scalar_lea.hbm %s4486_s2, 16 }
  0x28   : > { %p3506_p10 = scmp.ne.s32.totalorder %s4486_s2, %s3505_s18  ;;  %p3512_p7 = scmp.lt.u32.totalorder %s3505_s18, %s4486_s2 }
  0x2a   : > { %p3508_p4 = pnand %p3506_p10, %p3479_p11 }
  0x2c   : > { %p3509_p6 = pneg %p3508_p4 }
  0x2e   : > { %p3514_p12 = pnand %p3512_p7, %p3509_p6 }
  0x30   : > { %3517 = shalt.err (!%p3514_p12)
}
  0x31   : > { %s3518_s23 = scalar_lea.vmem %s3696_s26, 16  ;;  %s3525_s29 = scalar_lea.vmem %s3696_s26, 32 }
  0x32   : > { %p3519_p13 = scmp.ne.s32.totalorder %s3696_s26, %s3518_s23  ;;  %p3526_p2 = scmp.lt.s32.totalorder %s3696_s26, %s3696_s26 }
  0x33   : > { %p3527_p3 = scmp.lt.s32.totalorder %s3525_s29, %s3518_s23 }
  0x34   : > { %p3521_p0 = pnand %p3519_p13, %p3479_p11 }
  0x35   : > { %p3528_p5 = por %p3527_p3, %p3526_p2 }
  0x36   : > { %p3522_p1 = pneg %p3521_p0 }
  0x38   : > { %p3529_p8 = pnand %p3528_p5, %p3522_p1 }
  0x3a   : > { %3532 = shalt.err (!%p3529_p8)
}
  0x3b   : > { %3313 = dma.hbm_to_vmem [thread:$0]  (!%p3692_p9), %s4486_s2, 16, %s3696_s26, [#allocation5]  }
  0x3c   : > { %p4493_p10 = scmp.ne.s32.totalorder %s4491_s21, 0 }
  0x3d   : > { %p4494_p11 = scmp.eq.s32.totalorder (!%p4493_p10), %s3667_s15, 0 }
  0x3e   : > { %170 = sbr.rel (%p4493_p10) target bundleno = 517 (0x205), region = 32 }
  0x45   : > { %3578 = dma.done.wait (%p4494_p11), [#allocation3], 128   ;;  %p4495_p4 = pmov %p4494_p11 }
  0x47   : > { %3580 = vsyncadd (%p4495_p4), [#allocation3], 4294967168  ;;  %p4496_p6 = pmov %p4495_p4 }
  0x48   : > { %p4497_p7 = pmov %p4495_p4 }
  0x49   : > { %3582 = dma.done.wait (%p4496_p6), [#allocation5], 16  }
  0x4a   : > { %3584 = vsyncadd (%p4497_p7), [#allocation5], 4294967280  ;;  %vm876_vm0 = vcmask 1043456   ;;  %s3757_s24 = sshll.u32 %s3667_s15, 7  ;;  %vm877_vm1 = vcmask 1044480   ;;  %v3633_v0 = vmov 65535  }
  0x4b   : > { %p206_p9 = scmp.lt.s32.totalorder %s3757_s24, 195  ;;  %v878_v1 = vsel %vm876_vm0, 4294967295, %v3633_v0  ;;  %vm683_vm2 = vcmask 72704   ;;  %v3411_v3 = vld [vmem:[#allocation2] sm:$0x1f]   ;;  %s198_s8 = sand.u32 1, %s3587_s12  }
  0x4c   : > { %v879_v2 = vsel %vm877_vm1, %v878_v1, 0  ;;  %s2693_s9 = sshll.u32 %s198_s8, 9  ;;  %vm2068_vm3 = vcmask 257024   ;;  %p4498_p12 = scmp.ne.s32.totalorder %s4490_s20, 0 }
  0x4d   : > { %s207_s21 = scalar_select %p206_p9, %s3757_s24, 195  ;;  %v881_v5 = vand.u32 %v3411_v3, %v879_v2 }
  0x4e   : > { %s3905_s12 = scalar_lea.vmem [#allocation6], %s2693_s9   ;;  %s2205_s10 = ssub.s32 (%p4498_p12), 196, %s3757_s24 }
  0x4f   : > { %s2695_s26 = sshll.u32 %s207_s21, 2  ;;  %3167 = vmatprep.subr.bf16.mxu0 %v881_v5  ;;  %3297 = vmatprep.subr.bf16.mxu1 %v881_v5  ;;  %s3099_s11 = sshll.u32 (%p4498_p12), %s3667_s15, 9 }
  0x50   : > { %s3764_s7 = scalar_lea.vmem %s4484_s0, %s2695_s26  ;;  %3168 = vmatpush3.bf16.msra.mxu0 %v881_v5  ;;  %3298 = vmatpush3.bf16.msra.mxu1 %v881_v5  ;;  %v3895_v5 = vld [vmem:[#allocation4] ss:$0 sm:$0xff]  ;;  %p2206_p13 = scmp.lt.s32.totalorder (%p4498_p12), %s2205_s10, 128 }
  0x51   : > { %v3412_v4 = vld [vmem:[%s3764_s7] sm:$0xff]   ;;  %v3414_v7 = vld [vmem:[%s3764_s7 + $0x8] sm:$0xff]   ;;  %v3416_v9 = vld [vmem:[%s3764_s7 + $0x10] sm:$0xff]   ;;  %s4292_s18 = scalar_lea.vmem (%p4498_p12), %s4487_s3, %s3099_s11  }
  0x52   : > { %v3413_v6 = vld [vmem:[%s3764_s7 + $0x100] sm:$0xff]   ;;  %3169 = vmatprep.mubr.msk.bf16.mxu0 %vm683_vm2, %v3412_v4  ;;  %v3415_v8 = vld [vmem:[%s3764_s7 + $0x108] sm:$0xff]   ;;  %v3417_v10 = vld [vmem:[%s3764_s7 + $0x110] sm:$0xff]  }
  0x53   : > { %3233 = vmatprep.mubr.msk.bf16.mxu1 %vm683_vm2, %v3413_v6  ;;  %3170 = vmatmul.mubr.msk.bf16.vlgmr.msra.gmra.mrb[0].mxu0 %vm683_vm2, %v3414_v7  ;;  %v3418_v11 = vld [vmem:[%s3764_s7 + $0x18] sm:$0xff]   ;;  %v3420_v13 = vld [vmem:[%s3764_s7 + $0x20] sm:$0xff]   ;;  %v3422_v15 = vld [vmem:[%s3764_s7 + $0x28] sm:$0xff]  }
  0x54   : > { %3234 = vmatmul.mubr.msk.bf16.vlgmr.msra.gmra.mrb[0].mxu1 %vm683_vm2, %v3415_v8  ;;  %3173 = vmatprep.mubr.msk.bf16.mxu0 %vm683_vm2, %v3416_v9  ;;  %v3419_v12 = vld [vmem:[%s3764_s7 + $0x118] sm:$0xff]   ;;  %v3421_v14 = vld [vmem:[%s3764_s7 + $0x120] sm:$0xff]   ;;  %v3423_v16 = vld [vmem:[%s3764_s7 + $0x128] sm:$0xff]  }
  0x55   : > { %3237 = vmatprep.mubr.msk.bf16.mxu1 %vm683_vm2, %v3417_v10  ;;  %v3424_v17 = vld [vmem:[%s3764_s7 + $0x30] sm:$0xff]   ;;  %v3426_v19 = vld [vmem:[%s3764_s7 + $0x38] sm:$0xff]   ;;  %v3428_v21 = vld [vmem:[%s3764_s7 + $0x40] sm:$0xff]  }
  0x56   : > { %v3425_v18 = vld [vmem:[%s3764_s7 + $0x130] sm:$0xff]   ;;  %v3427_v20 = vld [vmem:[%s3764_s7 + $0x138] sm:$0xff]   ;;  %v3429_v22 = vld [vmem:[%s3764_s7 + $0x140] sm:$0xff]  }
  0x57   : > { %v3430_v23 = vld [vmem:[%s3764_s7 + $0x48] sm:$0xff]   ;;  %v3432_v25 = vld [vmem:[%s3764_s7 + $0x50] sm:$0xff]   ;;  %v3434_v27 = vld [vmem:[%s3764_s7 + $0x58] sm:$0xff]  }
  0x58   : > { %v3431_v24 = vld [vmem:[%s3764_s7 + $0x148] sm:$0xff]   ;;  %v3433_v26 = vld [vmem:[%s3764_s7 + $0x150] sm:$0xff]   ;;  %v3435_v28 = vld [vmem:[%s3764_s7 + $0x158] sm:$0xff]  }
  0x59   : > { %v3436_v29 = vld [vmem:[%s3764_s7 + $0x60] sm:$0xff]   ;;  %v3438_v31 = vld [vmem:[%s3764_s7 + $0x68] sm:$0xff]   ;;  %v3440_v33 = vld [vmem:[%s3764_s7 + $0x70] sm:$0xff]  }
  0x5a   : > { %v3437_v30 = vld [vmem:[%s3764_s7 + $0x160] sm:$0xff]   ;;  %v3439_v32 = vld [vmem:[%s3764_s7 + $0x168] sm:$0xff]   ;;  %v3441_v34 = vld [vmem:[%s3764_s7 + $0x170] sm:$0xff]  }
  0x5b   : > { %3174 = vmatmul.mubr.msk.bf16.gmra.mrb[4].mxu0 %vm683_vm2, %v3418_v11  ;;  %v3442_v35 = vld [vmem:[%s3764_s7 + $0x78] sm:$0xff]   ;;  %v3444_v37 = vld [vmem:[%s3764_s7 + $0x80] sm:$0xff]   ;;  %v3446_v39 = vld [vmem:[%s3764_s7 + $0x88] sm:$0xff]  }
  0x5c   : > { %3238 = vmatmul.mubr.msk.bf16.gmra.mrb[4].mxu1 %vm683_vm2, %v3419_v12  ;;  %3177 = vmatprep.mubr.msk.bf16.mxu0 %vm683_vm2, %v3420_v13  ;;  %v3443_v36 = vld [vmem:[%s3764_s7 + $0x178] sm:$0xff]   ;;  %v3445_v38 = vld [vmem:[%s3764_s7 + $0x180] sm:$0xff]   ;;  %v3447_v40 = vld [vmem:[%s3764_s7 + $0x188] sm:$0xff]  }
  0x5d   : > { %3241 = vmatprep.mubr.msk.bf16.mxu1 %vm683_vm2, %v3421_v14  ;;  %v3448_v41 = vld [vmem:[%s3764_s7 + $0x90] sm:$0xff]   ;;  %v3450_v43 = vld [vmem:[%s3764_s7 + $0x98] sm:$0xff]   ;;  %v3452_v45 = vld [vmem:[%s3764_s7 + $0xa0] sm:$0xff]  }
  0x5e   : > { %v3449_v42 = vld [vmem:[%s3764_s7 + $0x190] sm:$0xff]   ;;  %v3451_v44 = vld [vmem:[%s3764_s7 + $0x198] sm:$0xff]   ;;  %v3453_v46 = vld [vmem:[%s3764_s7 + $0x1a0] sm:$0xff]  }
  0x5f   : > { %v3454_v47 = vld [vmem:[%s3764_s7 + $0xa8] sm:$0xff]   ;;  %v3456_v49 = vld [vmem:[%s3764_s7 + $0xb0] sm:$0xff]   ;;  %v3458_v51 = vld [vmem:[%s3764_s7 + $0xb8] sm:$0xff]  }
  0x60   : > { %v3455_v48 = vld [vmem:[%s3764_s7 + $0x1a8] sm:$0xff]   ;;  %v3457_v50 = vld [vmem:[%s3764_s7 + $0x1b0] sm:$0xff]   ;;  %v3459_v52 = vld [vmem:[%s3764_s7 + $0x1b8] sm:$0xff]  }
  0x61   : > { %v3460_v53 = vld [vmem:[%s3764_s7 + $0xc0] sm:$0xff]   ;;  %v3462_v55 = vld [vmem:[%s3764_s7 + $0xc8] sm:$0xff]   ;;  %v3464_v57 = vld [vmem:[%s3764_s7 + $0xd0] sm:$0xff]  }
  0x62   : > { %v3461_v54 = vld [vmem:[%s3764_s7 + $0x1c0] sm:$0xff]   ;;  %v3463_v56 = vld [vmem:[%s3764_s7 + $0x1c8] sm:$0xff]   ;;  %v3465_v58 = vld [vmem:[%s3764_s7 + $0x1d0] sm:$0xff]  }
  0x63   : > { %3178 = vmatmul.mubr.msk.bf16.gmra.mrb[8].mxu0 %vm683_vm2, %v3422_v15  ;;  %v3466_v59 = vld [vmem:[%s3764_s7 + $0xd8] sm:$0xff]   ;;  %v3468_v61 = vld [vmem:[%s3764_s7 + $0xe0] sm:$0xff]   ;;  %v3470_v63 = vld [vmem:[%s3764_s7 + $0xe8] sm:$0xff]  }
  0x64   : > { %3242 = vmatmul.mubr.msk.bf16.gmra.mrb[8].mxu1 %vm683_vm2, %v3423_v16  ;;  %3181 = vmatprep.mubr.msk.bf16.mxu0 %vm683_vm2, %v3424_v17  ;;  %v3467_v60 = vld [vmem:[%s3764_s7 + $0x1d8] sm:$0xff]   ;;  %v3469_v62 = vld [vmem:[%s3764_s7 + $0x1e0] sm:$0xff]   ;;  %v3471_v0 = vld [vmem:[%s3764_s7 + $0x1e8] sm:$0xff]  }
  0x65   : > { %3245 = vmatprep.mubr.msk.bf16.mxu1 %vm683_vm2, %v3425_v18  ;;  %v3472_v1 = vld [vmem:[%s3764_s7 + $0xf0] sm:$0xff]   ;;  %v3474_v3 = vld [vmem:[%s3764_s7 + $0xf8] sm:$0xff]  }
  0x66   : > { %v3473_v2 = vld [vmem:[%s3764_s7 + $0x1f0] sm:$0xff]   ;;  %v3475_v4 = vld [vmem:[%s3764_s7 + $0x1f8] sm:$0xff]  }
  0x6b   : > { %3182 = vmatmul.mubr.msk.bf16.gmra.mrb[12].mxu0 %vm683_vm2, %v3426_v19 }
  0x6c   : > { %3246 = vmatmul.mubr.msk.bf16.gmra.mrb[12].mxu1 %vm683_vm2, %v3427_v20  ;;  %3185 = vmatprep.mubr.msk.bf16.mxu0 %vm683_vm2, %v3428_v21 }
  0x6d   : > { %3249 = vmatprep.mubr.msk.bf16.mxu1 %vm683_vm2, %v3429_v22 }
  0x73   : > { %3186 = vmatmul.mubr.msk.bf16.gmra.mrb[16].mxu0 %vm683_vm2, %v3430_v23 }
  0x74   : > { %3250 = vmatmul.mubr.msk.bf16.gmra.mrb[16].mxu1 %vm683_vm2, %v3431_v24  ;;  %3189 = vmatprep.mubr.msk.bf16.mxu0 %vm683_vm2, %v3432_v25 }
  0x75   : > { %3253 = vmatprep.mubr.msk.bf16.mxu1 %vm683_vm2, %v3433_v26 }
  0x7b   : > { %3190 = vmatmul.mubr.msk.bf16.gmra.mrb[20].mxu0 %vm683_vm2, %v3434_v27 }
  0x7c   : > { %3254 = vmatmul.mubr.msk.bf16.gmra.mrb[20].mxu1 %vm683_vm2, %v3435_v28  ;;  %3193 = vmatprep.mubr.msk.bf16.mxu0 %vm683_vm2, %v3436_v29 }
  0x7d   : > { %3257 = vmatprep.mubr.msk.bf16.mxu1 %vm683_vm2, %v3437_v30 }
  0x83   : > { %3194 = vmatmul.mubr.msk.bf16.gmra.mrb[24].mxu0 %vm683_vm2, %v3438_v31 }
  0x84   : > { %3258 = vmatmul.mubr.msk.bf16.gmra.mrb[24].mxu1 %vm683_vm2, %v3439_v32  ;;  %3197 = vmatprep.mubr.msk.bf16.mxu0 %vm683_vm2, %v3440_v33 }
  0x85   : > { %3261 = vmatprep.mubr.msk.bf16.mxu1 %vm683_vm2, %v3441_v34 }
  0x8b   : > { %3198 = vmatmul.mubr.msk.bf16.gmra.mrb[28].mxu0 %vm683_vm2, %v3442_v35 }
  0x8c   : > { %3262 = vmatmul.mubr.msk.bf16.gmra.mrb[28].mxu1 %vm683_vm2, %v3443_v36  ;;  %3201 = vmatprep.mubr.msk.bf16.mxu0 %vm683_vm2, %v3444_v37 }
  0x8d   : > { %3265 = vmatprep.mubr.msk.bf16.mxu1 %vm683_vm2, %v3445_v38 }
  0x93   : > { %3202 = vmatmul.mubr.msk.bf16.gmra.mrb[32].mxu0 %vm683_vm2, %v3446_v39 }
  0x94   : > { %3266 = vmatmul.mubr.msk.bf16.gmra.mrb[32].mxu1 %vm683_vm2, %v3447_v40  ;;  %3205 = vmatprep.mubr.msk.bf16.mxu0 %vm683_vm2, %v3448_v41 }
  0x95   : > { %3269 = vmatprep.mubr.msk.bf16.mxu1 %vm683_vm2, %v3449_v42 }
  0x9b   : > { %3206 = vmatmul.mubr.msk.bf16.gmra.mrb[36].mxu0 %vm683_vm2, %v3450_v43 }
  0x9c   : > { %3270 = vmatmul.mubr.msk.bf16.gmra.mrb[36].mxu1 %vm683_vm2, %v3451_v44  ;;  %3209 = vmatprep.mubr.msk.bf16.mxu0 %vm683_vm2, %v3452_v45 }
  0x9d   : > { %3273 = vmatprep.mubr.msk.bf16.mxu1 %vm683_vm2, %v3453_v46 }
  0xa3   : > { %3210 = vmatmul.mubr.msk.bf16.gmra.mrb[40].mxu0 %vm683_vm2, %v3454_v47 }
  0xa4   : > { %3274 = vmatmul.mubr.msk.bf16.gmra.mrb[40].mxu1 %vm683_vm2, %v3455_v48  ;;  %3213 = vmatprep.mubr.msk.bf16.mxu0 %vm683_vm2, %v3456_v49 }
  0xa5   : > { %3277 = vmatprep.mubr.msk.bf16.mxu1 %vm683_vm2, %v3457_v50 }
  0xab   : > { %3214 = vmatmul.mubr.msk.bf16.gmra.mrb[44].mxu0 %vm683_vm2, %v3458_v51 }
  0xac   : > { %3278 = vmatmul.mubr.msk.bf16.gmra.mrb[44].mxu1 %vm683_vm2, %v3459_v52  ;;  %3217 = vmatprep.mubr.msk.bf16.mxu0 %vm683_vm2, %v3460_v53 }
  0xad   : > { %3281 = vmatprep.mubr.msk.bf16.mxu1 %vm683_vm2, %v3461_v54 }
  0xb3   : > { %3218 = vmatmul.mubr.msk.bf16.gmra.mrb[48].mxu0 %vm683_vm2, %v3462_v55 }
  0xb4   : > { %3282 = vmatmul.mubr.msk.bf16.gmra.mrb[48].mxu1 %vm683_vm2, %v3463_v56  ;;  %3221 = vmatprep.mubr.msk.bf16.mxu0 %vm683_vm2, %v3464_v57 }
  0xb5   : > { %3285 = vmatprep.mubr.msk.bf16.mxu1 %vm683_vm2, %v3465_v58 }
  0xbb   : > { %3222 = vmatmul.mubr.msk.bf16.gmra.mrb[52].mxu0 %vm683_vm2, %v3466_v59 }
  0xbc   : > { %3286 = vmatmul.mubr.msk.bf16.gmra.mrb[52].mxu1 %vm683_vm2, %v3467_v60  ;;  %3225 = vmatprep.mubr.msk.bf16.mxu0 %vm683_vm2, %v3468_v61 }
  0xbd   : > { %3289 = vmatprep.mubr.msk.bf16.mxu1 %vm683_vm2, %v3469_v62 }
  0xc3   : > { %3226 = vmatmul.mubr.msk.bf16.gmra.mrb[56].mxu0 %vm683_vm2, %v3470_v63 }
  0xc4   : > { %3290 = vmatmul.mubr.msk.bf16.gmra.mrb[56].mxu1 %vm683_vm2, %v3471_v0  ;;  %3229 = vmatprep.mubr.msk.bf16.mxu0 %vm683_vm2, %v3472_v1 }
  0xc5   : > { %3293 = vmatprep.mubr.msk.bf16.mxu1 %vm683_vm2, %v3473_v2 }
  0xcb   : > { %3230 = vmatmul.mubr.msk.bf16.gmra.mrb[60].mxu0 %vm683_vm2, %v3474_v3 }
  0xcc   : > { %3294 = vmatmul.mubr.msk.bf16.gmra.mrb[60].mxu1 %vm683_vm2, %v3475_v4 }
 0x126   : > { %v3171_v6 = vpop.f32.mrb[0].mxu0 }
 0x127   : > { %v3235_v7 = vpop.f32.mrb[0].mxu1  ;;  %v926_v8 = vadd.f32 %v3171_v6, %v3895_v5  ;;  %v917_v10 = vpop.f32.mrb[1].mxu0 }
 0x128   : > { %v1182_v9 = vadd.f32 %v3235_v7, %v3895_v5  ;;  %v1173_v11 = vpop.f32.mrb[1].mxu1  ;;  %v918_v12 = vadd.f32 %v3895_v5, %v917_v10  ;;  %v3172_v14 = vpop.f32.mrb[2].mxu0 }
 0x129   : > { %v1174_v13 = vadd.f32 %v3895_v5, %v1173_v11  ;;  %v3236_v15 = vpop.f32.mrb[2].mxu1  ;;  %v1430_v16 = vmax.f32 %v926_v8, 0.0  ;;  %v929_v18 = vadd.f32 %v3172_v14, %v3895_v5  ;;  %v920_v20 = vpop.f32.mrb[3].mxu0 }
 0x12a   : > { %v1494_v17 = vmax.f32 %v1182_v9, 0.0  ;;  %v1185_v19 = vadd.f32 %v3236_v15, %v3895_v5  ;;  %v1176_v21 = vpop.f32.mrb[3].mxu1  ;;  %v1428_v22 = vmax.f32 %v918_v12, 0.0  ;;  %v921_v24 = vadd.f32 %v3895_v5, %v920_v20 }
 0x12b   : > { %v1492_v23 = vmax.f32 %v1174_v13, 0.0  ;;  %v1177_v25 = vadd.f32 %v3895_v5, %v1176_v21  ;;  %v2973_v26 = vpack.c.bf16 %v1430_v16, %v1430_v16  ;;  %v1431_v28 = vmax.f32 %v929_v18, 0.0 }
 0x12c   : > { %v3037_v27 = vpack.c.bf16 %v1494_v17, %v1494_v17  ;;  %v1495_v29 = vmax.f32 %v1185_v19, 0.0  ;;  %v2971_v30 = vpack.c.bf16 %v1428_v22, %v1428_v22  ;;  %v1429_v32 = vmax.f32 %v921_v24, 0.0 }
 0x12d   : > { %v3035_v31 = vpack.c.bf16 %v1492_v23, %v1492_v23  ;;  %v1493_v33 = vmax.f32 %v1177_v25, 0.0  ;;  %2071 = vst.msk [vmem:[%s3905_s12 + $0x8] sm:$0xf] %vm2068_vm3, %v2973_v26  ;;  %v2974_v34 = vpack.c.bf16 %v1431_v28, %v1431_v28 }
 0x12e   : > { %2135 = vst.msk [vmem:[%s3905_s12 + $0x108] sm:$0xf] %vm2068_vm3, %v3037_v27  ;;  %v3038_v35 = vpack.c.bf16 %v1495_v29, %v1495_v29  ;;  %2069 = vst.msk [vmem:[%s3905_s12] sm:$0xf] %vm2068_vm3, %v2971_v30  ;;  %v2972_v36 = vpack.c.bf16 %v1429_v32, %v1429_v32  ;;  %v3175_v38 = vpop.f32.mrb[4].mxu0 }
 0x12f   : > { %2133 = vst.msk [vmem:[%s3905_s12 + $0x100] sm:$0xf] %vm2068_vm3, %v3035_v31  ;;  %v3036_v37 = vpack.c.bf16 %v1493_v33, %v1493_v33  ;;  %v3239_v39 = vpop.f32.mrb[4].mxu1  ;;  %2072 = vst.msk [vmem:[%s3905_s12 + $0xc] sm:$0xf] %vm2068_vm3, %v2974_v34  ;;  %v942_v40 = vadd.f32 %v3175_v38, %v3895_v5  ;;  %v933_v42 = vpop.f32.mrb[5].mxu0 }
 0x130   : > { %2136 = vst.msk [vmem:[%s3905_s12 + $0x10c] sm:$0xf] %vm2068_vm3, %v3038_v35  ;;  %v1198_v41 = vadd.f32 %v3239_v39, %v3895_v5  ;;  %v1189_v43 = vpop.f32.mrb[5].mxu1  ;;  %2070 = vst.msk [vmem:[%s3905_s12 + $0x4] sm:$0xf] %vm2068_vm3, %v2972_v36  ;;  %v934_v44 = vadd.f32 %v3895_v5, %v933_v42  ;;  %v3176_v46 = vpop.f32.mrb[6].mxu0 }
 0x131   : > { %2134 = vst.msk [vmem:[%s3905_s12 + $0x104] sm:$0xf] %vm2068_vm3, %v3036_v37  ;;  %v1190_v45 = vadd.f32 %v3895_v5, %v1189_v43  ;;  %v3240_v47 = vpop.f32.mrb[6].mxu1  ;;  %v1434_v48 = vmax.f32 %v942_v40, 0.0  ;;  %v945_v50 = vadd.f32 %v3176_v46, %v3895_v5  ;;  %v936_v52 = vpop.f32.mrb[7].mxu0 }
 0x132   : > { %v1498_v49 = vmax.f32 %v1198_v41, 0.0  ;;  %v1201_v51 = vadd.f32 %v3240_v47, %v3895_v5  ;;  %v1192_v53 = vpop.f32.mrb[7].mxu1  ;;  %v1432_v54 = vmax.f32 %v934_v44, 0.0  ;;  %v937_v56 = vadd.f32 %v3895_v5, %v936_v52 }
 0x133   : > { %v1496_v55 = vmax.f32 %v1190_v45, 0.0  ;;  %v1193_v57 = vadd.f32 %v3895_v5, %v1192_v53  ;;  %v2977_v58 = vpack.c.bf16 %v1434_v48, %v1434_v48  ;;  %v1435_v60 = vmax.f32 %v945_v50, 0.0 }
 0x134   : > { %v3041_v59 = vpack.c.bf16 %v1498_v49, %v1498_v49  ;;  %v1499_v61 = vmax.f32 %v1201_v51, 0.0  ;;  %v2975_v62 = vpack.c.bf16 %v1432_v54, %v1432_v54  ;;  %v1433_v0 = vmax.f32 %v937_v56, 0.0 }
 0x135   : > { %v3039_v63 = vpack.c.bf16 %v1496_v55, %v1496_v55  ;;  %v1497_v1 = vmax.f32 %v1193_v57, 0.0  ;;  %2075 = vst.msk [vmem:[%s3905_s12 + $0x18] sm:$0xf] %vm2068_vm3, %v2977_v58  ;;  %v2978_v2 = vpack.c.bf16 %v1435_v60, %v1435_v60 }
 0x136   : > { %2139 = vst.msk [vmem:[%s3905_s12 + $0x118] sm:$0xf] %vm2068_vm3, %v3041_v59  ;;  %v3042_v3 = vpack.c.bf16 %v1499_v61, %v1499_v61  ;;  %2073 = vst.msk [vmem:[%s3905_s12 + $0x10] sm:$0xf] %vm2068_vm3, %v2975_v62  ;;  %v2976_v4 = vpack.c.bf16 %v1433_v0, %v1433_v0  ;;  %v3179_v7 = vpop.f32.mrb[8].mxu0 }
 0x137   : > { %2137 = vst.msk [vmem:[%s3905_s12 + $0x110] sm:$0xf] %vm2068_vm3, %v3039_v63  ;;  %v3040_v6 = vpack.c.bf16 %v1497_v1, %v1497_v1  ;;  %v3243_v8 = vpop.f32.mrb[8].mxu1  ;;  %2076 = vst.msk [vmem:[%s3905_s12 + $0x1c] sm:$0xf] %vm2068_vm3, %v2978_v2  ;;  %v958_v9 = vadd.f32 %v3179_v7, %v3895_v5  ;;  %v949_v11 = vpop.f32.mrb[9].mxu0 }
 0x138   : > { %2140 = vst.msk [vmem:[%s3905_s12 + $0x11c] sm:$0xf] %vm2068_vm3, %v3042_v3  ;;  %v1214_v10 = vadd.f32 %v3243_v8, %v3895_v5  ;;  %v1205_v12 = vpop.f32.mrb[9].mxu1  ;;  %2074 = vst.msk [vmem:[%s3905_s12 + $0x14] sm:$0xf] %vm2068_vm3, %v2976_v4  ;;  %v950_v13 = vadd.f32 %v3895_v5, %v949_v11  ;;  %v3180_v15 = vpop.f32.mrb[10].mxu0 }
 0x139   : > { %2138 = vst.msk [vmem:[%s3905_s12 + $0x114] sm:$0xf] %vm2068_vm3, %v3040_v6  ;;  %v1206_v14 = vadd.f32 %v3895_v5, %v1205_v12  ;;  %v3244_v16 = vpop.f32.mrb[10].mxu1  ;;  %v1438_v17 = vmax.f32 %v958_v9, 0.0  ;;  %v961_v19 = vadd.f32 %v3180_v15, %v3895_v5  ;;  %v952_v21 = vpop.f32.mrb[11].mxu0 }
 0x13a   : > { %v1502_v18 = vmax.f32 %v1214_v10, 0.0  ;;  %v1217_v20 = vadd.f32 %v3244_v16, %v3895_v5  ;;  %v1208_v22 = vpop.f32.mrb[11].mxu1  ;;  %v1436_v23 = vmax.f32 %v950_v13, 0.0  ;;  %v953_v25 = vadd.f32 %v3895_v5, %v952_v21 }
 0x13b   : > { %v1500_v24 = vmax.f32 %v1206_v14, 0.0  ;;  %v1209_v26 = vadd.f32 %v3895_v5, %v1208_v22  ;;  %v2981_v27 = vpack.c.bf16 %v1438_v17, %v1438_v17  ;;  %v1439_v29 = vmax.f32 %v961_v19, 0.0 }
 0x13c   : > { %v3045_v28 = vpack.c.bf16 %v1502_v18, %v1502_v18  ;;  %v1503_v30 = vmax.f32 %v1217_v20, 0.0  ;;  %v2979_v31 = vpack.c.bf16 %v1436_v23, %v1436_v23  ;;  %v1437_v33 = vmax.f32 %v953_v25, 0.0 }
 0x13d   : > { %v3043_v32 = vpack.c.bf16 %v1500_v24, %v1500_v24  ;;  %v1501_v34 = vmax.f32 %v1209_v26, 0.0  ;;  %2079 = vst.msk [vmem:[%s3905_s12 + $0x28] sm:$0xf] %vm2068_vm3, %v2981_v27  ;;  %v2982_v35 = vpack.c.bf16 %v1439_v29, %v1439_v29 }
 0x13e   : > { %2143 = vst.msk [vmem:[%s3905_s12 + $0x128] sm:$0xf] %vm2068_vm3, %v3045_v28  ;;  %v3046_v36 = vpack.c.bf16 %v1503_v30, %v1503_v30  ;;  %2077 = vst.msk [vmem:[%s3905_s12 + $0x20] sm:$0xf] %vm2068_vm3, %v2979_v31  ;;  %v2980_v37 = vpack.c.bf16 %v1437_v33, %v1437_v33  ;;  %v3183_v39 = vpop.f32.mrb[12].mxu0 }
 0x13f   : > { %2141 = vst.msk [vmem:[%s3905_s12 + $0x120] sm:$0xf] %vm2068_vm3, %v3043_v32  ;;  %v3044_v38 = vpack.c.bf16 %v1501_v34, %v1501_v34  ;;  %v3247_v40 = vpop.f32.mrb[12].mxu1  ;;  %2080 = vst.msk [vmem:[%s3905_s12 + $0x2c] sm:$0xf] %vm2068_vm3, %v2982_v35  ;;  %v974_v41 = vadd.f32 %v3183_v39, %v3895_v5  ;;  %v965_v43 = vpop.f32.mrb[13].mxu0 }
 0x140   : > { %2144 = vst.msk [vmem:[%s3905_s12 + $0x12c] sm:$0xf] %vm2068_vm3, %v3046_v36  ;;  %v1230_v42 = vadd.f32 %v3247_v40, %v3895_v5  ;;  %v1221_v44 = vpop.f32.mrb[13].mxu1  ;;  %2078 = vst.msk [vmem:[%s3905_s12 + $0x24] sm:$0xf] %vm2068_vm3, %v2980_v37  ;;  %v966_v45 = vadd.f32 %v3895_v5, %v965_v43  ;;  %v3184_v47 = vpop.f32.mrb[14].mxu0 }
 0x141   : > { %2142 = vst.msk [vmem:[%s3905_s12 + $0x124] sm:$0xf] %vm2068_vm3, %v3044_v38  ;;  %v1222_v46 = vadd.f32 %v3895_v5, %v1221_v44  ;;  %v3248_v48 = vpop.f32.mrb[14].mxu1  ;;  %v1442_v49 = vmax.f32 %v974_v41, 0.0  ;;  %v977_v51 = vadd.f32 %v3184_v47, %v3895_v5  ;;  %v968_v53 = vpop.f32.mrb[15].mxu0 }
 0x142   : > { %v1506_v50 = vmax.f32 %v1230_v42, 0.0  ;;  %v1233_v52 = vadd.f32 %v3248_v48, %v3895_v5  ;;  %v1224_v54 = vpop.f32.mrb[15].mxu1  ;;  %v1440_v55 = vmax.f32 %v966_v45, 0.0  ;;  %v969_v57 = vadd.f32 %v3895_v5, %v968_v53 }
 0x143   : > { %v1504_v56 = vmax.f32 %v1222_v46, 0.0  ;;  %v1225_v58 = vadd.f32 %v3895_v5, %v1224_v54  ;;  %v2985_v59 = vpack.c.bf16 %v1442_v49, %v1442_v49  ;;  %v1443_v61 = vmax.f32 %v977_v51, 0.0 }
 0x144   : > { %v3049_v60 = vpack.c.bf16 %v1506_v50, %v1506_v50  ;;  %v1507_v62 = vmax.f32 %v1233_v52, 0.0  ;;  %v2983_v63 = vpack.c.bf16 %v1440_v55, %v1440_v55  ;;  %v1441_v1 = vmax.f32 %v969_v57, 0.0 }
 0x145   : > { %v3047_v0 = vpack.c.bf16 %v1504_v56, %v1504_v56  ;;  %v1505_v2 = vmax.f32 %v1225_v58, 0.0  ;;  %2083 = vst.msk [vmem:[%s3905_s12 + $0x38] sm:$0xf] %vm2068_vm3, %v2985_v59  ;;  %v2986_v3 = vpack.c.bf16 %v1443_v61, %v1443_v61 }
 0x146   : > { %2147 = vst.msk [vmem:[%s3905_s12 + $0x138] sm:$0xf] %vm2068_vm3, %v3049_v60  ;;  %v3050_v4 = vpack.c.bf16 %v1507_v62, %v1507_v62  ;;  %2081 = vst.msk [vmem:[%s3905_s12 + $0x30] sm:$0xf] %vm2068_vm3, %v2983_v63  ;;  %v2984_v6 = vpack.c.bf16 %v1441_v1, %v1441_v1  ;;  %v3187_v8 = vpop.f32.mrb[16].mxu0 }
 0x147   : > { %2145 = vst.msk [vmem:[%s3905_s12 + $0x130] sm:$0xf] %vm2068_vm3, %v3047_v0  ;;  %v3048_v7 = vpack.c.bf16 %v1505_v2, %v1505_v2  ;;  %v3251_v9 = vpop.f32.mrb[16].mxu1  ;;  %2084 = vst.msk [vmem:[%s3905_s12 + $0x3c] sm:$0xf] %vm2068_vm3, %v2986_v3  ;;  %v990_v10 = vadd.f32 %v3187_v8, %v3895_v5  ;;  %v981_v12 = vpop.f32.mrb[17].mxu0 }
 0x148   : > { %2148 = vst.msk [vmem:[%s3905_s12 + $0x13c] sm:$0xf] %vm2068_vm3, %v3050_v4  ;;  %v1246_v11 = vadd.f32 %v3251_v9, %v3895_v5  ;;  %v1237_v13 = vpop.f32.mrb[17].mxu1  ;;  %2082 = vst.msk [vmem:[%s3905_s12 + $0x34] sm:$0xf] %vm2068_vm3, %v2984_v6  ;;  %v982_v14 = vadd.f32 %v3895_v5, %v981_v12  ;;  %v3188_v16 = vpop.f32.mrb[18].mxu0 }
 0x149   : > { %2146 = vst.msk [vmem:[%s3905_s12 + $0x134] sm:$0xf] %vm2068_vm3, %v3048_v7  ;;  %v1238_v15 = vadd.f32 %v3895_v5, %v1237_v13  ;;  %v3252_v17 = vpop.f32.mrb[18].mxu1  ;;  %v1446_v18 = vmax.f32 %v990_v10, 0.0  ;;  %v993_v20 = vadd.f32 %v3188_v16, %v3895_v5  ;;  %v984_v22 = vpop.f32.mrb[19].mxu0 }
 0x14a   : > { %v1510_v19 = vmax.f32 %v1246_v11, 0.0  ;;  %v1249_v21 = vadd.f32 %v3252_v17, %v3895_v5  ;;  %v1240_v23 = vpop.f32.mrb[19].mxu1  ;;  %v1444_v24 = vmax.f32 %v982_v14, 0.0  ;;  %v985_v26 = vadd.f32 %v3895_v5, %v984_v22 }
 0x14b   : > { %v1508_v25 = vmax.f32 %v1238_v15, 0.0  ;;  %v1241_v27 = vadd.f32 %v3895_v5, %v1240_v23  ;;  %v2989_v28 = vpack.c.bf16 %v1446_v18, %v1446_v18  ;;  %v1447_v30 = vmax.f32 %v993_v20, 0.0 }
 0x14c   : > { %v3053_v29 = vpack.c.bf16 %v1510_v19, %v1510_v19  ;;  %v1511_v31 = vmax.f32 %v1249_v21, 0.0  ;;  %v2987_v32 = vpack.c.bf16 %v1444_v24, %v1444_v24  ;;  %v1445_v34 = vmax.f32 %v985_v26, 0.0 }
 0x14d   : > { %v3051_v33 = vpack.c.bf16 %v1508_v25, %v1508_v25  ;;  %v1509_v35 = vmax.f32 %v1241_v27, 0.0  ;;  %2087 = vst.msk [vmem:[%s3905_s12 + $0x48] sm:$0xf] %vm2068_vm3, %v2989_v28  ;;  %v2990_v36 = vpack.c.bf16 %v1447_v30, %v1447_v30 }
 0x14e   : > { %2151 = vst.msk [vmem:[%s3905_s12 + $0x148] sm:$0xf] %vm2068_vm3, %v3053_v29  ;;  %v3054_v37 = vpack.c.bf16 %v1511_v31, %v1511_v31  ;;  %2085 = vst.msk [vmem:[%s3905_s12 + $0x40] sm:$0xf] %vm2068_vm3, %v2987_v32  ;;  %v2988_v38 = vpack.c.bf16 %v1445_v34, %v1445_v34  ;;  %v3191_v40 = vpop.f32.mrb[20].mxu0 }
 0x14f   : > { %2149 = vst.msk [vmem:[%s3905_s12 + $0x140] sm:$0xf] %vm2068_vm3, %v3051_v33  ;;  %v3052_v39 = vpack.c.bf16 %v1509_v35, %v1509_v35  ;;  %v3255_v41 = vpop.f32.mrb[20].mxu1  ;;  %2088 = vst.msk [vmem:[%s3905_s12 + $0x4c] sm:$0xf] %vm2068_vm3, %v2990_v36  ;;  %v1006_v42 = vadd.f32 %v3191_v40, %v3895_v5  ;;  %v997_v44 = vpop.f32.mrb[21].mxu0 }
 0x150   : > { %2152 = vst.msk [vmem:[%s3905_s12 + $0x14c] sm:$0xf] %vm2068_vm3, %v3054_v37  ;;  %v1262_v43 = vadd.f32 %v3255_v41, %v3895_v5  ;;  %v1253_v45 = vpop.f32.mrb[21].mxu1  ;;  %2086 = vst.msk [vmem:[%s3905_s12 + $0x44] sm:$0xf] %vm2068_vm3, %v2988_v38  ;;  %v998_v46 = vadd.f32 %v3895_v5, %v997_v44  ;;  %v3192_v48 = vpop.f32.mrb[22].mxu0 }
 0x151   : > { %2150 = vst.msk [vmem:[%s3905_s12 + $0x144] sm:$0xf] %vm2068_vm3, %v3052_v39  ;;  %v1254_v47 = vadd.f32 %v3895_v5, %v1253_v45  ;;  %v3256_v49 = vpop.f32.mrb[22].mxu1  ;;  %v1450_v50 = vmax.f32 %v1006_v42, 0.0  ;;  %v1009_v52 = vadd.f32 %v3192_v48, %v3895_v5  ;;  %v1000_v54 = vpop.f32.mrb[23].mxu0 }
 0x152   : > { %v1514_v51 = vmax.f32 %v1262_v43, 0.0  ;;  %v1265_v53 = vadd.f32 %v3256_v49, %v3895_v5  ;;  %v1256_v55 = vpop.f32.mrb[23].mxu1  ;;  %v1448_v56 = vmax.f32 %v998_v46, 0.0  ;;  %v1001_v58 = vadd.f32 %v3895_v5, %v1000_v54 }
 0x153   : > { %v1512_v57 = vmax.f32 %v1254_v47, 0.0  ;;  %v1257_v59 = vadd.f32 %v3895_v5, %v1256_v55  ;;  %v2993_v60 = vpack.c.bf16 %v1450_v50, %v1450_v50  ;;  %v1451_v62 = vmax.f32 %v1009_v52, 0.0 }
 0x154   : > { %v3057_v61 = vpack.c.bf16 %v1514_v51, %v1514_v51  ;;  %v1515_v63 = vmax.f32 %v1265_v53, 0.0  ;;  %v2991_v0 = vpack.c.bf16 %v1448_v56, %v1448_v56  ;;  %v1449_v2 = vmax.f32 %v1001_v58, 0.0 }
 0x155   : > { %v3055_v1 = vpack.c.bf16 %v1512_v57, %v1512_v57  ;;  %v1513_v3 = vmax.f32 %v1257_v59, 0.0  ;;  %2091 = vst.msk [vmem:[%s3905_s12 + $0x58] sm:$0xf] %vm2068_vm3, %v2993_v60  ;;  %v2994_v4 = vpack.c.bf16 %v1451_v62, %v1451_v62 }
 0x156   : > { %2155 = vst.msk [vmem:[%s3905_s12 + $0x158] sm:$0xf] %vm2068_vm3, %v3057_v61  ;;  %v3058_v6 = vpack.c.bf16 %v1515_v63, %v1515_v63  ;;  %2089 = vst.msk [vmem:[%s3905_s12 + $0x50] sm:$0xf] %vm2068_vm3, %v2991_v0  ;;  %v2992_v7 = vpack.c.bf16 %v1449_v2, %v1449_v2  ;;  %v3195_v9 = vpop.f32.mrb[24].mxu0 }
 0x157   : > { %2153 = vst.msk [vmem:[%s3905_s12 + $0x150] sm:$0xf] %vm2068_vm3, %v3055_v1  ;;  %v3056_v8 = vpack.c.bf16 %v1513_v3, %v1513_v3  ;;  %v3259_v10 = vpop.f32.mrb[24].mxu1  ;;  %2092 = vst.msk [vmem:[%s3905_s12 + $0x5c] sm:$0xf] %vm2068_vm3, %v2994_v4  ;;  %v1022_v11 = vadd.f32 %v3195_v9, %v3895_v5  ;;  %v1013_v13 = vpop.f32.mrb[25].mxu0 }
 0x158   : > { %2156 = vst.msk [vmem:[%s3905_s12 + $0x15c] sm:$0xf] %vm2068_vm3, %v3058_v6  ;;  %v1278_v12 = vadd.f32 %v3259_v10, %v3895_v5  ;;  %v1269_v14 = vpop.f32.mrb[25].mxu1  ;;  %2090 = vst.msk [vmem:[%s3905_s12 + $0x54] sm:$0xf] %vm2068_vm3, %v2992_v7  ;;  %v1014_v15 = vadd.f32 %v3895_v5, %v1013_v13  ;;  %v3196_v17 = vpop.f32.mrb[26].mxu0 }
 0x159   : > { %2154 = vst.msk [vmem:[%s3905_s12 + $0x154] sm:$0xf] %vm2068_vm3, %v3056_v8  ;;  %v1270_v16 = vadd.f32 %v3895_v5, %v1269_v14  ;;  %v3260_v18 = vpop.f32.mrb[26].mxu1  ;;  %v1454_v19 = vmax.f32 %v1022_v11, 0.0  ;;  %v1025_v21 = vadd.f32 %v3196_v17, %v3895_v5  ;;  %v1016_v23 = vpop.f32.mrb[27].mxu0 }
 0x15a   : > { %v1518_v20 = vmax.f32 %v1278_v12, 0.0  ;;  %v1281_v22 = vadd.f32 %v3260_v18, %v3895_v5  ;;  %v1272_v24 = vpop.f32.mrb[27].mxu1  ;;  %v1452_v25 = vmax.f32 %v1014_v15, 0.0  ;;  %v1017_v27 = vadd.f32 %v3895_v5, %v1016_v23 }
 0x15b   : > { %v1516_v26 = vmax.f32 %v1270_v16, 0.0  ;;  %v1273_v28 = vadd.f32 %v3895_v5, %v1272_v24  ;;  %v2997_v29 = vpack.c.bf16 %v1454_v19, %v1454_v19  ;;  %v1455_v31 = vmax.f32 %v1025_v21, 0.0 }
 0x15c   : > { %v3061_v30 = vpack.c.bf16 %v1518_v20, %v1518_v20  ;;  %v1519_v32 = vmax.f32 %v1281_v22, 0.0  ;;  %v2995_v33 = vpack.c.bf16 %v1452_v25, %v1452_v25  ;;  %v1453_v35 = vmax.f32 %v1017_v27, 0.0 }
 0x15d   : > { %v3059_v34 = vpack.c.bf16 %v1516_v26, %v1516_v26  ;;  %v1517_v36 = vmax.f32 %v1273_v28, 0.0  ;;  %2095 = vst.msk [vmem:[%s3905_s12 + $0x68] sm:$0xf] %vm2068_vm3, %v2997_v29  ;;  %v2998_v37 = vpack.c.bf16 %v1455_v31, %v1455_v31 }
 0x15e   : > { %2159 = vst.msk [vmem:[%s3905_s12 + $0x168] sm:$0xf] %vm2068_vm3, %v3061_v30  ;;  %v3062_v38 = vpack.c.bf16 %v1519_v32, %v1519_v32  ;;  %2093 = vst.msk [vmem:[%s3905_s12 + $0x60] sm:$0xf] %vm2068_vm3, %v2995_v33  ;;  %v2996_v39 = vpack.c.bf16 %v1453_v35, %v1453_v35  ;;  %v3199_v41 = vpop.f32.mrb[28].mxu0 }
 0x15f   : > { %2157 = vst.msk [vmem:[%s3905_s12 + $0x160] sm:$0xf] %vm2068_vm3, %v3059_v34  ;;  %v3060_v40 = vpack.c.bf16 %v1517_v36, %v1517_v36  ;;  %v3263_v42 = vpop.f32.mrb[28].mxu1  ;;  %2096 = vst.msk [vmem:[%s3905_s12 + $0x6c] sm:$0xf] %vm2068_vm3, %v2998_v37  ;;  %v1038_v43 = vadd.f32 %v3199_v41, %v3895_v5  ;;  %v1029_v45 = vpop.f32.mrb[29].mxu0 }
 0x160   : > { %2160 = vst.msk [vmem:[%s3905_s12 + $0x16c] sm:$0xf] %vm2068_vm3, %v3062_v38  ;;  %v1294_v44 = vadd.f32 %v3263_v42, %v3895_v5  ;;  %v1285_v46 = vpop.f32.mrb[29].mxu1  ;;  %2094 = vst.msk [vmem:[%s3905_s12 + $0x64] sm:$0xf] %vm2068_vm3, %v2996_v39  ;;  %v1030_v47 = vadd.f32 %v3895_v5, %v1029_v45  ;;  %v3200_v49 = vpop.f32.mrb[30].mxu0 }
 0x161   : > { %2158 = vst.msk [vmem:[%s3905_s12 + $0x164] sm:$0xf] %vm2068_vm3, %v3060_v40  ;;  %v1286_v48 = vadd.f32 %v3895_v5, %v1285_v46  ;;  %v3264_v50 = vpop.f32.mrb[30].mxu1  ;;  %v1458_v51 = vmax.f32 %v1038_v43, 0.0  ;;  %v1041_v53 = vadd.f32 %v3200_v49, %v3895_v5  ;;  %v1032_v55 = vpop.f32.mrb[31].mxu0 }
 0x162   : > { %v1522_v52 = vmax.f32 %v1294_v44, 0.0  ;;  %v1297_v54 = vadd.f32 %v3264_v50, %v3895_v5  ;;  %v1288_v56 = vpop.f32.mrb[31].mxu1  ;;  %v1456_v57 = vmax.f32 %v1030_v47, 0.0  ;;  %v1033_v59 = vadd.f32 %v3895_v5, %v1032_v55 }
 0x163   : > { %v1520_v58 = vmax.f32 %v1286_v48, 0.0  ;;  %v1289_v60 = vadd.f32 %v3895_v5, %v1288_v56  ;;  %v3001_v61 = vpack.c.bf16 %v1458_v51, %v1458_v51  ;;  %v1459_v63 = vmax.f32 %v1041_v53, 0.0 }
 0x164   : > { %v3065_v62 = vpack.c.bf16 %v1522_v52, %v1522_v52  ;;  %v1523_v0 = vmax.f32 %v1297_v54, 0.0  ;;  %v2999_v1 = vpack.c.bf16 %v1456_v57, %v1456_v57  ;;  %v1457_v3 = vmax.f32 %v1033_v59, 0.0 }
 0x165   : > { %v3063_v2 = vpack.c.bf16 %v1520_v58, %v1520_v58  ;;  %v1521_v4 = vmax.f32 %v1289_v60, 0.0  ;;  %2099 = vst.msk [vmem:[%s3905_s12 + $0x78] sm:$0xf] %vm2068_vm3, %v3001_v61  ;;  %v3002_v6 = vpack.c.bf16 %v1459_v63, %v1459_v63 }
 0x166   : > { %2163 = vst.msk [vmem:[%s3905_s12 + $0x178] sm:$0xf] %vm2068_vm3, %v3065_v62  ;;  %v3066_v7 = vpack.c.bf16 %v1523_v0, %v1523_v0  ;;  %2097 = vst.msk [vmem:[%s3905_s12 + $0x70] sm:$0xf] %vm2068_vm3, %v2999_v1  ;;  %v3000_v8 = vpack.c.bf16 %v1457_v3, %v1457_v3  ;;  %v3203_v10 = vpop.f32.mrb[32].mxu0 }
 0x167   : > { %2161 = vst.msk [vmem:[%s3905_s12 + $0x170] sm:$0xf] %vm2068_vm3, %v3063_v2  ;;  %v3064_v9 = vpack.c.bf16 %v1521_v4, %v1521_v4  ;;  %v3267_v11 = vpop.f32.mrb[32].mxu1  ;;  %2100 = vst.msk [vmem:[%s3905_s12 + $0x7c] sm:$0xf] %vm2068_vm3, %v3002_v6  ;;  %v1054_v12 = vadd.f32 %v3203_v10, %v3895_v5  ;;  %v1045_v14 = vpop.f32.mrb[33].mxu0 }
 0x168   : > { %2164 = vst.msk [vmem:[%s3905_s12 + $0x17c] sm:$0xf] %vm2068_vm3, %v3066_v7  ;;  %v1310_v13 = vadd.f32 %v3267_v11, %v3895_v5  ;;  %v1301_v15 = vpop.f32.mrb[33].mxu1  ;;  %2098 = vst.msk [vmem:[%s3905_s12 + $0x74] sm:$0xf] %vm2068_vm3, %v3000_v8  ;;  %v1046_v16 = vadd.f32 %v3895_v5, %v1045_v14  ;;  %v3204_v18 = vpop.f32.mrb[34].mxu0 }
 0x169   : > { %2162 = vst.msk [vmem:[%s3905_s12 + $0x174] sm:$0xf] %vm2068_vm3, %v3064_v9  ;;  %v1302_v17 = vadd.f32 %v3895_v5, %v1301_v15  ;;  %v3268_v19 = vpop.f32.mrb[34].mxu1  ;;  %v1462_v20 = vmax.f32 %v1054_v12, 0.0  ;;  %v1057_v22 = vadd.f32 %v3204_v18, %v3895_v5  ;;  %v1048_v24 = vpop.f32.mrb[35].mxu0 }
 0x16a   : > { %v1526_v21 = vmax.f32 %v1310_v13, 0.0  ;;  %v1313_v23 = vadd.f32 %v3268_v19, %v3895_v5  ;;  %v1304_v25 = vpop.f32.mrb[35].mxu1  ;;  %v1460_v26 = vmax.f32 %v1046_v16, 0.0  ;;  %v1049_v28 = vadd.f32 %v3895_v5, %v1048_v24 }
 0x16b   : > { %v1524_v27 = vmax.f32 %v1302_v17, 0.0  ;;  %v1305_v29 = vadd.f32 %v3895_v5, %v1304_v25  ;;  %v3005_v30 = vpack.c.bf16 %v1462_v20, %v1462_v20  ;;  %v1463_v32 = vmax.f32 %v1057_v22, 0.0 }
 0x16c   : > { %v3069_v31 = vpack.c.bf16 %v1526_v21, %v1526_v21  ;;  %v1527_v33 = vmax.f32 %v1313_v23, 0.0  ;;  %v3003_v34 = vpack.c.bf16 %v1460_v26, %v1460_v26  ;;  %v1461_v36 = vmax.f32 %v1049_v28, 0.0 }
 0x16d   : > { %v3067_v35 = vpack.c.bf16 %v1524_v27, %v1524_v27  ;;  %v1525_v37 = vmax.f32 %v1305_v29, 0.0  ;;  %2103 = vst.msk [vmem:[%s3905_s12 + $0x88] sm:$0xf] %vm2068_vm3, %v3005_v30  ;;  %v3006_v38 = vpack.c.bf16 %v1463_v32, %v1463_v32 }
 0x16e   : > { %2167 = vst.msk [vmem:[%s3905_s12 + $0x188] sm:$0xf] %vm2068_vm3, %v3069_v31  ;;  %v3070_v39 = vpack.c.bf16 %v1527_v33, %v1527_v33  ;;  %2101 = vst.msk [vmem:[%s3905_s12 + $0x80] sm:$0xf] %vm2068_vm3, %v3003_v34  ;;  %v3004_v40 = vpack.c.bf16 %v1461_v36, %v1461_v36  ;;  %v3207_v42 = vpop.f32.mrb[36].mxu0 }
 0x16f   : > { %2165 = vst.msk [vmem:[%s3905_s12 + $0x180] sm:$0xf] %vm2068_vm3, %v3067_v35  ;;  %v3068_v41 = vpack.c.bf16 %v1525_v37, %v1525_v37  ;;  %v3271_v43 = vpop.f32.mrb[36].mxu1  ;;  %2104 = vst.msk [vmem:[%s3905_s12 + $0x8c] sm:$0xf] %vm2068_vm3, %v3006_v38  ;;  %v1070_v44 = vadd.f32 %v3207_v42, %v3895_v5  ;;  %v1061_v46 = vpop.f32.mrb[37].mxu0 }
 0x170   : > { %2168 = vst.msk [vmem:[%s3905_s12 + $0x18c] sm:$0xf] %vm2068_vm3, %v3070_v39  ;;  %v1326_v45 = vadd.f32 %v3271_v43, %v3895_v5  ;;  %v1317_v47 = vpop.f32.mrb[37].mxu1  ;;  %2102 = vst.msk [vmem:[%s3905_s12 + $0x84] sm:$0xf] %vm2068_vm3, %v3004_v40  ;;  %v1062_v48 = vadd.f32 %v3895_v5, %v1061_v46  ;;  %v3208_v50 = vpop.f32.mrb[38].mxu0 }
 0x171   : > { %2166 = vst.msk [vmem:[%s3905_s12 + $0x184] sm:$0xf] %vm2068_vm3, %v3068_v41  ;;  %v1318_v49 = vadd.f32 %v3895_v5, %v1317_v47  ;;  %v3272_v51 = vpop.f32.mrb[38].mxu1  ;;  %v1466_v52 = vmax.f32 %v1070_v44, 0.0  ;;  %v1073_v54 = vadd.f32 %v3208_v50, %v3895_v5  ;;  %v1064_v56 = vpop.f32.mrb[39].mxu0 }
 0x172   : > { %v1530_v53 = vmax.f32 %v1326_v45, 0.0  ;;  %v1329_v55 = vadd.f32 %v3272_v51, %v3895_v5  ;;  %v1320_v57 = vpop.f32.mrb[39].mxu1  ;;  %v1464_v58 = vmax.f32 %v1062_v48, 0.0  ;;  %v1065_v60 = vadd.f32 %v3895_v5, %v1064_v56 }
 0x173   : > { %v1528_v59 = vmax.f32 %v1318_v49, 0.0  ;;  %v1321_v61 = vadd.f32 %v3895_v5, %v1320_v57  ;;  %v3009_v62 = vpack.c.bf16 %v1466_v52, %v1466_v52  ;;  %v1467_v0 = vmax.f32 %v1073_v54, 0.0 }
 0x174   : > { %v3073_v63 = vpack.c.bf16 %v1530_v53, %v1530_v53  ;;  %v1531_v1 = vmax.f32 %v1329_v55, 0.0  ;;  %v3007_v2 = vpack.c.bf16 %v1464_v58, %v1464_v58  ;;  %v1465_v4 = vmax.f32 %v1065_v60, 0.0 }
 0x175   : > { %v3071_v3 = vpack.c.bf16 %v1528_v59, %v1528_v59  ;;  %v1529_v6 = vmax.f32 %v1321_v61, 0.0  ;;  %2107 = vst.msk [vmem:[%s3905_s12 + $0x98] sm:$0xf] %vm2068_vm3, %v3009_v62  ;;  %v3010_v7 = vpack.c.bf16 %v1467_v0, %v1467_v0 }
 0x176   : > { %2171 = vst.msk [vmem:[%s3905_s12 + $0x198] sm:$0xf] %vm2068_vm3, %v3073_v63  ;;  %v3074_v8 = vpack.c.bf16 %v1531_v1, %v1531_v1  ;;  %2105 = vst.msk [vmem:[%s3905_s12 + $0x90] sm:$0xf] %vm2068_vm3, %v3007_v2  ;;  %v3008_v9 = vpack.c.bf16 %v1465_v4, %v1465_v4  ;;  %v3211_v11 = vpop.f32.mrb[40].mxu0 }
 0x177   : > { %2169 = vst.msk [vmem:[%s3905_s12 + $0x190] sm:$0xf] %vm2068_vm3, %v3071_v3  ;;  %v3072_v10 = vpack.c.bf16 %v1529_v6, %v1529_v6  ;;  %v3275_v12 = vpop.f32.mrb[40].mxu1  ;;  %2108 = vst.msk [vmem:[%s3905_s12 + $0x9c] sm:$0xf] %vm2068_vm3, %v3010_v7  ;;  %v1086_v13 = vadd.f32 %v3211_v11, %v3895_v5  ;;  %v1077_v15 = vpop.f32.mrb[41].mxu0 }
 0x178   : > { %2172 = vst.msk [vmem:[%s3905_s12 + $0x19c] sm:$0xf] %vm2068_vm3, %v3074_v8  ;;  %v1342_v14 = vadd.f32 %v3275_v12, %v3895_v5  ;;  %v1333_v16 = vpop.f32.mrb[41].mxu1  ;;  %2106 = vst.msk [vmem:[%s3905_s12 + $0x94] sm:$0xf] %vm2068_vm3, %v3008_v9  ;;  %v1078_v17 = vadd.f32 %v3895_v5, %v1077_v15  ;;  %v3212_v19 = vpop.f32.mrb[42].mxu0 }
 0x179   : > { %2170 = vst.msk [vmem:[%s3905_s12 + $0x194] sm:$0xf] %vm2068_vm3, %v3072_v10  ;;  %v1334_v18 = vadd.f32 %v3895_v5, %v1333_v16  ;;  %v3276_v20 = vpop.f32.mrb[42].mxu1  ;;  %v1470_v21 = vmax.f32 %v1086_v13, 0.0  ;;  %v1089_v23 = vadd.f32 %v3212_v19, %v3895_v5  ;;  %v1080_v25 = vpop.f32.mrb[43].mxu0 }
 0x17a   : > { %v1534_v22 = vmax.f32 %v1342_v14, 0.0  ;;  %v1345_v24 = vadd.f32 %v3276_v20, %v3895_v5  ;;  %v1336_v26 = vpop.f32.mrb[43].mxu1  ;;  %v1468_v27 = vmax.f32 %v1078_v17, 0.0  ;;  %v1081_v29 = vadd.f32 %v3895_v5, %v1080_v25 }
 0x17b   : > { %v1532_v28 = vmax.f32 %v1334_v18, 0.0  ;;  %v1337_v30 = vadd.f32 %v3895_v5, %v1336_v26  ;;  %v3013_v31 = vpack.c.bf16 %v1470_v21, %v1470_v21  ;;  %v1471_v33 = vmax.f32 %v1089_v23, 0.0 }
 0x17c   : > { %v3077_v32 = vpack.c.bf16 %v1534_v22, %v1534_v22  ;;  %v1535_v34 = vmax.f32 %v1345_v24, 0.0  ;;  %v3011_v35 = vpack.c.bf16 %v1468_v27, %v1468_v27  ;;  %v1469_v37 = vmax.f32 %v1081_v29, 0.0 }
 0x17d   : > { %v3075_v36 = vpack.c.bf16 %v1532_v28, %v1532_v28  ;;  %v1533_v38 = vmax.f32 %v1337_v30, 0.0  ;;  %2111 = vst.msk [vmem:[%s3905_s12 + $0xa8] sm:$0xf] %vm2068_vm3, %v3013_v31  ;;  %v3014_v39 = vpack.c.bf16 %v1471_v33, %v1471_v33 }
 0x17e   : > { %2175 = vst.msk [vmem:[%s3905_s12 + $0x1a8] sm:$0xf] %vm2068_vm3, %v3077_v32  ;;  %v3078_v40 = vpack.c.bf16 %v1535_v34, %v1535_v34  ;;  %2109 = vst.msk [vmem:[%s3905_s12 + $0xa0] sm:$0xf] %vm2068_vm3, %v3011_v35  ;;  %v3012_v41 = vpack.c.bf16 %v1469_v37, %v1469_v37  ;;  %v3215_v43 = vpop.f32.mrb[44].mxu0 }
 0x17f   : > { %2173 = vst.msk [vmem:[%s3905_s12 + $0x1a0] sm:$0xf] %vm2068_vm3, %v3075_v36  ;;  %v3076_v42 = vpack.c.bf16 %v1533_v38, %v1533_v38  ;;  %v3279_v44 = vpop.f32.mrb[44].mxu1  ;;  %2112 = vst.msk [vmem:[%s3905_s12 + $0xac] sm:$0xf] %vm2068_vm3, %v3014_v39  ;;  %v1102_v45 = vadd.f32 %v3215_v43, %v3895_v5  ;;  %v1093_v47 = vpop.f32.mrb[45].mxu0 }
 0x180   : > { %2176 = vst.msk [vmem:[%s3905_s12 + $0x1ac] sm:$0xf] %vm2068_vm3, %v3078_v40  ;;  %v1358_v46 = vadd.f32 %v3279_v44, %v3895_v5  ;;  %v1349_v48 = vpop.f32.mrb[45].mxu1  ;;  %2110 = vst.msk [vmem:[%s3905_s12 + $0xa4] sm:$0xf] %vm2068_vm3, %v3012_v41  ;;  %v1094_v49 = vadd.f32 %v3895_v5, %v1093_v47  ;;  %v3216_v51 = vpop.f32.mrb[46].mxu0 }
 0x181   : > { %2174 = vst.msk [vmem:[%s3905_s12 + $0x1a4] sm:$0xf] %vm2068_vm3, %v3076_v42  ;;  %v1350_v50 = vadd.f32 %v3895_v5, %v1349_v48  ;;  %v3280_v52 = vpop.f32.mrb[46].mxu1  ;;  %v1474_v53 = vmax.f32 %v1102_v45, 0.0  ;;  %v1105_v55 = vadd.f32 %v3216_v51, %v3895_v5  ;;  %v1096_v57 = vpop.f32.mrb[47].mxu0 }
 0x182   : > { %v1538_v54 = vmax.f32 %v1358_v46, 0.0  ;;  %v1361_v56 = vadd.f32 %v3280_v52, %v3895_v5  ;;  %v1352_v58 = vpop.f32.mrb[47].mxu1  ;;  %v1472_v59 = vmax.f32 %v1094_v49, 0.0  ;;  %v1097_v61 = vadd.f32 %v3895_v5, %v1096_v57  ;;  %v4207_v45 = vld [vmem:[#allocation4] ss:$0 sm:$0xff] }
 0x183   : > { %v1536_v60 = vmax.f32 %v1350_v50, 0.0  ;;  %v1353_v62 = vadd.f32 %v3895_v5, %v1352_v58  ;;  %v3017_v63 = vpack.c.bf16 %v1474_v53, %v1474_v53  ;;  %v1475_v1 = vmax.f32 %v1105_v55, 0.0 }
 0x184   : > { %v3081_v0 = vpack.c.bf16 %v1538_v54, %v1538_v54  ;;  %v1539_v2 = vmax.f32 %v1361_v56, 0.0  ;;  %v3015_v3 = vpack.c.bf16 %v1472_v59, %v1472_v59  ;;  %v1473_v6 = vmax.f32 %v1097_v61, 0.0 }
 0x185   : > { %v3079_v4 = vpack.c.bf16 %v1536_v60, %v1536_v60  ;;  %v1537_v7 = vmax.f32 %v1353_v62, 0.0  ;;  %2115 = vst.msk [vmem:[%s3905_s12 + $0xb8] sm:$0xf] %vm2068_vm3, %v3017_v63  ;;  %v3018_v8 = vpack.c.bf16 %v1475_v1, %v1475_v1 }
 0x186   : > { %2179 = vst.msk [vmem:[%s3905_s12 + $0x1b8] sm:$0xf] %vm2068_vm3, %v3081_v0  ;;  %v3082_v9 = vpack.c.bf16 %v1539_v2, %v1539_v2  ;;  %2113 = vst.msk [vmem:[%s3905_s12 + $0xb0] sm:$0xf] %vm2068_vm3, %v3015_v3  ;;  %v3016_v10 = vpack.c.bf16 %v1473_v6, %v1473_v6  ;;  %v3219_v12 = vpop.f32.mrb[48].mxu0 }
 0x187   : > { %2177 = vst.msk [vmem:[%s3905_s12 + $0x1b0] sm:$0xf] %vm2068_vm3, %v3079_v4  ;;  %v3080_v11 = vpack.c.bf16 %v1537_v7, %v1537_v7  ;;  %v3283_v13 = vpop.f32.mrb[48].mxu1  ;;  %2116 = vst.msk [vmem:[%s3905_s12 + $0xbc] sm:$0xf] %vm2068_vm3, %v3018_v8  ;;  %v1118_v14 = vadd.f32 %v3219_v12, %v3895_v5  ;;  %v1109_v16 = vpop.f32.mrb[49].mxu0 }
 0x188   : > { %2180 = vst.msk [vmem:[%s3905_s12 + $0x1bc] sm:$0xf] %vm2068_vm3, %v3082_v9  ;;  %v1374_v15 = vadd.f32 %v3283_v13, %v3895_v5  ;;  %v1365_v17 = vpop.f32.mrb[49].mxu1  ;;  %2114 = vst.msk [vmem:[%s3905_s12 + $0xb4] sm:$0xf] %vm2068_vm3, %v3016_v10  ;;  %v1110_v18 = vadd.f32 %v3895_v5, %v1109_v16  ;;  %v3220_v20 = vpop.f32.mrb[50].mxu0 }
 0x189   : > { %2178 = vst.msk [vmem:[%s3905_s12 + $0x1b4] sm:$0xf] %vm2068_vm3, %v3080_v11  ;;  %v1366_v19 = vadd.f32 %v3895_v5, %v1365_v17  ;;  %v3284_v21 = vpop.f32.mrb[50].mxu1  ;;  %v1478_v22 = vmax.f32 %v1118_v14, 0.0  ;;  %v1121_v24 = vadd.f32 %v3220_v20, %v3895_v5  ;;  %v1112_v26 = vpop.f32.mrb[51].mxu0 }
 0x18a   : > { %v1542_v23 = vmax.f32 %v1374_v15, 0.0  ;;  %v1377_v25 = vadd.f32 %v3284_v21, %v3895_v5  ;;  %v1368_v27 = vpop.f32.mrb[51].mxu1  ;;  %v1476_v28 = vmax.f32 %v1110_v18, 0.0  ;;  %v1113_v30 = vadd.f32 %v3895_v5, %v1112_v26 }
 0x18b   : > { %v1540_v29 = vmax.f32 %v1366_v19, 0.0  ;;  %v1369_v31 = vadd.f32 %v3895_v5, %v1368_v27  ;;  %v3021_v32 = vpack.c.bf16 %v1478_v22, %v1478_v22  ;;  %v1479_v34 = vmax.f32 %v1121_v24, 0.0 }
 0x18c   : > { %v3085_v33 = vpack.c.bf16 %v1542_v23, %v1542_v23  ;;  %v1543_v35 = vmax.f32 %v1377_v25, 0.0  ;;  %v3019_v36 = vpack.c.bf16 %v1476_v28, %v1476_v28  ;;  %v1477_v38 = vmax.f32 %v1113_v30, 0.0 }
 0x18d   : > { %v3083_v37 = vpack.c.bf16 %v1540_v29, %v1540_v29  ;;  %v1541_v39 = vmax.f32 %v1369_v31, 0.0  ;;  %2119 = vst.msk [vmem:[%s3905_s12 + $0xc8] sm:$0xf] %vm2068_vm3, %v3021_v32  ;;  %v3022_v40 = vpack.c.bf16 %v1479_v34, %v1479_v34 }
 0x18e   : > { %2183 = vst.msk [vmem:[%s3905_s12 + $0x1c8] sm:$0xf] %vm2068_vm3, %v3085_v33  ;;  %v3086_v41 = vpack.c.bf16 %v1543_v35, %v1543_v35  ;;  %2117 = vst.msk [vmem:[%s3905_s12 + $0xc0] sm:$0xf] %vm2068_vm3, %v3019_v36  ;;  %v3020_v5 = vpack.c.bf16 %v1477_v38, %v1477_v38  ;;  %v3223_v43 = vpop.f32.mrb[52].mxu0 }
 0x18f   : > { %2181 = vst.msk [vmem:[%s3905_s12 + $0x1c0] sm:$0xf] %vm2068_vm3, %v3083_v37  ;;  %v3084_v42 = vpack.c.bf16 %v1541_v39, %v1541_v39  ;;  %v3287_v44 = vpop.f32.mrb[52].mxu1  ;;  %2120 = vst.msk [vmem:[%s3905_s12 + $0xcc] sm:$0xf] %vm2068_vm3, %v3022_v40  ;;  %v1134_v46 = vadd.f32 %v4207_v45, %v3223_v43  ;;  %v1125_v48 = vpop.f32.mrb[53].mxu0 }
 0x190   : > { %2184 = vst.msk [vmem:[%s3905_s12 + $0x1cc] sm:$0xf] %vm2068_vm3, %v3086_v41  ;;  %v1390_v47 = vadd.f32 %v4207_v45, %v3287_v44  ;;  %v1381_v49 = vpop.f32.mrb[53].mxu1  ;;  %2118 = vst.msk [vmem:[%s3905_s12 + $0xc4] sm:$0xf] %vm2068_vm3, %v3020_v5  ;;  %v1126_v50 = vadd.f32 %v4207_v45, %v1125_v48  ;;  %v3224_v52 = vpop.f32.mrb[54].mxu0 }
 0x191   : > { %2182 = vst.msk [vmem:[%s3905_s12 + $0x1c4] sm:$0xf] %vm2068_vm3, %v3084_v42  ;;  %v1382_v51 = vadd.f32 %v4207_v45, %v1381_v49  ;;  %v3288_v53 = vpop.f32.mrb[54].mxu1  ;;  %v1482_v54 = vmax.f32 %v1134_v46, 0.0  ;;  %v1137_v56 = vadd.f32 %v4207_v45, %v3224_v52  ;;  %v1128_v58 = vpop.f32.mrb[55].mxu0 }
 0x192   : > { %v1546_v55 = vmax.f32 %v1390_v47, 0.0  ;;  %v1393_v57 = vadd.f32 %v4207_v45, %v3288_v53  ;;  %v1384_v59 = vpop.f32.mrb[55].mxu1  ;;  %v1480_v60 = vmax.f32 %v1126_v50, 0.0  ;;  %v1129_v62 = vadd.f32 %v4207_v45, %v1128_v58 }
 0x193   : > { %v1544_v61 = vmax.f32 %v1382_v51, 0.0  ;;  %v1385_v63 = vadd.f32 %v4207_v45, %v1384_v59  ;;  %v3025_v0 = vpack.c.bf16 %v1482_v54, %v1482_v54  ;;  %v1483_v2 = vmax.f32 %v1137_v56, 0.0 }
 0x194   : > { %v3089_v1 = vpack.c.bf16 %v1546_v55, %v1546_v55  ;;  %v1547_v3 = vmax.f32 %v1393_v57, 0.0  ;;  %v3023_v4 = vpack.c.bf16 %v1480_v60, %v1480_v60  ;;  %v1481_v7 = vmax.f32 %v1129_v62, 0.0 }
 0x195   : > { %v3087_v6 = vpack.c.bf16 %v1544_v61, %v1544_v61  ;;  %v1545_v8 = vmax.f32 %v1385_v63, 0.0  ;;  %2123 = vst.msk [vmem:[%s3905_s12 + $0xd8] sm:$0xf] %vm2068_vm3, %v3025_v0  ;;  %v3026_v9 = vpack.c.bf16 %v1483_v2, %v1483_v2 }
 0x196   : > { %2187 = vst.msk [vmem:[%s3905_s12 + $0x1d8] sm:$0xf] %vm2068_vm3, %v3089_v1  ;;  %v3090_v10 = vpack.c.bf16 %v1547_v3, %v1547_v3  ;;  %2121 = vst.msk [vmem:[%s3905_s12 + $0xd0] sm:$0xf] %vm2068_vm3, %v3023_v4  ;;  %v3024_v11 = vpack.c.bf16 %v1481_v7, %v1481_v7  ;;  %v3227_v13 = vpop.f32.mrb[56].mxu0 }
 0x197   : > { %2185 = vst.msk [vmem:[%s3905_s12 + $0x1d0] sm:$0xf] %vm2068_vm3, %v3087_v6  ;;  %v3088_v12 = vpack.c.bf16 %v1545_v8, %v1545_v8  ;;  %v3291_v14 = vpop.f32.mrb[56].mxu1  ;;  %2124 = vst.msk [vmem:[%s3905_s12 + $0xdc] sm:$0xf] %vm2068_vm3, %v3026_v9  ;;  %v1150_v15 = vadd.f32 %v4207_v45, %v3227_v13  ;;  %v1141_v17 = vpop.f32.mrb[57].mxu0 }
 0x198   : > { %2188 = vst.msk [vmem:[%s3905_s12 + $0x1dc] sm:$0xf] %vm2068_vm3, %v3090_v10  ;;  %v1406_v16 = vadd.f32 %v4207_v45, %v3291_v14  ;;  %v1397_v18 = vpop.f32.mrb[57].mxu1  ;;  %2122 = vst.msk [vmem:[%s3905_s12 + $0xd4] sm:$0xf] %vm2068_vm3, %v3024_v11  ;;  %v1142_v19 = vadd.f32 %v4207_v45, %v1141_v17  ;;  %v3228_v21 = vpop.f32.mrb[58].mxu0 }
 0x199   : > { %2186 = vst.msk [vmem:[%s3905_s12 + $0x1d4] sm:$0xf] %vm2068_vm3, %v3088_v12  ;;  %v1398_v20 = vadd.f32 %v4207_v45, %v1397_v18  ;;  %v3292_v22 = vpop.f32.mrb[58].mxu1  ;;  %v1486_v23 = vmax.f32 %v1150_v15, 0.0  ;;  %v1153_v25 = vadd.f32 %v4207_v45, %v3228_v21  ;;  %v1144_v27 = vpop.f32.mrb[59].mxu0 }
 0x19a   : > { %v1550_v24 = vmax.f32 %v1406_v16, 0.0  ;;  %v1409_v26 = vadd.f32 %v4207_v45, %v3292_v22  ;;  %v1400_v28 = vpop.f32.mrb[59].mxu1  ;;  %v1484_v29 = vmax.f32 %v1142_v19, 0.0  ;;  %v1145_v31 = vadd.f32 %v4207_v45, %v1144_v27 }
 0x19b   : > { %v1548_v30 = vmax.f32 %v1398_v20, 0.0  ;;  %v1401_v32 = vadd.f32 %v4207_v45, %v1400_v28  ;;  %v3029_v33 = vpack.c.bf16 %v1486_v23, %v1486_v23  ;;  %v1487_v35 = vmax.f32 %v1153_v25, 0.0 }
 0x19c   : > { %v3093_v34 = vpack.c.bf16 %v1550_v24, %v1550_v24  ;;  %v1551_v36 = vmax.f32 %v1409_v26, 0.0  ;;  %v3027_v37 = vpack.c.bf16 %v1484_v29, %v1484_v29  ;;  %v1485_v39 = vmax.f32 %v1145_v31, 0.0 }
 0x19d   : > { %v3091_v38 = vpack.c.bf16 %v1548_v30, %v1548_v30  ;;  %v1549_v40 = vmax.f32 %v1401_v32, 0.0  ;;  %2127 = vst.msk [vmem:[%s3905_s12 + $0xe8] sm:$0xf] %vm2068_vm3, %v3029_v33  ;;  %v3030_v41 = vpack.c.bf16 %v1487_v35, %v1487_v35 }
 0x19e   : > { %2191 = vst.msk [vmem:[%s3905_s12 + $0x1e8] sm:$0xf] %vm2068_vm3, %v3093_v34  ;;  %v3094_v5 = vpack.c.bf16 %v1551_v36, %v1551_v36  ;;  %2125 = vst.msk [vmem:[%s3905_s12 + $0xe0] sm:$0xf] %vm2068_vm3, %v3027_v37  ;;  %v3028_v42 = vpack.c.bf16 %v1485_v39, %v1485_v39  ;;  %v3231_v44 = vpop.f32.mrb[60].mxu0 }
 0x19f   : > { %2189 = vst.msk [vmem:[%s3905_s12 + $0x1e0] sm:$0xf] %vm2068_vm3, %v3091_v38  ;;  %v3092_v43 = vpack.c.bf16 %v1549_v40, %v1549_v40  ;;  %v3295_v46 = vpop.f32.mrb[60].mxu1  ;;  %2128 = vst.msk [vmem:[%s3905_s12 + $0xec] sm:$0xf] %vm2068_vm3, %v3030_v41  ;;  %v1166_v47 = vadd.f32 %v4207_v45, %v3231_v44  ;;  %v1157_v49 = vpop.f32.mrb[61].mxu0 }
 0x1a0   : > { %2192 = vst.msk [vmem:[%s3905_s12 + $0x1ec] sm:$0xf] %vm2068_vm3, %v3094_v5  ;;  %v1422_v48 = vadd.f32 %v4207_v45, %v3295_v46  ;;  %v1413_v50 = vpop.f32.mrb[61].mxu1  ;;  %2126 = vst.msk [vmem:[%s3905_s12 + $0xe4] sm:$0xf] %vm2068_vm3, %v3028_v42  ;;  %v1158_v51 = vadd.f32 %v4207_v45, %v1157_v49  ;;  %v3232_v53 = vpop.f32.mrb[62].mxu0 }
 0x1a1   : > { %2190 = vst.msk [vmem:[%s3905_s12 + $0x1e4] sm:$0xf] %vm2068_vm3, %v3092_v43  ;;  %v1414_v52 = vadd.f32 %v4207_v45, %v1413_v50  ;;  %v3296_v54 = vpop.f32.mrb[62].mxu1  ;;  %v1490_v55 = vmax.f32 %v1166_v47, 0.0  ;;  %v1169_v57 = vadd.f32 %v4207_v45, %v3232_v53  ;;  %v1160_v59 = vpop.f32.mrb[63].mxu0 }
 0x1a2   : > { %v1554_v56 = vmax.f32 %v1422_v48, 0.0  ;;  %v1425_v58 = vadd.f32 %v4207_v45, %v3296_v54  ;;  %v1416_v60 = vpop.f32.mrb[63].mxu1  ;;  %v1488_v61 = vmax.f32 %v1158_v51, 0.0  ;;  %v1161_v63 = vadd.f32 %v4207_v45, %v1160_v59 }
 0x1a3   : > { %v1552_v62 = vmax.f32 %v1414_v52, 0.0  ;;  %v1417_v0 = vadd.f32 %v4207_v45, %v1416_v60  ;;  %v3033_v1 = vpack.c.bf16 %v1490_v55, %v1490_v55  ;;  %v1491_v3 = vmax.f32 %v1169_v57, 0.0  ;;  %2203 = sbr.rel (!%p4498_p12) target bundleno = 517 (0x205), region = 44 }
 0x1a4   : > { %v3097_v2 = vpack.c.bf16 %v1554_v56, %v1554_v56  ;;  %v1555_v4 = vmax.f32 %v1425_v58, 0.0  ;;  %v3031_v6 = vpack.c.bf16 %v1488_v61, %v1488_v61  ;;  %v1489_v8 = vmax.f32 %v1161_v63, 0.0 }
 0x1a5   : > { %v3095_v7 = vpack.c.bf16 %v1552_v62, %v1552_v62  ;;  %v1553_v9 = vmax.f32 %v1417_v0, 0.0  ;;  %2131 = vst.msk [vmem:[%s3905_s12 + $0xf8] sm:$0xf] %vm2068_vm3, %v3033_v1  ;;  %v3034_v10 = vpack.c.bf16 %v1491_v3, %v1491_v3 }
 0x1a6   : > { %2195 = vst.msk [vmem:[%s3905_s12 + $0x1f8] sm:$0xf] %vm2068_vm3, %v3097_v2  ;;  %v3098_v11 = vpack.c.bf16 %v1555_v4, %v1555_v4  ;;  %2129 = vst.msk [vmem:[%s3905_s12 + $0xf0] sm:$0xf] %vm2068_vm3, %v3031_v6  ;;  %v3032_v45 = vpack.c.bf16 %v1489_v8, %v1489_v8 }
 0x1a7   : > { %2193 = vst.msk [vmem:[%s3905_s12 + $0x1f0] sm:$0xf] %vm2068_vm3, %v3095_v7  ;;  %v3096_v12 = vpack.c.bf16 %v1553_v9, %v1553_v9  ;;  %2132 = vst.msk [vmem:[%s3905_s12 + $0xfc] sm:$0xf] %vm2068_vm3, %v3034_v10 }
 0x1a8   : > { %2196 = vst.msk [vmem:[%s3905_s12 + $0x1fc] sm:$0xf] %vm2068_vm3, %v3098_v11  ;;  %2130 = vst.msk [vmem:[%s3905_s12 + $0xf4] sm:$0xf] %vm2068_vm3, %v3032_v45 }
 0x1a9   : > { %2194 = vst.msk [vmem:[%s3905_s12 + $0x1f4] sm:$0xf] %vm2068_vm3, %v3096_v12 }
 0x1aa   : > { %s4506_s10 = smov (!%p2206_p13, %s2205_s10), 128 }
 0x1ab   : > { %s2956_s22 = sshll.u32 %s4506_s10, 6 }
 0x1ac   : > { %p2959_p0 = scmp.eq.s32.totalorder %s2956_s22, 0 }
 0x1ad   : > { %s4298_s25 = sshrl.u32 (!%p2959_p0), %s4506_s10, 6 }
 0x1ae   : > { %2214 = sbr.rel (%p2959_p0) target bundleno = 517 (0x205), region = 48  ;;  %p2960_p1 = scmp.le.s32.totalorder (!%p2959_p0), %s4298_s25, 0 }
 0x1b5   : > { %2623 = sbr.rel (%p2960_p1) target bundleno = 496 (0x1f0), region = 121  ;;  %s4499_s15 = smov (!%p2960_p1), %s4292_s18 }
 0x1b6   : > { %s4500_s20 = smov (!%p2960_p1), %s3905_s12  ;;  %s4307_s27 = smov (!%p2960_p1), 0  }
 0x1b7   : > { %s4309_s28 = smov (!%p2960_p1), 0  }
 0x1bc LB: >> { %v2230_v13 = vld [vmem:[%s3603_s20] sm:$0xf]  ;;  %v2232_v14 = vld [vmem:[%s3603_s20 + $0x4] sm:$0xf]  ;;  %v2234_v15 = vld [vmem:[%s3603_s20 + $0x8] sm:$0xf]  ;;  %s3611_s28 = sphi %s4309_s28, %s2224_s28   ;;  %s3607_s27 = sphi %s4307_s27, %s4501_s27   ;;  %s3603_s20 = sphi %s4500_s20, %s2363_s20   ;;  %s3599_s15 = sphi %s4499_s15, %s2364_s15  }
 0x1bd   : >> { %2231 = vst [vmem:[%s3599_s15] sm:$0xf] %v2230_v13  ;;  %2233 = vst [vmem:[%s3599_s15 + $0x4] sm:$0xf] %v2232_v14  ;;  %v2236_v16 = vld [vmem:[%s3603_s20 + $0xc] sm:$0xf]  ;;  %s2358_s23 = sadd.s32 1, %s3607_s27 }
 0x1be   : >> { %2235 = vst [vmem:[%s3599_s15 + $0x8] sm:$0xf] %v2234_v15  ;;  %v2238_v17 = vld [vmem:[%s3603_s20 + $0x10] sm:$0xf]  ;;  %v2240_v18 = vld [vmem:[%s3603_s20 + $0x14] sm:$0xf]  ;;  %p2359_p2 = scmp.ge.s32.totalorder %s2358_s23, %s4298_s25 }
 0x1bf   : >> { %2237 = vst [vmem:[%s3599_s15 + $0xc] sm:$0xf] %v2236_v16  ;;  %2239 = vst [vmem:[%s3599_s15 + $0x10] sm:$0xf] %v2238_v17  ;;  %v2242_v19 = vld [vmem:[%s3603_s20 + $0x18] sm:$0xf] }
 0x1c0   : >> { %2241 = vst [vmem:[%s3599_s15 + $0x14] sm:$0xf] %v2240_v18  ;;  %v2244_v20 = vld [vmem:[%s3603_s20 + $0x1c] sm:$0xf]  ;;  %v2246_v21 = vld [vmem:[%s3603_s20 + $0x20] sm:$0xf] }
 0x1c1   : >> { %2243 = vst [vmem:[%s3599_s15 + $0x18] sm:$0xf] %v2242_v19  ;;  %2245 = vst [vmem:[%s3599_s15 + $0x1c] sm:$0xf] %v2244_v20  ;;  %v2248_v22 = vld [vmem:[%s3603_s20 + $0x24] sm:$0xf] }
 0x1c2   : >> { %2247 = vst [vmem:[%s3599_s15 + $0x20] sm:$0xf] %v2246_v21  ;;  %v2250_v23 = vld [vmem:[%s3603_s20 + $0x28] sm:$0xf]  ;;  %v2252_v24 = vld [vmem:[%s3603_s20 + $0x2c] sm:$0xf] }
 0x1c3   : >> { %2249 = vst [vmem:[%s3599_s15 + $0x24] sm:$0xf] %v2248_v22  ;;  %2251 = vst [vmem:[%s3599_s15 + $0x28] sm:$0xf] %v2250_v23  ;;  %v2254_v25 = vld [vmem:[%s3603_s20 + $0x30] sm:$0xf] }
 0x1c4   : >> { %2253 = vst [vmem:[%s3599_s15 + $0x2c] sm:$0xf] %v2252_v24  ;;  %v2256_v26 = vld [vmem:[%s3603_s20 + $0x34] sm:$0xf]  ;;  %v2258_v27 = vld [vmem:[%s3603_s20 + $0x38] sm:$0xf] }
 0x1c5   : >> { %2255 = vst [vmem:[%s3599_s15 + $0x30] sm:$0xf] %v2254_v25  ;;  %2257 = vst [vmem:[%s3599_s15 + $0x34] sm:$0xf] %v2256_v26  ;;  %v2260_v28 = vld [vmem:[%s3603_s20 + $0x3c] sm:$0xf] }
 0x1c6   : >> { %2259 = vst [vmem:[%s3599_s15 + $0x38] sm:$0xf] %v2258_v27  ;;  %v2262_v29 = vld [vmem:[%s3603_s20 + $0x40] sm:$0xf]  ;;  %v2264_v30 = vld [vmem:[%s3603_s20 + $0x44] sm:$0xf] }
 0x1c7   : >> { %2261 = vst [vmem:[%s3599_s15 + $0x3c] sm:$0xf] %v2260_v28  ;;  %2263 = vst [vmem:[%s3599_s15 + $0x40] sm:$0xf] %v2262_v29  ;;  %v2266_v31 = vld [vmem:[%s3603_s20 + $0x48] sm:$0xf] }
 0x1c8   : >> { %2265 = vst [vmem:[%s3599_s15 + $0x44] sm:$0xf] %v2264_v30  ;;  %v2268_v32 = vld [vmem:[%s3603_s20 + $0x4c] sm:$0xf]  ;;  %v2270_v33 = vld [vmem:[%s3603_s20 + $0x50] sm:$0xf] }
 0x1c9   : >> { %2267 = vst [vmem:[%s3599_s15 + $0x48] sm:$0xf] %v2266_v31  ;;  %2269 = vst [vmem:[%s3599_s15 + $0x4c] sm:$0xf] %v2268_v32  ;;  %v2272_v34 = vld [vmem:[%s3603_s20 + $0x54] sm:$0xf] }
 0x1ca   : >> { %2271 = vst [vmem:[%s3599_s15 + $0x50] sm:$0xf] %v2270_v33  ;;  %v2274_v35 = vld [vmem:[%s3603_s20 + $0x58] sm:$0xf]  ;;  %v2276_v36 = vld [vmem:[%s3603_s20 + $0x5c] sm:$0xf] }
 0x1cb   : >> { %2273 = vst [vmem:[%s3599_s15 + $0x54] sm:$0xf] %v2272_v34  ;;  %2275 = vst [vmem:[%s3599_s15 + $0x58] sm:$0xf] %v2274_v35  ;;  %v2278_v37 = vld [vmem:[%s3603_s20 + $0x60] sm:$0xf] }
 0x1cc   : >> { %2277 = vst [vmem:[%s3599_s15 + $0x5c] sm:$0xf] %v2276_v36  ;;  %v2280_v38 = vld [vmem:[%s3603_s20 + $0x64] sm:$0xf]  ;;  %v2282_v39 = vld [vmem:[%s3603_s20 + $0x68] sm:$0xf] }
 0x1cd   : >> { %2279 = vst [vmem:[%s3599_s15 + $0x60] sm:$0xf] %v2278_v37  ;;  %2281 = vst [vmem:[%s3599_s15 + $0x64] sm:$0xf] %v2280_v38  ;;  %v2284_v40 = vld [vmem:[%s3603_s20 + $0x6c] sm:$0xf] }
 0x1ce   : >> { %2283 = vst [vmem:[%s3599_s15 + $0x68] sm:$0xf] %v2282_v39  ;;  %v2286_v41 = vld [vmem:[%s3603_s20 + $0x70] sm:$0xf]  ;;  %v2288_v5 = vld [vmem:[%s3603_s20 + $0x74] sm:$0xf] }
 0x1cf   : >> { %2285 = vst [vmem:[%s3599_s15 + $0x6c] sm:$0xf] %v2284_v40  ;;  %2287 = vst [vmem:[%s3599_s15 + $0x70] sm:$0xf] %v2286_v41  ;;  %v2290_v42 = vld [vmem:[%s3603_s20 + $0x78] sm:$0xf] }
 0x1d0   : >> { %2289 = vst [vmem:[%s3599_s15 + $0x74] sm:$0xf] %v2288_v5  ;;  %v2292_v43 = vld [vmem:[%s3603_s20 + $0x7c] sm:$0xf]  ;;  %v2294_v44 = vld [vmem:[%s3603_s20 + $0x80] sm:$0xf] }
 0x1d1   : >> { %2291 = vst [vmem:[%s3599_s15 + $0x78] sm:$0xf] %v2290_v42  ;;  %2293 = vst [vmem:[%s3599_s15 + $0x7c] sm:$0xf] %v2292_v43  ;;  %v2296_v46 = vld [vmem:[%s3603_s20 + $0x84] sm:$0xf] }
 0x1d2   : >> { %2295 = vst [vmem:[%s3599_s15 + $0x80] sm:$0xf] %v2294_v44  ;;  %v2298_v47 = vld [vmem:[%s3603_s20 + $0x88] sm:$0xf]  ;;  %v2300_v48 = vld [vmem:[%s3603_s20 + $0x8c] sm:$0xf] }
 0x1d3   : >> { %2297 = vst [vmem:[%s3599_s15 + $0x84] sm:$0xf] %v2296_v46  ;;  %2299 = vst [vmem:[%s3599_s15 + $0x88] sm:$0xf] %v2298_v47  ;;  %v2302_v49 = vld [vmem:[%s3603_s20 + $0x90] sm:$0xf] }
 0x1d4   : >> { %2301 = vst [vmem:[%s3599_s15 + $0x8c] sm:$0xf] %v2300_v48  ;;  %v2304_v50 = vld [vmem:[%s3603_s20 + $0x94] sm:$0xf]  ;;  %v2306_v51 = vld [vmem:[%s3603_s20 + $0x98] sm:$0xf] }
 0x1d5   : >> { %2303 = vst [vmem:[%s3599_s15 + $0x90] sm:$0xf] %v2302_v49  ;;  %2305 = vst [vmem:[%s3599_s15 + $0x94] sm:$0xf] %v2304_v50  ;;  %v2308_v52 = vld [vmem:[%s3603_s20 + $0x9c] sm:$0xf] }
 0x1d6   : >> { %2307 = vst [vmem:[%s3599_s15 + $0x98] sm:$0xf] %v2306_v51  ;;  %v2310_v53 = vld [vmem:[%s3603_s20 + $0xa0] sm:$0xf]  ;;  %v2312_v54 = vld [vmem:[%s3603_s20 + $0xa4] sm:$0xf] }
 0x1d7   : >> { %2309 = vst [vmem:[%s3599_s15 + $0x9c] sm:$0xf] %v2308_v52  ;;  %2311 = vst [vmem:[%s3599_s15 + $0xa0] sm:$0xf] %v2310_v53  ;;  %v2314_v55 = vld [vmem:[%s3603_s20 + $0xa8] sm:$0xf] }
 0x1d8   : >> { %2313 = vst [vmem:[%s3599_s15 + $0xa4] sm:$0xf] %v2312_v54  ;;  %v2316_v56 = vld [vmem:[%s3603_s20 + $0xac] sm:$0xf]  ;;  %v2318_v57 = vld [vmem:[%s3603_s20 + $0xb0] sm:$0xf] }
 0x1d9   : >> { %2315 = vst [vmem:[%s3599_s15 + $0xa8] sm:$0xf] %v2314_v55  ;;  %2317 = vst [vmem:[%s3599_s15 + $0xac] sm:$0xf] %v2316_v56  ;;  %v2320_v58 = vld [vmem:[%s3603_s20 + $0xb4] sm:$0xf] }
 0x1da   : >> { %2319 = vst [vmem:[%s3599_s15 + $0xb0] sm:$0xf] %v2318_v57  ;;  %v2322_v59 = vld [vmem:[%s3603_s20 + $0xb8] sm:$0xf]  ;;  %v2324_v60 = vld [vmem:[%s3603_s20 + $0xbc] sm:$0xf] }
 0x1db   : >> { %2321 = vst [vmem:[%s3599_s15 + $0xb4] sm:$0xf] %v2320_v58  ;;  %2323 = vst [vmem:[%s3599_s15 + $0xb8] sm:$0xf] %v2322_v59  ;;  %v2326_v61 = vld [vmem:[%s3603_s20 + $0xc0] sm:$0xf] }
 0x1dc   : >> { %2325 = vst [vmem:[%s3599_s15 + $0xbc] sm:$0xf] %v2324_v60  ;;  %v2328_v62 = vld [vmem:[%s3603_s20 + $0xc4] sm:$0xf]  ;;  %v2330_v63 = vld [vmem:[%s3603_s20 + $0xc8] sm:$0xf] }
 0x1dd   : >> { %2327 = vst [vmem:[%s3599_s15 + $0xc0] sm:$0xf] %v2326_v61  ;;  %2329 = vst [vmem:[%s3599_s15 + $0xc4] sm:$0xf] %v2328_v62  ;;  %v2332_v0 = vld [vmem:[%s3603_s20 + $0xcc] sm:$0xf] }
 0x1de   : >> { %2331 = vst [vmem:[%s3599_s15 + $0xc8] sm:$0xf] %v2330_v63  ;;  %v2334_v1 = vld [vmem:[%s3603_s20 + $0xd0] sm:$0xf]  ;;  %v2336_v2 = vld [vmem:[%s3603_s20 + $0xd4] sm:$0xf] }
 0x1df   : >> { %2333 = vst [vmem:[%s3599_s15 + $0xcc] sm:$0xf] %v2332_v0  ;;  %2335 = vst [vmem:[%s3599_s15 + $0xd0] sm:$0xf] %v2334_v1  ;;  %v2338_v3 = vld [vmem:[%s3603_s20 + $0xd8] sm:$0xf] }
 0x1e0   : >> { %2337 = vst [vmem:[%s3599_s15 + $0xd4] sm:$0xf] %v2336_v2  ;;  %v2340_v4 = vld [vmem:[%s3603_s20 + $0xdc] sm:$0xf]  ;;  %v2342_v6 = vld [vmem:[%s3603_s20 + $0xe0] sm:$0xf] }
 0x1e1   : >> { %2339 = vst [vmem:[%s3599_s15 + $0xd8] sm:$0xf] %v2338_v3  ;;  %2341 = vst [vmem:[%s3599_s15 + $0xdc] sm:$0xf] %v2340_v4  ;;  %v2344_v7 = vld [vmem:[%s3603_s20 + $0xe4] sm:$0xf] }
 0x1e2   : >> { %2343 = vst [vmem:[%s3599_s15 + $0xe0] sm:$0xf] %v2342_v6  ;;  %v2346_v8 = vld [vmem:[%s3603_s20 + $0xe8] sm:$0xf]  ;;  %v2348_v9 = vld [vmem:[%s3603_s20 + $0xec] sm:$0xf] }
 0x1e3   : >> { %2345 = vst [vmem:[%s3599_s15 + $0xe4] sm:$0xf] %v2344_v7  ;;  %2347 = vst [vmem:[%s3599_s15 + $0xe8] sm:$0xf] %v2346_v8  ;;  %v2350_v10 = vld [vmem:[%s3603_s20 + $0xf0] sm:$0xf] }
 0x1e4   : >> { %2349 = vst [vmem:[%s3599_s15 + $0xec] sm:$0xf] %v2348_v9  ;;  %v2352_v11 = vld [vmem:[%s3603_s20 + $0xf4] sm:$0xf]  ;;  %v2354_v45 = vld [vmem:[%s3603_s20 + $0xf8] sm:$0xf] }
 0x1e5   : >> { %2351 = vst [vmem:[%s3599_s15 + $0xf0] sm:$0xf] %v2350_v10  ;;  %2353 = vst [vmem:[%s3599_s15 + $0xf4] sm:$0xf] %v2352_v11  ;;  %v2356_v12 = vld [vmem:[%s3603_s20 + $0xfc] sm:$0xf] }
 0x1e6   : >> { %2355 = vst [vmem:[%s3599_s15 + $0xf8] sm:$0xf] %v2354_v45  ;;  %2357 = vst [vmem:[%s3599_s15 + $0xfc] sm:$0xf] %v2356_v12  ;;  %s4508_s23 = smov (%p2359_p2, %s2358_s23), 0  ;;  %s2224_s28 = sadd.s32 1, %s3611_s28  }
 0x1e7   : >> { %s2961_s29 = sshll.u32 %s4508_s23, 8  ;;  %p2223_p3 = scmp.ge.s32.totalorder %s2224_s28, %s4298_s25 }
 0x1e8   : >> { %s2363_s20 = scalar_lea.vmem %s3905_s12, %s2961_s29 [#allocation6]   ;;  %s2364_s15 = scalar_lea.vmem %s4292_s18, %s2961_s29  }
 0x1e9   : >> { %s4501_s27 = smov %s4508_s23  ;;  %2226 = sbr.rel (!%p2223_p3) target bundleno = 444 (0x1bc), region = 127 }
 0x1f0 PF: > { %s4466_s30 = sand.u32 63, %s4506_s10   ;;  %s3100_s4 = sshll.u32 %s4298_s25, 8 }
 0x1f1   : > { %s2369_s24 = scalar_lea.vmem %s3905_s12, %s3100_s4 [#allocation6]   ;;  %s2371_s21 = scalar_lea.vmem %s4292_s18, %s3100_s4  }
 0x1f2   : > { %p2966_p5 = scmp.le.s32.totalorder %s4466_s30, 0 }
 0x1f3   : > { %s3613_s26 = smov (!%p2966_p5), %s2371_s21   ;;  %s3617_s5 = smov (!%p2966_p5), %s2369_s24  }
 0x1f4   : > { %2637 = sbr.rel (%p2966_p5) target bundleno = 517 (0x205), region = 132  ;;  %s3621_s6 = smov (!%p2966_p5), 0  }
 0x1f5   : > { %s3625_s7 = smov (!%p2966_p5), 0  }
 0x1fb LB: >> { %v2381_v13 = vld [vmem:[%s3619_s5] sm:$0xf]  ;;  %s2383_s8 = sadd.s32 1, %s3623_s6  ;;  %s2375_s7 = sadd.s32 1, %s3627_s7   ;;  %s3627_s7 = sphi %s3625_s7, %s2375_s7   ;;  %s3623_s6 = sphi %s3621_s6, %s3622_s6   ;;  %s3619_s5 = sphi %s3617_s5, %s2388_s5   ;;  %s3615_s26 = sphi %s3613_s26, %s2389_s26  }
 0x1fc   : >> { %2382 = vst [vmem:[%s3615_s26] sm:$0xf] %v2381_v13  ;;  %p2384_p8 = scmp.ge.s32.totalorder %s2383_s8, %s4466_s30  ;;  %p2374_p10 = scmp.ge.s32.totalorder %s2375_s7, %s4466_s30 }
 0x1fe   : >> { %s4510_s8 = smov (%p2384_p8, %s2383_s8), 0  ;;  %2377 = sbr.rel (!%p2374_p10) target bundleno = 507 (0x1fb), region = 138 }
 0x1ff   : >> { %s2967_s9 = sshll.u32 %s4510_s8, 2  ;;  %s3622_s6 = smov %s4510_s8  }
 0x200   : >> { %s2388_s5 = scalar_lea.vmem %s2369_s24, %s2967_s9 [#allocation6]   ;;  %s2389_s26 = scalar_lea.vmem %s2371_s21, %s2967_s9  }
 0x205 PF: > { %p12_p11 = scmp.ge.s32.totalorder %s3669_s16, 4   ;;  %s4502_s12 = smov %s3591_s13 }
 0x206   : > { %s4503_s13 = smov %s3677_s19  ;;  %s4504_s14 = smov %s3669_s16 }
 0x207   :  { %14 = sbr.rel (!%p12_p11) target bundleno = 3 (0x3), region = 149 }
 0x20e   :  { %2576 = vsyncpa [#allocation3], 1 }
 0x20f   :  { %2578 = vsyncpa [#allocation3 + $0x1], 1 }
 0x210   :  { %2579 = vsyncpa [#allocation5], 1 }

// kernel: simple_cnn_forward.6
= control target key start
LH: loop header
LB: loop body
LE: loop exit
PB: predicated region body
PF: predicated region fallthrough
CT: control target
= control target key end

     0   :  { %vm74_vm0 = vcmask 1043456   ;;  %vm75_vm1 = vcmask 523268   ;;  %vm83_vm3 = vcmask 1041408   ;;  %vm84_vm4 = vcmask 521220   ;;  %s248_s0 = inlined_call_operand.vmem [shape: bf16[28,448], index: 0, kind: input, shape index: {}]   ;;  %s249_s1 = inlined_call_operand.vmem [shape: bf16[28,448], index: 1, kind: input, shape index: {}]   ;;  %s250_s2 = inlined_call_operand.vmem [shape: bf16[28,448], index: 2, kind: input, shape index: {}]   ;;  %s251_s3 = inlined_call_operand.vmem [shape: bf16[28,448], index: 3, kind: input, shape index: {}]   ;;  %s252_s4 = inlined_call_operand.vmem [shape: bf16[28,448], index: 4, kind: output, shape index: {}]  }
   0x1   :  { %v17_v0 = vld [vmem:[%s248_s0] sm:$0xff]  ;;  %v18_v5 = vld [vmem:[%s248_s0 + $0x8] sm:$0xff]  ;;  %vm140_vm2 = vmor %vm75_vm1, %vm74_vm0 }
   0x2   :  { %v25_v1 = vld [vmem:[%s249_s1] sm:$0xff]  ;;  %v26_v6 = vld [vmem:[%s249_s1 + $0x8] sm:$0xff]  ;;  %v19_v13 = vld [vmem:[%s248_s0 + $0x10] sm:$0xff] }
   0x3   :  { %v41_v2 = vld [vmem:[%s250_s2] sm:$0xff]  ;;  %v33_v3 = vmax.bf16 %v25_v1, %v17_v0  ;;  %v34_v8 = vmax.bf16 %v26_v6, %v18_v5  ;;  %v42_v9 = vld [vmem:[%s250_s2 + $0x8] sm:$0xff]  ;;  %v27_v14 = vld [vmem:[%s249_s1 + $0x10] sm:$0xff] }
   0x4   :  { %v49_v4 = vld [vmem:[%s251_s3] sm:$0xff]  ;;  %v50_v10 = vld [vmem:[%s251_s3 + $0x8] sm:$0xff]  ;;  %v43_v15 = vld [vmem:[%s250_s2 + $0x10] sm:$0xff]  ;;  %v35_v17 = vmax.bf16 %v27_v14, %v19_v13 }
   0x5   :  { %v57_v7 = vmax.bf16 %v49_v4, %v41_v2  ;;  %v58_v12 = vmax.bf16 %v50_v10, %v42_v9  ;;  %v51_v18 = vld [vmem:[%s251_s3 + $0x10] sm:$0xff]  ;;  %v20_v19 = vld [vmem:[%s248_s0 + $0x18] sm:$0xff]  ;;  %v21_v26 = vld [vmem:[%s248_s0 + $0x20] sm:$0xff] }
   0x6   :  { %v28_v20 = vld [vmem:[%s249_s1 + $0x18] sm:$0xff]  ;;  %v59_v22 = vmax.bf16 %v51_v18, %v43_v15  ;;  %v29_v28 = vld [vmem:[%s249_s1 + $0x20] sm:$0xff]  ;;  %v22_v34 = vld [vmem:[%s248_s0 + $0x28] sm:$0xff] }
   0x7   :  { %v65_v16 = vmax.bf16 %v57_v7, %v33_v3  ;;  %v66_v21 = vmax.bf16 %v58_v12, %v34_v8  ;;  %v36_v23 = vmax.bf16 %v28_v20, %v20_v19  ;;  %v44_v24 = vld [vmem:[%s250_s2 + $0x18] sm:$0xff]  ;;  %v45_v29 = vld [vmem:[%s250_s2 + $0x20] sm:$0xff]  ;;  %v37_v32 = vmax.bf16 %v29_v28, %v21_v26  ;;  %v30_v35 = vld [vmem:[%s249_s1 + $0x28] sm:$0xff] }
   0x8   :  { %v52_v25 = vld [vmem:[%s251_s3 + $0x18] sm:$0xff]  ;;  %v53_v30 = vld [vmem:[%s251_s3 + $0x20] sm:$0xff]  ;;  %v67_v31 = vmax.bf16 %v59_v22, %v35_v17  ;;  %v46_v36 = vld [vmem:[%s250_s2 + $0x28] sm:$0xff]  ;;  %v38_v38 = vmax.bf16 %v30_v35, %v22_v34 }
   0x9   :  { %73 = vst [vmem:[%s252_s4] sm:$0xff] %v65_v16  ;;  %v60_v27 = vmax.bf16 %v52_v25, %v44_v24  ;;  %77 = vst.msk [vmem:[%s252_s4 + $0x8] sm:$0xff] %vm140_vm2, %v66_v21  ;;  %v61_v33 = vmax.bf16 %v53_v30, %v45_v29  ;;  %v54_v39 = vld [vmem:[%s251_s3 + $0x28] sm:$0xff]  ;;  %v23_v40 = vld [vmem:[%s248_s0 + $0x30] sm:$0x33] }
   0xa   :  { %v31_v41 = vld [vmem:[%s249_s1 + $0x30] sm:$0x33]  ;;  %78 = vst [vmem:[%s252_s4 + $0x10] sm:$0xff] %v67_v31  ;;  %v62_v43 = vmax.bf16 %v54_v39, %v46_v36  ;;  %v24_v47 = vld [vmem:[%s248_s0 + $0x38] sm:$0x33]  ;;  %vm85_vm5 = vmor %vm84_vm4, %vm83_vm3 }
   0xb   :  { %v68_v37 = vmax.bf16 %v60_v27, %v36_v23  ;;  %v69_v42 = vmax.bf16 %v61_v33, %v37_v32  ;;  %v39_v44 = vmax.bf16 %v31_v41, %v23_v40  ;;  %v47_v45 = vld [vmem:[%s250_s2 + $0x30] sm:$0x33]  ;;  %v32_v49 = vld [vmem:[%s249_s1 + $0x38] sm:$0x33] }
   0xc   :  { %v55_v46 = vld [vmem:[%s251_s3 + $0x30] sm:$0x33]  ;;  %v48_v50 = vld [vmem:[%s250_s2 + $0x38] sm:$0x33]  ;;  %v70_v52 = vmax.bf16 %v62_v43, %v38_v38  ;;  %v40_v53 = vmax.bf16 %v32_v49, %v24_v47 }
   0xd   :  { %79 = vst.msk [vmem:[%s252_s4 + $0x18] sm:$0xff] %vm140_vm2, %v68_v37  ;;  %v63_v48 = vmax.bf16 %v55_v46, %v47_v45  ;;  %v56_v51 = vld [vmem:[%s251_s3 + $0x38] sm:$0x33]  ;;  %80 = vst [vmem:[%s252_s4 + $0x20] sm:$0xff] %v69_v42 }
   0xe   :  { %v64_v54 = vmax.bf16 %v56_v51, %v48_v50  ;;  %81 = vst.msk [vmem:[%s252_s4 + $0x28] sm:$0xff] %vm140_vm2, %v70_v52 }
   0xf   :  { %v71_v55 = vmax.bf16 %v63_v48, %v39_v44 }
  0x10   :  { %v72_v56 = vmax.bf16 %v64_v54, %v40_v53 }
  0x11   :  { %82 = vst [vmem:[%s252_s4 + $0x30] sm:$0x33] %v71_v55 }
  0x12   :  { %86 = vst.msk [vmem:[%s252_s4 + $0x38] sm:$0x33] %vm85_vm5, %v72_v56 }

// kernel: simple_cnn_forward.7
= control target key start
LH: loop header
LB: loop body
LE: loop exit
PB: predicated region body
PF: predicated region fallthrough
CT: control target
= control target key end

     0   :  { %v2040_v0 = vmov 0   ;;  %v2041_v2 = vmov 0.0   ;;  %vm2042_vm0 = vmmov 0   ;;  %vm634_vm1 = vcmask 261120   ;;  %s2814_s1 = inlined_call_operand.vmem [shape: bf16[288,64], index: 1, kind: input, shape index: {}]   ;;  %s2815_s0 = inlined_call_operand.vmem [shape: bf16[392,288], index: 0, kind: input, shape index: {}]   ;;  %s2816_s2 = inlined_call_operand.vmem [shape: f32[1,64], index: 2, kind: input, shape index: {}]   ;;  %s2817_s3 = inlined_call_operand.vmem [shape: bf16[392,64], index: 3, kind: output, shape index: {}]  }
   0x1   :  { %710 = vmatprep.subr.bf16.mxu1 %v2040_v0  ;;  %v1923_v1 = vld [vmem:[%s2814_s1] sm:$0xff]   ;;  %1718 = vmatprep.subr.bf16.mxu0 %v2041_v2  ;;  %v1924_v3 = vld [vmem:[%s2814_s1 + $0x8] sm:$0xff]   ;;  %v1925_v4 = vld [vmem:[%s2814_s1 + $0x10] sm:$0xff]   ;;  %vm1420_vm2 = vcmask 519168  }
   0x2   :  { %1722 = vmatprep.mubr.msk.bf16.mxu0 %vm2042_vm0, %v2041_v2  ;;  %711 = vmatpush1.bf16.msra.mxu1 %v1923_v1  ;;  %v1926_v5 = vld [vmem:[%s2814_s1 + $0x18] sm:$0xff]   ;;  %v1927_v6 = vld [vmem:[%s2814_s1 + $0x20] sm:$0xff]   ;;  %v1939_v8 = vld [vmem:[%s2814_s1 + $0x88] sm:$0xff]  }
   0x3   :  { %712 = vmatprep.subr.bf16.mxu1 %v2040_v0  ;;  %v1937_v7 = vld [vmem:[%s2814_s1 + $0x80] sm:$0xff]   ;;  %v1928_v9 = vld [vmem:[%s2814_s1 + $0x28] sm:$0xff]   ;;  %v1929_v12 = vld [vmem:[%s2814_s1 + $0x30] sm:$0xff]  }
   0x4   :  { %1719 = vmatpush3.bf16.msra.mxu0 %v1937_v7  ;;  %v1943_v10 = vld [vmem:[%s2815_s0 + $0x4] ss:$12 sps:$4 sm:$0xff]   ;;  %v1944_v11 = vld [vmem:[%s2815_s0 + $0x8] ss:$12 sps:$4 sm:$0xff]   ;;  %v1930_v13 = vld [vmem:[%s2814_s1 + $0x38] sm:$0xff]  }
   0x5   :  { %1720 = vmatprep.subr.bf16.mxu0 %v2041_v2  ;;  %742 = vmatprep.mubr.bf16.mxu1 %v1943_v10  ;;  %v1947_v14 = vld [vmem:[%s2815_s0 + $0x20] ss:$12 sps:$4 sm:$0xff]   ;;  %v1951_v17 = vld [vmem:[%s2815_s0 + $0x38] ss:$12 sps:$4 sm:$0xff]   ;;  %v1933_v18 = vld [vmem:[%s2814_s1 + $0x50] sm:$0xff]  }
   0x6   :  { %713 = vmatpush1.bf16.msra.mxu1 %v1924_v3  ;;  %v1931_v15 = vld [vmem:[%s2814_s1 + $0x40] sm:$0xff]   ;;  %v1932_v16 = vld [vmem:[%s2814_s1 + $0x48] sm:$0xff]   ;;  %v1934_v19 = vld [vmem:[%s2814_s1 + $0x58] sm:$0xff]  }
   0x7   :  { %714 = vmatprep.subr.bf16.mxu1 %v2040_v0  ;;  %v1955_v20 = vld [vmem:[%s2815_s0 + $0x50] ss:$12 sps:$4 sm:$0xff]   ;;  %v1935_v21 = vld [vmem:[%s2814_s1 + $0x60] sm:$0xff]   ;;  %v1936_v22 = vld [vmem:[%s2814_s1 + $0x68] sm:$0xff]  }
   0x8   :  { %1721 = vmatpush3.bf16.msra.mxu0 %v1939_v8  ;;  %v1959_v23 = vld [vmem:[%s2815_s0 + $0x68] ss:$12 sps:$4 sm:$0xff]   ;;  %v1940_v25 = vld [vmem:[%s2814_s1 + $0x78] sm:$0xff]   ;;  %v1963_v26 = vld [vmem:[%s2815_s0 + $0x80] ss:$12 sps:$4 sm:$0xff]  }
   0x9   :  { %v1938_v24 = vld [vmem:[%s2814_s1 + $0x70] sm:$0xff]   ;;  %v1941_v27 = vld [vmem:[%s2815_s0] ss:$12 sps:$4 sm:$0xff]   ;;  %v1945_v28 = vld [vmem:[%s2815_s0 + $0x1c] ss:$12 sps:$4 sm:$0xff]  }
   0xa   :  { %715 = vmatpush1.bf16.msra.mxu1 %v1925_v4  ;;  %v1967_v29 = vld [vmem:[%s2815_s0 + $0x98] ss:$12 sps:$4 sm:$0xff]   ;;  %v1949_v31 = vld [vmem:[%s2815_s0 + $0x34] ss:$12 sps:$4 sm:$0xff]   ;;  %v1971_v32 = vld [vmem:[%s2815_s0 + $0xb0] ss:$12 sps:$4 sm:$0xff]  }
   0xb   :  { %716 = vmatprep.subr.bf16.mxu1 %v2040_v0  ;;  %1723 = vmatmul.mubr.msk.bf16.vlgmr.msra.gmra.mrb[0].mxu0 %vm634_vm1, %v1944_v11  ;;  %v1948_v30 = vld [vmem:[%s2815_s0 + $0x18] ss:$12 sps:$4 sm:$0xff]   ;;  %v1952_v33 = vld [vmem:[%s2815_s0 + $0x30] ss:$12 sps:$4 sm:$0xff]   ;;  %v1975_v35 = vld [vmem:[%s2815_s0 + $0xc8] ss:$12 sps:$4 sm:$0xff]  }
   0xc   :  { %1726 = vmatprep.mubr.msk.bf16.mxu0 %vm2042_vm0, %v2041_v2  ;;  %v1953_v34 = vld [vmem:[%s2815_s0 + $0x4c] ss:$12 sps:$4 sm:$0xff]   ;;  %v1956_v36 = vld [vmem:[%s2815_s0 + $0x48] ss:$12 sps:$4 sm:$0xff]   ;;  %v1957_v37 = vld [vmem:[%s2815_s0 + $0x64] ss:$12 sps:$4 sm:$0xff]  }
   0xd   :  { %v1979_v38 = vld [vmem:[%s2815_s0 + $0xe0] ss:$12 sps:$4 sm:$0xff]   ;;  %v1961_v40 = vld [vmem:[%s2815_s0 + $0x7c] ss:$12 sps:$4 sm:$0xff]   ;;  %v1983_v41 = vld [vmem:[%s2815_s0 + $0xf8] ss:$12 sps:$4 sm:$0xff]  }
   0xe   :  { %717 = vmatpush1.bf16.msra.mxu1 %v1926_v5  ;;  %v1960_v39 = vld [vmem:[%s2815_s0 + $0x60] ss:$12 sps:$4 sm:$0xff]   ;;  %v1964_v42 = vld [vmem:[%s2815_s0 + $0x78] ss:$12 sps:$4 sm:$0xff]   ;;  %v1987_v44 = vld [vmem:[%s2815_s0 + $0x110] ss:$12 sps:$4 sm:$0xff]  }
   0xf   :  { %718 = vmatprep.subr.bf16.mxu1 %v2040_v0  ;;  %v1965_v43 = vld [vmem:[%s2815_s0 + $0x94] ss:$12 sps:$4 sm:$0xff]   ;;  %v1968_v45 = vld [vmem:[%s2815_s0 + $0x90] ss:$12 sps:$4 sm:$0xff]   ;;  %v1969_v46 = vld [vmem:[%s2815_s0 + $0xac] ss:$12 sps:$4 sm:$0xff]  }
  0x10   :  { %v1991_v47 = vld [vmem:[%s2815_s0 + $0x128] ss:$12 sps:$4 sm:$0xff]   ;;  %v1973_v49 = vld [vmem:[%s2815_s0 + $0xc4] ss:$12 sps:$4 sm:$0xff]   ;;  %v1995_v50 = vld [vmem:[%s2815_s0 + $0x140] ss:$12 sps:$4 sm:$0xff]  }
  0x11   :  { %v1972_v48 = vld [vmem:[%s2815_s0 + $0xa8] ss:$12 sps:$4 sm:$0xff]   ;;  %v1976_v51 = vld [vmem:[%s2815_s0 + $0xc0] ss:$12 sps:$4 sm:$0xff]   ;;  %v1999_v53 = vld [vmem:[%s2815_s0 + $0x158] ss:$12 sps:$4 sm:$0xff]  }
  0x12   :  { %719 = vmatpush1.bf16.msra.mxu1 %v1927_v6  ;;  %v1977_v52 = vld [vmem:[%s2815_s0 + $0xdc] ss:$12 sps:$4 sm:$0xff]   ;;  %v1980_v54 = vld [vmem:[%s2815_s0 + $0xd8] ss:$12 sps:$4 sm:$0xff]   ;;  %v1981_v55 = vld [vmem:[%s2815_s0 + $0xf4] ss:$12 sps:$4 sm:$0xff]  }
  0x13   :  { %720 = vmatprep.subr.bf16.mxu1 %v2040_v0  ;;  %1727 = vmatmul.mubr.msk.bf16.gmra.mrb[4].mxu0 %vm634_vm1, %v1947_v14  ;;  %v2003_v56 = vld [vmem:[%s2815_s0 + $0x170] ss:$12 sps:$4 sm:$0xff]   ;;  %v1985_v58 = vld [vmem:[%s2815_s0 + $0x10c] ss:$12 sps:$4 sm:$0xff]   ;;  %v2007_v59 = vld [vmem:[%s2815_s0 + $0x188] ss:$12 sps:$4 sm:$0xff]  }
  0x14   :  { %1730 = vmatprep.mubr.msk.bf16.mxu0 %vm2042_vm0, %v2041_v2  ;;  %v1984_v57 = vld [vmem:[%s2815_s0 + $0xf0] ss:$12 sps:$4 sm:$0xff]   ;;  %v1988_v60 = vld [vmem:[%s2815_s0 + $0x108] ss:$12 sps:$4 sm:$0xff]   ;;  %v2011_v62 = vld [vmem:[%s2815_s0 + $0x1a0] ss:$12 sps:$4 sm:$0xff]  }
  0x15   :  { %v1989_v61 = vld [vmem:[%s2815_s0 + $0x124] ss:$12 sps:$4 sm:$0xff]   ;;  %v1992_v63 = vld [vmem:[%s2815_s0 + $0x120] ss:$12 sps:$4 sm:$0xff]   ;;  %v2023_v8 = vld [vmem:[%s2815_s0 + $0x1e8] ss:$12 sps:$4 sm:$0xff]  }
  0x16   :  { %721 = vmatpush1.bf16.msra.mxu1 %v1928_v9  ;;  %v2015_v1 = vld [vmem:[%s2815_s0 + $0x1b8] ss:$12 sps:$4 sm:$0xff]   ;;  %v1997_v4 = vld [vmem:[%s2815_s0 + $0x154] ss:$12 sps:$4 sm:$0xff]   ;;  %v2019_v5 = vld [vmem:[%s2815_s0 + $0x1d0] ss:$12 sps:$4 sm:$0xff]  }
  0x17   :  { %722 = vmatprep.subr.bf16.mxu1 %v2040_v0  ;;  %v1996_v3 = vld [vmem:[%s2815_s0 + $0x138] ss:$12 sps:$4 sm:$0xff]   ;;  %v2000_v6 = vld [vmem:[%s2815_s0 + $0x150] ss:$12 sps:$4 sm:$0xff]   ;;  %v2004_v9 = vld [vmem:[%s2815_s0 + $0x168] ss:$12 sps:$4 sm:$0xff]  }
  0x18   :  { %v2001_v7 = vld [vmem:[%s2815_s0 + $0x16c] ss:$12 sps:$4 sm:$0xff]   ;;  %v2005_v10 = vld [vmem:[%s2815_s0 + $0x184] ss:$12 sps:$4 sm:$0xff]  }
  0x19   :  { %v2027_v11 = vld [vmem:[%s2815_s0 + $0x200] ss:$12 sps:$4 sm:$0xff]   ;;  %v2031_v14 = vld [vmem:[%s2815_s0 + $0x218] ss:$12 sps:$4 sm:$0xff]  }
  0x1a   :  { %723 = vmatpush1.bf16.msra.mxu1 %v1929_v12  ;;  %v2008_v12 = vld [vmem:[%s2815_s0 + $0x180] ss:$12 sps:$4 sm:$0xff]  }
  0x1b   :  { %724 = vmatprep.subr.bf16.mxu1 %v2040_v0  ;;  %1731 = vmatmul.mubr.msk.bf16.gmra.mrb[8].mxu0 %vm634_vm1, %v1951_v17  ;;  %v2035_v17 = vld [vmem:[%s2815_s0 + $0x230] ss:$12 sps:$4 sm:$0xff]  }
  0x1c   :  { %1734 = vmatprep.mubr.msk.bf16.mxu0 %vm2042_vm0, %v2041_v2 }
  0x1e   :  { %725 = vmatpush1.bf16.msra.mxu1 %v1930_v13  ;;  %v2009_v13 = vld [vmem:[%s2815_s0 + $0x19c] ss:$12 sps:$4 sm:$0xff]  }
  0x1f   :  { %726 = vmatprep.subr.bf16.mxu1 %v2040_v0 }
  0x22   :  { %727 = vmatpush1.bf16.msra.mxu1 %v1931_v15  ;;  %v2012_v15 = vld [vmem:[%s2815_s0 + $0x198] ss:$12 sps:$4 sm:$0xff]  }
  0x23   :  { %728 = vmatprep.subr.bf16.mxu1 %v2040_v0  ;;  %1735 = vmatmul.mubr.msk.bf16.gmra.mrb[12].mxu0 %vm634_vm1, %v1955_v20  ;;  %v2038_v20 = vld [vmem:[%s2815_s0 + $0x248] ss:$0 sps:$4 sm:$0xff]  }
  0x24   :  { %1738 = vmatprep.mubr.msk.bf16.mxu0 %vm2042_vm0, %v2041_v2 }
  0x26   :  { %729 = vmatpush1.bf16.msra.mxu1 %v1932_v16  ;;  %v2013_v16 = vld [vmem:[%s2815_s0 + $0x1b4] ss:$12 sps:$4 sm:$0xff]  }
  0x27   :  { %730 = vmatprep.subr.bf16.mxu1 %v2040_v0 }
  0x2a   :  { %731 = vmatpush1.bf16.msra.mxu1 %v1933_v18  ;;  %v2016_v18 = vld [vmem:[%s2815_s0 + $0x1b0] ss:$12 sps:$4 sm:$0xff]  }
  0x2b   :  { %732 = vmatprep.subr.bf16.mxu1 %v2040_v0  ;;  %1739 = vmatmul.mubr.msk.bf16.gmra.mrb[16].mxu0 %vm634_vm1, %v1959_v23  ;;  %v2025_v23 = vld [vmem:[%s2815_s0 + $0x1fc] ss:$12 sps:$4 sm:$0xff]  }
  0x2c   :  { %1742 = vmatprep.mubr.msk.bf16.mxu0 %vm2042_vm0, %v2041_v2 }
  0x2e   :  { %733 = vmatpush1.bf16.msra.mxu1 %v1934_v19  ;;  %v2017_v19 = vld [vmem:[%s2815_s0 + $0x1cc] ss:$12 sps:$4 sm:$0xff]  }
  0x2f   :  { %734 = vmatprep.subr.bf16.mxu1 %v2040_v0 }
  0x32   :  { %735 = vmatpush1.bf16.msra.mxu1 %v1935_v21  ;;  %v2020_v21 = vld [vmem:[%s2815_s0 + $0x1c8] ss:$12 sps:$4 sm:$0xff]  }
  0x33   :  { %736 = vmatprep.subr.bf16.mxu1 %v2040_v0  ;;  %1743 = vmatmul.mubr.msk.bf16.gmra.mrb[20].mxu0 %vm634_vm1, %v1963_v26 }
  0x34   :  { %1746 = vmatprep.mubr.msk.bf16.mxu0 %vm2042_vm0, %v2041_v2 }
  0x36   :  { %737 = vmatpush1.bf16.msra.mxu1 %v1936_v22  ;;  %v2021_v22 = vld [vmem:[%s2815_s0 + $0x1e4] ss:$12 sps:$4 sm:$0xff]  }
  0x37   :  { %738 = vmatprep.subr.bf16.mxu1 %v2040_v0 }
  0x3a   :  { %739 = vmatpush1.bf16.msra.mxu1 %v1938_v24  ;;  %v2028_v24 = vld [vmem:[%s2815_s0 + $0x1f8] ss:$12 sps:$4 sm:$0xff]  }
  0x3b   :  { %740 = vmatprep.subr.bf16.mxu1 %v2040_v0  ;;  %1747 = vmatmul.mubr.msk.bf16.gmra.mrb[24].mxu0 %vm634_vm1, %v1967_v29  ;;  %v1993_v0 = vld [vmem:[%s2815_s0 + $0x13c] ss:$12 sps:$4 sm:$0xff]  }
  0x3c   :  { %1750 = vmatprep.mubr.msk.bf16.mxu0 %vm2042_vm0, %v2041_v2  ;;  %v2032_v29 = vld [vmem:[%s2815_s0 + $0x210] ss:$12 sps:$4 sm:$0xff]  }
  0x3e   :  { %741 = vmatpush1.bf16.msra.mxu1 %v1940_v25  ;;  %v2029_v25 = vld [vmem:[%s2815_s0 + $0x214] ss:$12 sps:$4 sm:$0xff]  }
  0x41   :  { %743 = vmatmul.mubr.bf16.vlgmr.msra.gmra.mrb[0].mxu1 %v1941_v27 }
  0x42   :  { %750 = vmatprep.mubr.bf16.mxu1 %v1945_v28 }
  0x43   :  { %1751 = vmatmul.mubr.msk.bf16.gmra.mrb[28].mxu0 %vm634_vm1, %v1971_v32 }
  0x44   :  { %1754 = vmatprep.mubr.msk.bf16.mxu0 %vm2042_vm0, %v2041_v2 }
  0x49   :  { %751 = vmatmul.mubr.bf16.gmra.mrb[4].mxu1 %v1948_v30 }
  0x4a   :  { %758 = vmatprep.mubr.bf16.mxu1 %v1949_v31  ;;  %v2033_v31 = vld [vmem:[%s2815_s0 + $0x22c] ss:$12 sps:$4 sm:$0xff]  }
  0x4b   :  { %1755 = vmatmul.mubr.msk.bf16.gmra.mrb[32].mxu0 %vm634_vm1, %v1975_v35 }
  0x4c   :  { %1758 = vmatprep.mubr.msk.bf16.mxu0 %vm2042_vm0, %v2041_v2 }
  0x51   :  { %759 = vmatmul.mubr.bf16.gmra.mrb[8].mxu1 %v1952_v33  ;;  %v111_v33 = vld [vmem:[%s2815_s0 + $0x240] sm:$0xff] }
  0x52   :  { %766 = vmatprep.mubr.bf16.mxu1 %v1953_v34 }
  0x53   :  { %1759 = vmatmul.mubr.msk.bf16.gmra.mrb[36].mxu0 %vm634_vm1, %v1979_v38  ;;  %v1548_v38 = vcombine.high %v111_v33, %v111_v33 }
  0x54   :  { %1762 = vmatprep.mubr.msk.bf16.mxu0 %vm2042_vm0, %v2041_v2 }
  0x59   :  { %767 = vmatmul.mubr.bf16.gmra.mrb[12].mxu1 %v1956_v36  ;;  %v2036_v36 = vld [vmem:[%s2815_s0 + $0x228] ss:$12 sps:$4 sm:$0xff]  }
  0x5a   :  { %774 = vmatprep.mubr.bf16.mxu1 %v1957_v37 }
  0x5b   :  { %1763 = vmatmul.mubr.msk.bf16.gmra.mrb[40].mxu0 %vm634_vm1, %v1983_v41 }
  0x5c   :  { %1766 = vmatprep.mubr.msk.bf16.mxu0 %vm2042_vm0, %v2041_v2 }
  0x61   :  { %775 = vmatmul.mubr.bf16.gmra.mrb[16].mxu1 %v1960_v39 }
  0x62   :  { %782 = vmatprep.mubr.bf16.mxu1 %v1961_v40 }
  0x63   :  { %1767 = vmatmul.mubr.msk.bf16.gmra.mrb[44].mxu0 %vm634_vm1, %v1987_v44 }
  0x64   :  { %1770 = vmatprep.mubr.msk.bf16.mxu0 %vm2042_vm0, %v2041_v2 }
  0x69   :  { %783 = vmatmul.mubr.bf16.gmra.mrb[20].mxu1 %v1964_v42  ;;  %v1547_v42 = vcombine.low %v111_v33, %v111_v33 }
  0x6a   :  { %790 = vmatprep.mubr.bf16.mxu1 %v1965_v43 }
  0x6b   :  { %1771 = vmatmul.mubr.msk.bf16.gmra.mrb[48].mxu0 %vm634_vm1, %v1991_v47 }
  0x6c   :  { %1774 = vmatprep.mubr.msk.bf16.mxu0 %vm2042_vm0, %v2041_v2 }
  0x71   :  { %791 = vmatmul.mubr.bf16.gmra.mrb[24].mxu1 %v1968_v45 }
  0x72   :  { %798 = vmatprep.mubr.bf16.mxu1 %v1969_v46 }
  0x73   :  { %1775 = vmatmul.mubr.msk.bf16.gmra.mrb[52].mxu0 %vm634_vm1, %v1995_v50 }
  0x74   :  { %1778 = vmatprep.mubr.msk.bf16.mxu0 %vm2042_vm0, %v2041_v2 }
  0x79   :  { %799 = vmatmul.mubr.bf16.gmra.mrb[28].mxu1 %v1972_v48 }
  0x7a   :  { %806 = vmatprep.mubr.bf16.mxu1 %v1973_v49 }
  0x7b   :  { %1779 = vmatmul.mubr.msk.bf16.gmra.mrb[56].mxu0 %vm634_vm1, %v1999_v53 }
  0x7c   :  { %1782 = vmatprep.mubr.msk.bf16.mxu0 %vm2042_vm0, %v2041_v2 }
  0x81   :  { %807 = vmatmul.mubr.bf16.gmra.mrb[32].mxu1 %v1976_v51 }
  0x82   :  { %814 = vmatprep.mubr.bf16.mxu1 %v1977_v52  ;;  %v2445_v52 = vld [vmem:[%s2816_s2] ss:$0 sm:$0xff] }
  0x83   :  { %1783 = vmatmul.mubr.msk.bf16.gmra.mrb[60].mxu0 %vm634_vm1, %v2003_v56 }
  0x84   :  { %1786 = vmatprep.mubr.msk.bf16.mxu0 %vm2042_vm0, %v2041_v2 }
  0x89   :  { %815 = vmatmul.mubr.bf16.gmra.mrb[36].mxu1 %v1980_v54 }
  0x8a   :  { %822 = vmatprep.mubr.bf16.mxu1 %v1981_v55 }
  0x8b   :  { %1787 = vmatmul.mubr.msk.bf16.gmra.mrb[64].mxu0 %vm634_vm1, %v2007_v59 }
  0x8c   :  { %1790 = vmatprep.mubr.msk.bf16.mxu0 %vm2042_vm0, %v2041_v2 }
  0x91   :  { %823 = vmatmul.mubr.bf16.gmra.mrb[40].mxu1 %v1984_v57 }
  0x92   :  { %830 = vmatprep.mubr.bf16.mxu1 %v1985_v58 }
  0x93   :  { %1791 = vmatmul.mubr.msk.bf16.gmra.mrb[68].mxu0 %vm634_vm1, %v2011_v62 }
  0x94   :  { %1794 = vmatprep.mubr.msk.bf16.mxu0 %vm2042_vm0, %v2041_v2 }
  0x99   :  { %831 = vmatmul.mubr.bf16.gmra.mrb[44].mxu1 %v1988_v60 }
  0x9a   :  { %838 = vmatprep.mubr.bf16.mxu1 %v1989_v61 }
  0x9b   :  { %1795 = vmatmul.mubr.msk.bf16.gmra.mrb[72].mxu0 %vm634_vm1, %v2015_v1 }
  0x9c   :  { %1798 = vmatprep.mubr.msk.bf16.mxu0 %vm2042_vm0, %v2041_v2 }
  0xa1   :  { %839 = vmatmul.mubr.bf16.gmra.mrb[48].mxu1 %v1992_v63 }
  0xa2   :  { %846 = vmatprep.mubr.bf16.mxu1 %v1993_v0 }
  0xa3   :  { %1799 = vmatmul.mubr.msk.bf16.gmra.mrb[76].mxu0 %vm634_vm1, %v2019_v5 }
  0xa4   :  { %1802 = vmatprep.mubr.msk.bf16.mxu0 %vm2042_vm0, %v2041_v2 }
  0xa9   :  { %847 = vmatmul.mubr.bf16.gmra.mrb[52].mxu1 %v1996_v3 }
  0xaa   :  { %854 = vmatprep.mubr.bf16.mxu1 %v1997_v4 }
  0xab   :  { %1803 = vmatmul.mubr.msk.bf16.gmra.mrb[80].mxu0 %vm634_vm1, %v2023_v8 }
  0xac   :  { %1806 = vmatprep.mubr.msk.bf16.mxu0 %vm2042_vm0, %v2041_v2 }
  0xb1   :  { %855 = vmatmul.mubr.bf16.gmra.mrb[56].mxu1 %v2000_v6 }
  0xb2   :  { %862 = vmatprep.mubr.bf16.mxu1 %v2001_v7 }
  0xb3   :  { %1807 = vmatmul.mubr.msk.bf16.gmra.mrb[84].mxu0 %vm634_vm1, %v2027_v11 }
  0xb4   :  { %1810 = vmatprep.mubr.msk.bf16.mxu0 %vm2042_vm0, %v2041_v2 }
  0xb9   :  { %863 = vmatmul.mubr.bf16.gmra.mrb[60].mxu1 %v2004_v9 }
  0xba   :  { %870 = vmatprep.mubr.bf16.mxu1 %v2005_v10 }
  0xbb   :  { %1811 = vmatmul.mubr.msk.bf16.gmra.mrb[88].mxu0 %vm634_vm1, %v2031_v14 }
  0xbc   :  { %1814 = vmatprep.mubr.msk.bf16.mxu0 %vm2042_vm0, %v2041_v2 }
  0xc1   :  { %871 = vmatmul.mubr.bf16.gmra.mrb[64].mxu1 %v2008_v12 }
  0xc2   :  { %878 = vmatprep.mubr.bf16.mxu1 %v2009_v13 }
  0xc3   :  { %1815 = vmatmul.mubr.msk.bf16.gmra.mrb[92].mxu0 %vm634_vm1, %v2035_v17 }
  0xc4   :  { %1818 = vmatprep.mubr.msk.bf16.mxu0 %vm2042_vm0, %v2041_v2  ;;  %v2024_v2 = vld [vmem:[%s2815_s0 + $0x1e0] ss:$12 sps:$4 sm:$0xff]  }
  0xc9   :  { %879 = vmatmul.mubr.bf16.gmra.mrb[68].mxu1 %v2012_v15 }
  0xca   :  { %886 = vmatprep.mubr.bf16.mxu1 %v2013_v16 }
  0xcb   :  { %1819 = vmatmul.mubr.msk.bf16.gmra.mrb[96].mxu0 %vm634_vm1, %v2038_v20 }
  0xd1   :  { %887 = vmatmul.mubr.bf16.gmra.mrb[72].mxu1 %v2016_v18 }
  0xd2   :  { %894 = vmatprep.mubr.bf16.mxu1 %v2017_v19 }
  0xd9   :  { %895 = vmatmul.mubr.bf16.gmra.mrb[76].mxu1 %v2020_v21 }
  0xda   :  { %902 = vmatprep.mubr.bf16.mxu1 %v2021_v22 }
  0xde   :  { %v976_v26 = vpop.f32.mrb[0].mxu0 }
  0xdf   :  { %v1724_v27 = vpop.f32.mrb[1].mxu0 }
  0xe0   :  { %v979_v28 = vpop.f32.mrb[2].mxu0 }
  0xe1   :  { %903 = vmatmul.mubr.bf16.gmra.mrb[80].mxu1 %v2024_v2  ;;  %v1725_v30 = vpop.f32.mrb[3].mxu0 }
  0xe2   :  { %910 = vmatprep.mubr.bf16.mxu1 %v2025_v23 }
  0xe6   :  { %v984_v32 = vpop.f32.mrb[4].mxu0 }
  0xe7   :  { %v1728_v34 = vpop.f32.mrb[5].mxu0 }
  0xe8   :  { %v987_v35 = vpop.f32.mrb[6].mxu0 }
  0xe9   :  { %911 = vmatmul.mubr.bf16.gmra.mrb[84].mxu1 %v2028_v24  ;;  %v1729_v37 = vpop.f32.mrb[7].mxu0 }
  0xea   :  { %918 = vmatprep.mubr.bf16.mxu1 %v2029_v25 }
  0xee   :  { %v992_v39 = vpop.f32.mrb[8].mxu0 }
  0xef   :  { %v1732_v40 = vpop.f32.mrb[9].mxu0 }
  0xf0   :  { %v2432_v41 = vpop.f32.mrb[10].mxu0 }
  0xf1   :  { %919 = vmatmul.mubr.bf16.gmra.mrb[88].mxu1 %v2032_v29  ;;  %v1733_v43 = vpop.f32.mrb[11].mxu0 }
  0xf2   :  { %926 = vmatprep.mubr.bf16.mxu1 %v2033_v31 }
  0xf6   :  { %v2434_v44 = vpop.f32.mrb[12].mxu0 }
  0xf7   :  { %v1736_v45 = vpop.f32.mrb[13].mxu0 }
  0xf8   :  { %v2436_v46 = vpop.f32.mrb[14].mxu0 }
  0xf9   :  { %927 = vmatmul.mubr.bf16.gmra.mrb[92].mxu1 %v2036_v36  ;;  %v1737_v47 = vpop.f32.mrb[15].mxu0 }
  0xfa   :  { %934 = vmatprep.mubr.bf16.mxu1 %v1548_v38 }
  0xfe   :  { %v2438_v48 = vpop.f32.mrb[16].mxu0 }
  0xff   :  { %v1740_v49 = vpop.f32.mrb[17].mxu0 }
 0x100   :  { %v2440_v50 = vpop.f32.mrb[18].mxu0 }
 0x101   :  { %935 = vmatmul.mubr.bf16.gmra.mrb[96].mxu1 %v1547_v42  ;;  %v1741_v51 = vpop.f32.mrb[19].mxu0 }
 0x106   :  { %v2447_v53 = vpop.f32.mrb[20].mxu0 }
 0x107   :  { %v1744_v54 = vpop.f32.mrb[21].mxu0 }
 0x108   :  { %v2449_v56 = vpop.f32.mrb[22].mxu0 }
 0x109   :  { %v1745_v59 = vpop.f32.mrb[23].mxu0 }
 0x10e   :  { %v2453_v3 = vpop.f32.mrb[24].mxu0 }
 0x10f   :  { %v1748_v6 = vpop.f32.mrb[25].mxu0 }
 0x110   :  { %v2455_v8 = vpop.f32.mrb[26].mxu0 }
 0x111   :  { %v1749_v12 = vpop.f32.mrb[27].mxu0 }
 0x114   :  { %v744_v55 = vpop.f32.mrb[0].mxu1 }
 0x115   :  { %v745_v57 = vadd.f32 %v2445_v52, %v744_v55  ;;  %v746_v58 = vpop.f32.mrb[1].mxu1 }
 0x116   :  { %v747_v60 = vpop.f32.mrb[2].mxu1  ;;  %v2467_v19 = vpop.f32.mrb[28].mxu0 }
 0x117   :  { %v977_v61 = vadd.f32 %v976_v26, %v745_v57  ;;  %v748_v62 = vadd.f32 %v2445_v52, %v747_v60  ;;  %v749_v63 = vpop.f32.mrb[3].mxu1  ;;  %v1752_v22 = vpop.f32.mrb[29].mxu0 }
 0x118   :  { %v2469_v23 = vpop.f32.mrb[30].mxu0 }
 0x119   :  { %v1174_v0 = vmax.f32 %v977_v61, 0.0  ;;  %v980_v1 = vadd.f32 %v979_v28, %v748_v62  ;;  %v1753_v27 = vpop.f32.mrb[31].mxu0 }
 0x11b   :  { %v1642_v4 = vpack.c.bf16 %v1174_v0, %v1174_v0  ;;  %v1175_v5 = vmax.f32 %v980_v1, 0.0 }
 0x11c   :  { %v752_v7 = vpop.f32.mrb[4].mxu1 }
 0x11d   :  { %1421 = vst.msk [vmem:[%s2817_s3] sm:$0xf] %vm1420_vm2, %v1642_v4  ;;  %v1643_v9 = vpack.c.bf16 %v1175_v5, %v1175_v5  ;;  %v753_v10 = vadd.f32 %v2445_v52, %v752_v7  ;;  %v754_v11 = vpop.f32.mrb[5].mxu1 }
 0x11e   :  { %v755_v13 = vpop.f32.mrb[6].mxu1  ;;  %v2482_v34 = vpop.f32.mrb[32].mxu0 }
 0x11f   :  { %1422 = vst.msk [vmem:[%s2817_s3 + $0x4] sm:$0xf] %vm1420_vm2, %v1643_v9  ;;  %v985_v14 = vadd.f32 %v984_v32, %v753_v10  ;;  %v756_v15 = vadd.f32 %v2445_v52, %v755_v13  ;;  %v757_v16 = vpop.f32.mrb[7].mxu1  ;;  %v1756_v37 = vpop.f32.mrb[33].mxu0 }
 0x120   :  { %v2484_v40 = vpop.f32.mrb[34].mxu0 }
 0x121   :  { %v1176_v17 = vmax.f32 %v985_v14, 0.0  ;;  %v988_v18 = vadd.f32 %v987_v35, %v756_v15  ;;  %v1757_v45 = vpop.f32.mrb[35].mxu0 }
 0x123   :  { %v1644_v20 = vpack.c.bf16 %v1176_v17, %v1176_v17  ;;  %v1177_v21 = vmax.f32 %v988_v18, 0.0 }
 0x124   :  { %v760_v2 = vpop.f32.mrb[8].mxu1 }
 0x125   :  { %1423 = vst.msk [vmem:[%s2817_s3 + $0x8] sm:$0xf] %vm1420_vm2, %v1644_v20  ;;  %v1645_v24 = vpack.c.bf16 %v1177_v21, %v1177_v21  ;;  %v761_v25 = vadd.f32 %v2445_v52, %v760_v2  ;;  %v762_v26 = vpop.f32.mrb[9].mxu1 }
 0x126   :  { %v763_v28 = vpop.f32.mrb[10].mxu1  ;;  %v2498_v57 = vpop.f32.mrb[36].mxu0 }
 0x127   :  { %1424 = vst.msk [vmem:[%s2817_s3 + $0xc] sm:$0xf] %vm1420_vm2, %v1645_v24  ;;  %v993_v29 = vadd.f32 %v992_v39, %v761_v25  ;;  %v764_v30 = vadd.f32 %v2445_v52, %v763_v28  ;;  %v765_v31 = vpop.f32.mrb[11].mxu1  ;;  %v1760_v60 = vpop.f32.mrb[37].mxu0 }
 0x128   :  { %v2500_v62 = vpop.f32.mrb[38].mxu0 }
 0x129   :  { %v1178_v32 = vmax.f32 %v993_v29, 0.0  ;;  %v996_v33 = vadd.f32 %v2432_v41, %v764_v30  ;;  %v1761_v1 = vpop.f32.mrb[39].mxu0 }
 0x12b   :  { %v1646_v35 = vpack.c.bf16 %v1178_v32, %v1178_v32  ;;  %v1179_v36 = vmax.f32 %v996_v33, 0.0 }
 0x12c   :  { %v768_v38 = vpop.f32.mrb[12].mxu1 }
 0x12d   :  { %1425 = vst.msk [vmem:[%s2817_s3 + $0x10] sm:$0xf] %vm1420_vm2, %v1646_v35  ;;  %v1647_v39 = vpack.c.bf16 %v1179_v36, %v1179_v36  ;;  %v769_v42 = vadd.f32 %v2445_v52, %v768_v38  ;;  %v770_v43 = vpop.f32.mrb[13].mxu1 }
 0x12e   :  { %v771_v47 = vpop.f32.mrb[14].mxu1  ;;  %v2514_v10 = vpop.f32.mrb[40].mxu0 }
 0x12f   :  { %1426 = vst.msk [vmem:[%s2817_s3 + $0x14] sm:$0xf] %vm1420_vm2, %v1647_v39  ;;  %v1001_v41 = vadd.f32 %v2434_v44, %v769_v42  ;;  %v772_v49 = vadd.f32 %v2445_v52, %v771_v47  ;;  %v773_v51 = vpop.f32.mrb[15].mxu1  ;;  %v1764_v13 = vpop.f32.mrb[41].mxu0 }
 0x130   :  { %v2516_v15 = vpop.f32.mrb[42].mxu0 }
 0x131   :  { %v1180_v54 = vmax.f32 %v1001_v41, 0.0  ;;  %v1004_v55 = vadd.f32 %v2436_v46, %v772_v49  ;;  %v1765_v18 = vpop.f32.mrb[43].mxu0 }
 0x133   :  { %v1648_v58 = vpack.c.bf16 %v1180_v54, %v1180_v54  ;;  %v1181_v59 = vmax.f32 %v1004_v55, 0.0 }
 0x134   :  { %v776_v61 = vpop.f32.mrb[16].mxu1 }
 0x135   :  { %1427 = vst.msk [vmem:[%s2817_s3 + $0x18] sm:$0xf] %vm1420_vm2, %v1648_v58  ;;  %v1649_v44 = vpack.c.bf16 %v1181_v59, %v1181_v59  ;;  %v777_v63 = vadd.f32 %v2445_v52, %v776_v61  ;;  %v778_v0 = vpop.f32.mrb[17].mxu1 }
 0x136   :  { %v779_v4 = vpop.f32.mrb[18].mxu1  ;;  %v2530_v25 = vpop.f32.mrb[44].mxu0 }
 0x137   :  { %1428 = vst.msk [vmem:[%s2817_s3 + $0x1c] sm:$0xf] %vm1420_vm2, %v1649_v44  ;;  %v1009_v46 = vadd.f32 %v2438_v48, %v777_v63  ;;  %v780_v5 = vadd.f32 %v2445_v52, %v779_v4  ;;  %v781_v6 = vpop.f32.mrb[19].mxu1  ;;  %v1768_v28 = vpop.f32.mrb[45].mxu0 }
 0x138   :  { %v2532_v30 = vpop.f32.mrb[46].mxu0 }
 0x139   :  { %v1182_v7 = vmax.f32 %v1009_v46, 0.0  ;;  %v1012_v9 = vadd.f32 %v2440_v50, %v780_v5  ;;  %v1769_v33 = vpop.f32.mrb[47].mxu0 }
 0x13b   :  { %v1650_v11 = vpack.c.bf16 %v1182_v7, %v1182_v7  ;;  %v1183_v12 = vmax.f32 %v1012_v9, 0.0 }
 0x13c   :  { %v784_v14 = vpop.f32.mrb[20].mxu1 }
 0x13d   :  { %1429 = vst.msk [vmem:[%s2817_s3 + $0x20] sm:$0xf] %vm1420_vm2, %v1650_v11  ;;  %v1651_v48 = vpack.c.bf16 %v1183_v12, %v1183_v12  ;;  %v785_v16 = vadd.f32 %v2445_v52, %v784_v14  ;;  %v786_v17 = vpop.f32.mrb[21].mxu1 }
 0x13e   :  { %v787_v20 = vpop.f32.mrb[22].mxu1  ;;  %v2546_v42 = vpop.f32.mrb[48].mxu0 }
 0x13f   :  { %1430 = vst.msk [vmem:[%s2817_s3 + $0x24] sm:$0xf] %vm1420_vm2, %v1651_v48  ;;  %v1017_v50 = vadd.f32 %v2447_v53, %v785_v16  ;;  %v788_v21 = vadd.f32 %v2445_v52, %v787_v20  ;;  %v789_v22 = vpop.f32.mrb[23].mxu1  ;;  %v1772_v47 = vpop.f32.mrb[49].mxu0 }
 0x140   :  { %v2548_v49 = vpop.f32.mrb[50].mxu0 }
 0x141   :  { %v1184_v2 = vmax.f32 %v1017_v50, 0.0  ;;  %v1020_v24 = vadd.f32 %v2449_v56, %v788_v21  ;;  %v1773_v55 = vpop.f32.mrb[51].mxu0 }
 0x143   :  { %v1652_v26 = vpack.c.bf16 %v1184_v2, %v1184_v2  ;;  %v1185_v27 = vmax.f32 %v1020_v24, 0.0 }
 0x144   :  { %v792_v29 = vpop.f32.mrb[24].mxu1 }
 0x145   :  { %1431 = vst.msk [vmem:[%s2817_s3 + $0x28] sm:$0xf] %vm1420_vm2, %v1652_v26  ;;  %v1653_v53 = vpack.c.bf16 %v1185_v27, %v1185_v27  ;;  %v793_v31 = vadd.f32 %v2445_v52, %v792_v29  ;;  %v794_v32 = vpop.f32.mrb[25].mxu1 }
 0x146   :  { %v795_v35 = vpop.f32.mrb[26].mxu1  ;;  %v2562_v63 = vpop.f32.mrb[52].mxu0 }
 0x147   :  { %1432 = vst.msk [vmem:[%s2817_s3 + $0x2c] sm:$0xf] %vm1420_vm2, %v1653_v53  ;;  %v1025_v56 = vadd.f32 %v2453_v3, %v793_v31  ;;  %v796_v36 = vadd.f32 %v2445_v52, %v795_v35  ;;  %v797_v37 = vpop.f32.mrb[27].mxu1  ;;  %v1776_v4 = vpop.f32.mrb[53].mxu0 }
 0x148   :  { %v2564_v5 = vpop.f32.mrb[54].mxu0 }
 0x149   :  { %v1186_v38 = vmax.f32 %v1025_v56, 0.0  ;;  %v1028_v39 = vadd.f32 %v2455_v8, %v796_v36  ;;  %v1777_v9 = vpop.f32.mrb[55].mxu0 }
 0x14b   :  { %v1654_v43 = vpack.c.bf16 %v1186_v38, %v1186_v38  ;;  %v1187_v45 = vmax.f32 %v1028_v39, 0.0 }
 0x14c   :  { %v800_v41 = vpop.f32.mrb[28].mxu1 }
 0x14d   :  { %1433 = vst.msk [vmem:[%s2817_s3 + $0x30] sm:$0xf] %vm1420_vm2, %v1654_v43  ;;  %v1655_v3 = vpack.c.bf16 %v1187_v45, %v1187_v45  ;;  %v801_v51 = vadd.f32 %v2445_v52, %v800_v41  ;;  %v802_v54 = vpop.f32.mrb[29].mxu1 }
 0x14e   :  { %v803_v58 = vpop.f32.mrb[30].mxu1  ;;  %v2578_v16 = vpop.f32.mrb[56].mxu0 }
 0x14f   :  { %1434 = vst.msk [vmem:[%s2817_s3 + $0x34] sm:$0xf] %vm1420_vm2, %v1655_v3  ;;  %v1033_v8 = vadd.f32 %v2467_v19, %v801_v51  ;;  %v804_v59 = vadd.f32 %v2445_v52, %v803_v58  ;;  %v805_v60 = vpop.f32.mrb[31].mxu1  ;;  %v1780_v20 = vpop.f32.mrb[57].mxu0 }
 0x150   :  { %v2580_v21 = vpop.f32.mrb[58].mxu0 }
 0x151   :  { %v1188_v61 = vmax.f32 %v1033_v8, 0.0  ;;  %v1036_v44 = vadd.f32 %v2469_v23, %v804_v59  ;;  %v1781_v24 = vpop.f32.mrb[59].mxu0 }
 0x153   :  { %v1656_v0 = vpack.c.bf16 %v1188_v61, %v1188_v61  ;;  %v1189_v1 = vmax.f32 %v1036_v44, 0.0 }
 0x154   :  { %v808_v46 = vpop.f32.mrb[32].mxu1 }
 0x155   :  { %1435 = vst.msk [vmem:[%s2817_s3 + $0x38] sm:$0xf] %vm1420_vm2, %v1656_v0  ;;  %v1657_v19 = vpack.c.bf16 %v1189_v1, %v1189_v1  ;;  %v809_v6 = vadd.f32 %v2445_v52, %v808_v46  ;;  %v810_v7 = vpop.f32.mrb[33].mxu1 }
 0x156   :  { %v811_v11 = vpop.f32.mrb[34].mxu1  ;;  %v2594_v31 = vpop.f32.mrb[60].mxu0 }
 0x157   :  { %1436 = vst.msk [vmem:[%s2817_s3 + $0x3c] sm:$0xf] %vm1420_vm2, %v1657_v19  ;;  %v1041_v23 = vadd.f32 %v2482_v34, %v809_v6  ;;  %v812_v12 = vadd.f32 %v2445_v52, %v811_v11  ;;  %v813_v13 = vpop.f32.mrb[35].mxu1  ;;  %v1784_v35 = vpop.f32.mrb[61].mxu0 }
 0x158   :  { %v2596_v36 = vpop.f32.mrb[62].mxu0 }
 0x159   :  { %v1190_v14 = vmax.f32 %v1041_v23, 0.0  ;;  %v1044_v48 = vadd.f32 %v2484_v40, %v812_v12  ;;  %v1785_v39 = vpop.f32.mrb[63].mxu0 }
 0x15b   :  { %v1658_v17 = vpack.c.bf16 %v1190_v14, %v1190_v14  ;;  %v1191_v18 = vmax.f32 %v1044_v48, 0.0 }
 0x15c   :  { %v816_v50 = vpop.f32.mrb[36].mxu1 }
 0x15d   :  { %1437 = vst.msk [vmem:[%s2817_s3 + $0x40] sm:$0xf] %vm1420_vm2, %v1658_v17  ;;  %v1659_v34 = vpack.c.bf16 %v1191_v18, %v1191_v18  ;;  %v817_v22 = vadd.f32 %v2445_v52, %v816_v50  ;;  %v818_v2 = vpop.f32.mrb[37].mxu1 }
 0x15e   :  { %v819_v26 = vpop.f32.mrb[38].mxu1  ;;  %v2610_v51 = vpop.f32.mrb[64].mxu0 }
 0x15f   :  { %1438 = vst.msk [vmem:[%s2817_s3 + $0x44] sm:$0xf] %vm1420_vm2, %v1659_v34  ;;  %v1049_v40 = vadd.f32 %v2498_v57, %v817_v22  ;;  %v820_v27 = vadd.f32 %v2445_v52, %v819_v26  ;;  %v821_v28 = vpop.f32.mrb[39].mxu1  ;;  %v1788_v58 = vpop.f32.mrb[65].mxu0 }
 0x160   :  { %v2612_v59 = vpop.f32.mrb[66].mxu0 }
 0x161   :  { %v1192_v29 = vmax.f32 %v1049_v40, 0.0  ;;  %v1052_v53 = vadd.f32 %v2500_v62, %v820_v27  ;;  %v1789_v44 = vpop.f32.mrb[67].mxu0 }
 0x163   :  { %v1660_v32 = vpack.c.bf16 %v1192_v29, %v1192_v29  ;;  %v1193_v33 = vmax.f32 %v1052_v53, 0.0 }
 0x164   :  { %v824_v56 = vpop.f32.mrb[40].mxu1 }
 0x165   :  { %1439 = vst.msk [vmem:[%s2817_s3 + $0x48] sm:$0xf] %vm1420_vm2, %v1660_v32  ;;  %v1661_v57 = vpack.c.bf16 %v1193_v33, %v1193_v33  ;;  %v825_v37 = vadd.f32 %v2445_v52, %v824_v56  ;;  %v826_v38 = vpop.f32.mrb[41].mxu1 }
 0x166   :  { %v827_v43 = vpop.f32.mrb[42].mxu1  ;;  %v2626_v6 = vpop.f32.mrb[68].mxu0 }
 0x167   :  { %1440 = vst.msk [vmem:[%s2817_s3 + $0x4c] sm:$0xf] %vm1420_vm2, %v1661_v57  ;;  %v1057_v62 = vadd.f32 %v2514_v10, %v825_v37  ;;  %v828_v45 = vadd.f32 %v2445_v52, %v827_v43  ;;  %v829_v47 = vpop.f32.mrb[43].mxu1  ;;  %v1792_v11 = vpop.f32.mrb[69].mxu0 }
 0x168   :  { %v2628_v12 = vpop.f32.mrb[70].mxu0 }
 0x169   :  { %v1194_v41 = vmax.f32 %v1057_v62, 0.0  ;;  %v1060_v3 = vadd.f32 %v2516_v15, %v828_v45  ;;  %v1793_v48 = vpop.f32.mrb[71].mxu0 }
 0x16b   :  { %v1662_v54 = vpack.c.bf16 %v1194_v41, %v1194_v41  ;;  %v1195_v55 = vmax.f32 %v1060_v3, 0.0 }
 0x16c   :  { %v832_v8 = vpop.f32.mrb[44].mxu1 }
 0x16d   :  { %1441 = vst.msk [vmem:[%s2817_s3 + $0x50] sm:$0xf] %vm1420_vm2, %v1662_v54  ;;  %v1663_v10 = vpack.c.bf16 %v1195_v55, %v1195_v55  ;;  %v833_v60 = vadd.f32 %v2445_v52, %v832_v8  ;;  %v834_v61 = vpop.f32.mrb[45].mxu1 }
 0x16e   :  { %v835_v0 = vpop.f32.mrb[46].mxu1  ;;  %v2642_v22 = vpop.f32.mrb[72].mxu0 }
 0x16f   :  { %1442 = vst.msk [vmem:[%s2817_s3 + $0x54] sm:$0xf] %vm1420_vm2, %v1663_v10  ;;  %v1065_v15 = vadd.f32 %v2530_v25, %v833_v60  ;;  %v836_v1 = vadd.f32 %v2445_v52, %v835_v0  ;;  %v837_v4 = vpop.f32.mrb[47].mxu1  ;;  %v1796_v26 = vpop.f32.mrb[73].mxu0 }
 0x170   :  { %v2644_v27 = vpop.f32.mrb[74].mxu0 }
 0x171   :  { %v1196_v46 = vmax.f32 %v1065_v15, 0.0  ;;  %v1068_v19 = vadd.f32 %v2532_v30, %v836_v1  ;;  %v1797_v53 = vpop.f32.mrb[75].mxu0 }
 0x173   :  { %v1664_v7 = vpack.c.bf16 %v1196_v46, %v1196_v46  ;;  %v1197_v9 = vmax.f32 %v1068_v19, 0.0 }
 0x174   :  { %v840_v23 = vpop.f32.mrb[48].mxu1 }
 0x175   :  { %1443 = vst.msk [vmem:[%s2817_s3 + $0x58] sm:$0xf] %vm1420_vm2, %v1664_v7  ;;  %v1665_v25 = vpack.c.bf16 %v1197_v9, %v1197_v9  ;;  %v841_v13 = vadd.f32 %v2445_v52, %v840_v23  ;;  %v842_v14 = vpop.f32.mrb[49].mxu1 }
 0x176   :  { %v843_v17 = vpop.f32.mrb[50].mxu1  ;;  %v2658_v37 = vpop.f32.mrb[76].mxu0 }
 0x177   :  { %1444 = vst.msk [vmem:[%s2817_s3 + $0x5c] sm:$0xf] %vm1420_vm2, %v1665_v25  ;;  %v1073_v30 = vadd.f32 %v2546_v42, %v841_v13  ;;  %v844_v18 = vadd.f32 %v2445_v52, %v843_v17  ;;  %v845_v20 = vpop.f32.mrb[51].mxu1  ;;  %v1800_v43 = vpop.f32.mrb[77].mxu0 }
 0x178   :  { %v2660_v45 = vpop.f32.mrb[78].mxu0 }
 0x179   :  { %v1198_v50 = vmax.f32 %v1073_v30, 0.0  ;;  %v1076_v34 = vadd.f32 %v2548_v49, %v844_v18  ;;  %v1801_v3 = vpop.f32.mrb[79].mxu0 }
 0x17b   :  { %v1666_v2 = vpack.c.bf16 %v1198_v50, %v1198_v50  ;;  %v1199_v24 = vmax.f32 %v1076_v34, 0.0 }
 0x17c   :  { %v848_v40 = vpop.f32.mrb[52].mxu1 }
 0x17d   :  { %1445 = vst.msk [vmem:[%s2817_s3 + $0x60] sm:$0xf] %vm1420_vm2, %v1666_v2  ;;  %v1667_v42 = vpack.c.bf16 %v1199_v24, %v1199_v24  ;;  %v849_v28 = vadd.f32 %v2445_v52, %v848_v40  ;;  %v850_v29 = vpop.f32.mrb[53].mxu1 }
 0x17e   :  { %v851_v32 = vpop.f32.mrb[54].mxu1  ;;  %v2674_v60 = vpop.f32.mrb[80].mxu0 }
 0x17f   :  { %1446 = vst.msk [vmem:[%s2817_s3 + $0x64] sm:$0xf] %vm1420_vm2, %v1667_v42  ;;  %v1081_v49 = vadd.f32 %v2562_v63, %v849_v28  ;;  %v852_v33 = vadd.f32 %v2445_v52, %v851_v32  ;;  %v853_v35 = vpop.f32.mrb[55].mxu1  ;;  %v1804_v0 = vpop.f32.mrb[81].mxu0 }
 0x180   :  { %v2676_v1 = vpop.f32.mrb[82].mxu0 }
 0x181   :  { %v1200_v56 = vmax.f32 %v1081_v49, 0.0  ;;  %v1084_v57 = vadd.f32 %v2564_v5, %v852_v33  ;;  %v1805_v19 = vpop.f32.mrb[83].mxu0 }
 0x183   :  { %v1668_v38 = vpack.c.bf16 %v1200_v56, %v1200_v56  ;;  %v1201_v39 = vmax.f32 %v1084_v57, 0.0 }
 0x184   :  { %v856_v62 = vpop.f32.mrb[56].mxu1 }
 0x185   :  { %1447 = vst.msk [vmem:[%s2817_s3 + $0x68] sm:$0xf] %vm1420_vm2, %v1668_v38  ;;  %v1669_v63 = vpack.c.bf16 %v1201_v39, %v1201_v39  ;;  %v857_v47 = vadd.f32 %v2445_v52, %v856_v62  ;;  %v858_v41 = vpop.f32.mrb[57].mxu1 }
 0x186   :  { %v859_v54 = vpop.f32.mrb[58].mxu1  ;;  %v2690_v13 = vpop.f32.mrb[84].mxu0 }
 0x187   :  { %1448 = vst.msk [vmem:[%s2817_s3 + $0x6c] sm:$0xf] %vm1420_vm2, %v1669_v63  ;;  %v1089_v5 = vadd.f32 %v2578_v16, %v857_v47  ;;  %v860_v55 = vadd.f32 %v2445_v52, %v859_v54  ;;  %v861_v58 = vpop.f32.mrb[59].mxu1  ;;  %v1808_v17 = vpop.f32.mrb[85].mxu0 }
 0x188   :  { %v2692_v18 = vpop.f32.mrb[86].mxu0 }
 0x189   :  { %v1202_v8 = vmax.f32 %v1089_v5, 0.0  ;;  %v1092_v10 = vadd.f32 %v2580_v21, %v860_v55  ;;  %v1809_v34 = vpop.f32.mrb[87].mxu0 }
 0x18b   :  { %v1670_v61 = vpack.c.bf16 %v1202_v8, %v1202_v8  ;;  %v1203_v44 = vmax.f32 %v1092_v10, 0.0 }
 0x18c   :  { %v864_v15 = vpop.f32.mrb[60].mxu1 }
 0x18d   :  { %1449 = vst.msk [vmem:[%s2817_s3 + $0x70] sm:$0xf] %vm1420_vm2, %v1670_v61  ;;  %v1671_v16 = vpack.c.bf16 %v1203_v44, %v1203_v44  ;;  %v865_v4 = vadd.f32 %v2445_v52, %v864_v15  ;;  %v866_v46 = vpop.f32.mrb[61].mxu1 }
 0x18e   :  { %v867_v7 = vpop.f32.mrb[62].mxu1  ;;  %v2706_v28 = vpop.f32.mrb[88].mxu0 }
 0x18f   :  { %1450 = vst.msk [vmem:[%s2817_s3 + $0x74] sm:$0xf] %vm1420_vm2, %v1671_v16  ;;  %v1097_v21 = vadd.f32 %v2594_v31, %v865_v4  ;;  %v868_v9 = vadd.f32 %v2445_v52, %v867_v7  ;;  %v869_v11 = vpop.f32.mrb[63].mxu1  ;;  %v1812_v32 = vpop.f32.mrb[89].mxu0 }
 0x190   :  { %v2708_v33 = vpop.f32.mrb[90].mxu0 }
 0x191   :  { %v1204_v23 = vmax.f32 %v1097_v21, 0.0  ;;  %v1100_v25 = vadd.f32 %v2596_v36, %v868_v9  ;;  %v1813_v57 = vpop.f32.mrb[91].mxu0 }
 0x193   :  { %v1672_v14 = vpack.c.bf16 %v1204_v23, %v1204_v23  ;;  %v1205_v48 = vmax.f32 %v1100_v25, 0.0 }
 0x194   :  { %v872_v30 = vpop.f32.mrb[64].mxu1 }
 0x195   :  { %1451 = vst.msk [vmem:[%s2817_s3 + $0x78] sm:$0xf] %vm1420_vm2, %v1672_v14  ;;  %v1673_v31 = vpack.c.bf16 %v1205_v48, %v1205_v48  ;;  %v873_v20 = vadd.f32 %v2445_v52, %v872_v30  ;;  %v874_v50 = vpop.f32.mrb[65].mxu1 }
 0x196   :  { %v875_v2 = vpop.f32.mrb[66].mxu1  ;;  %v2722_v47 = vpop.f32.mrb[92].mxu0 }
 0x197   :  { %1452 = vst.msk [vmem:[%s2817_s3 + $0x7c] sm:$0xf] %vm1420_vm2, %v1673_v31  ;;  %v1105_v36 = vadd.f32 %v2610_v51, %v873_v20  ;;  %v876_v24 = vadd.f32 %v2445_v52, %v875_v2  ;;  %v877_v26 = vpop.f32.mrb[67].mxu1  ;;  %v1816_v54 = vpop.f32.mrb[93].mxu0 }
 0x198   :  { %v2724_v55 = vpop.f32.mrb[94].mxu0 }
 0x199   :  { %v1206_v40 = vmax.f32 %v1105_v36, 0.0  ;;  %v1108_v42 = vadd.f32 %v2612_v59, %v876_v24  ;;  %v1817_v10 = vpop.f32.mrb[95].mxu0 }
 0x19b   :  { %v1674_v29 = vpack.c.bf16 %v1206_v40, %v1206_v40  ;;  %v1207_v53 = vmax.f32 %v1108_v42, 0.0 }
 0x19c   :  { %v880_v49 = vpop.f32.mrb[68].mxu1 }
 0x19d   :  { %1453 = vst.msk [vmem:[%s2817_s3 + $0x80] sm:$0xf] %vm1420_vm2, %v1674_v29  ;;  %v1675_v51 = vpack.c.bf16 %v1207_v53, %v1207_v53  ;;  %v881_v35 = vadd.f32 %v2445_v52, %v880_v49  ;;  %v882_v56 = vpop.f32.mrb[69].mxu1 }
 0x19e   :  { %v883_v38 = vpop.f32.mrb[70].mxu1  ;;  %v2738_v4 = vpop.f32.mrb[96].mxu0 }
 0x19f   :  { %1454 = vst.msk [vmem:[%s2817_s3 + $0x84] sm:$0xf] %vm1420_vm2, %v1675_v51  ;;  %v1113_v59 = vadd.f32 %v2626_v6, %v881_v35  ;;  %v884_v39 = vadd.f32 %v2445_v52, %v883_v38  ;;  %v885_v43 = vpop.f32.mrb[71].mxu1  ;;  %v1820_v7 = vpop.f32.mrb[97].mxu0 }
 0x1a0   :  { %v1171_v9 = vpop.f32.mrb[98].mxu0 }
 0x1a1   :  { %v1208_v62 = vmax.f32 %v1113_v59, 0.0  ;;  %v1116_v63 = vadd.f32 %v2628_v12, %v884_v39  ;;  %v1821_v25 = vpop.f32.mrb[99].mxu0 }
 0x1a3   :  { %v1676_v41 = vpack.c.bf16 %v1208_v62, %v1208_v62  ;;  %v1209_v3 = vmax.f32 %v1116_v63, 0.0 }
 0x1a4   :  { %v888_v5 = vpop.f32.mrb[72].mxu1 }
 0x1a5   :  { %1455 = vst.msk [vmem:[%s2817_s3 + $0x88] sm:$0xf] %vm1420_vm2, %v1676_v41  ;;  %v1677_v6 = vpack.c.bf16 %v1209_v3, %v1209_v3  ;;  %v889_v58 = vadd.f32 %v2445_v52, %v888_v5  ;;  %v890_v8 = vpop.f32.mrb[73].mxu1 }
 0x1a6   :  { %v891_v61 = vpop.f32.mrb[74].mxu1 }
 0x1a7   :  { %1456 = vst.msk [vmem:[%s2817_s3 + $0x8c] sm:$0xf] %vm1420_vm2, %v1677_v6  ;;  %v1121_v12 = vadd.f32 %v2642_v22, %v889_v58  ;;  %v892_v44 = vadd.f32 %v2445_v52, %v891_v61  ;;  %v893_v0 = vpop.f32.mrb[75].mxu1 }
 0x1a9   :  { %v1210_v15 = vmax.f32 %v1121_v12, 0.0  ;;  %v1124_v16 = vadd.f32 %v2644_v27, %v892_v44 }
 0x1ab   :  { %v1678_v46 = vpack.c.bf16 %v1210_v15, %v1210_v15  ;;  %v1211_v19 = vmax.f32 %v1124_v16, 0.0 }
 0x1ac   :  { %v896_v21 = vpop.f32.mrb[76].mxu1 }
 0x1ad   :  { %1457 = vst.msk [vmem:[%s2817_s3 + $0x90] sm:$0xf] %vm1420_vm2, %v1678_v46  ;;  %v1679_v11 = vpack.c.bf16 %v1211_v19, %v1211_v19  ;;  %v897_v22 = vadd.f32 %v2445_v52, %v896_v21  ;;  %v898_v23 = vpop.f32.mrb[77].mxu1 }
 0x1ae   :  { %v899_v14 = vpop.f32.mrb[78].mxu1 }
 0x1af   :  { %1458 = vst.msk [vmem:[%s2817_s3 + $0x94] sm:$0xf] %vm1420_vm2, %v1679_v11  ;;  %v1129_v27 = vadd.f32 %v2658_v37, %v897_v22  ;;  %v900_v48 = vadd.f32 %v2445_v52, %v899_v14  ;;  %v901_v17 = vpop.f32.mrb[79].mxu1 }
 0x1b1   :  { %v1212_v30 = vmax.f32 %v1129_v27, 0.0  ;;  %v1132_v31 = vadd.f32 %v2660_v45, %v900_v48 }
 0x1b3   :  { %v1680_v20 = vpack.c.bf16 %v1212_v30, %v1212_v30  ;;  %v1213_v50 = vmax.f32 %v1132_v31, 0.0 }
 0x1b4   :  { %v904_v34 = vpop.f32.mrb[80].mxu1 }
 0x1b5   :  { %1459 = vst.msk [vmem:[%s2817_s3 + $0x98] sm:$0xf] %vm1420_vm2, %v1680_v20  ;;  %v1681_v2 = vpack.c.bf16 %v1213_v50, %v1213_v50  ;;  %v905_v36 = vadd.f32 %v2445_v52, %v904_v34  ;;  %v906_v24 = vpop.f32.mrb[81].mxu1 }
 0x1b6   :  { %v907_v26 = vpop.f32.mrb[82].mxu1 }
 0x1b7   :  { %1460 = vst.msk [vmem:[%s2817_s3 + $0x9c] sm:$0xf] %vm1420_vm2, %v1681_v2  ;;  %v1137_v37 = vadd.f32 %v2674_v60, %v905_v36  ;;  %v908_v45 = vadd.f32 %v2445_v52, %v907_v26  ;;  %v909_v40 = vpop.f32.mrb[83].mxu1 }
 0x1b9   :  { %v1214_v42 = vmax.f32 %v1137_v37, 0.0  ;;  %v1140_v29 = vadd.f32 %v2676_v1, %v908_v45 }
 0x1bb   :  { %v1682_v53 = vpack.c.bf16 %v1214_v42, %v1214_v42  ;;  %v1215_v32 = vmax.f32 %v1140_v29, 0.0 }
 0x1bc   :  { %v912_v49 = vpop.f32.mrb[84].mxu1 }
 0x1bd   :  { %1461 = vst.msk [vmem:[%s2817_s3 + $0xa0] sm:$0xf] %vm1420_vm2, %v1682_v53  ;;  %v1683_v51 = vpack.c.bf16 %v1215_v32, %v1215_v32  ;;  %v913_v35 = vadd.f32 %v2445_v52, %v912_v49  ;;  %v914_v56 = vpop.f32.mrb[85].mxu1 }
 0x1be   :  { %v915_v57 = vpop.f32.mrb[86].mxu1 }
 0x1bf   :  { %1462 = vst.msk [vmem:[%s2817_s3 + $0xa4] sm:$0xf] %vm1420_vm2, %v1683_v51  ;;  %v1145_v60 = vadd.f32 %v2690_v13, %v913_v35  ;;  %v916_v1 = vadd.f32 %v2445_v52, %v915_v57  ;;  %v917_v38 = vpop.f32.mrb[87].mxu1 }
 0x1c1   :  { %v1216_v59 = vmax.f32 %v1145_v60, 0.0  ;;  %v1148_v39 = vadd.f32 %v2692_v18, %v916_v1 }
 0x1c3   :  { %v1684_v43 = vpack.c.bf16 %v1216_v59, %v1216_v59  ;;  %v1217_v62 = vmax.f32 %v1148_v39, 0.0 }
 0x1c4   :  { %v920_v63 = vpop.f32.mrb[88].mxu1 }
 0x1c5   :  { %1463 = vst.msk [vmem:[%s2817_s3 + $0xa8] sm:$0xf] %vm1420_vm2, %v1684_v43  ;;  %v1685_v41 = vpack.c.bf16 %v1217_v62, %v1217_v62  ;;  %v921_v3 = vadd.f32 %v2445_v52, %v920_v63  ;;  %v922_v54 = vpop.f32.mrb[89].mxu1 }
 0x1c6   :  { %v923_v5 = vpop.f32.mrb[90].mxu1 }
 0x1c7   :  { %1464 = vst.msk [vmem:[%s2817_s3 + $0xac] sm:$0xf] %vm1420_vm2, %v1685_v41  ;;  %v1153_v13 = vadd.f32 %v2706_v28, %v921_v3  ;;  %v924_v18 = vadd.f32 %v2445_v52, %v923_v5  ;;  %v925_v6 = vpop.f32.mrb[91].mxu1 }
 0x1c9   :  { %v1218_v58 = vmax.f32 %v1153_v13, 0.0  ;;  %v1156_v8 = vadd.f32 %v2708_v33, %v924_v18 }
 0x1cb   :  { %v1686_v10 = vpack.c.bf16 %v1218_v58, %v1218_v58  ;;  %v1219_v61 = vmax.f32 %v1156_v8, 0.0 }
 0x1cc   :  { %v928_v12 = vpop.f32.mrb[92].mxu1 }
 0x1cd   :  { %1465 = vst.msk [vmem:[%s2817_s3 + $0xb0] sm:$0xf] %vm1420_vm2, %v1686_v10  ;;  %v1687_v44 = vpack.c.bf16 %v1219_v61, %v1219_v61  ;;  %v929_v0 = vadd.f32 %v2445_v52, %v928_v12  ;;  %v930_v15 = vpop.f32.mrb[93].mxu1 }
 0x1ce   :  { %v931_v16 = vpop.f32.mrb[94].mxu1 }
 0x1cf   :  { %1466 = vst.msk [vmem:[%s2817_s3 + $0xb4] sm:$0xf] %vm1420_vm2, %v1687_v44  ;;  %v1161_v28 = vadd.f32 %v2722_v47, %v929_v0  ;;  %v932_v33 = vadd.f32 %v2445_v52, %v931_v16  ;;  %v933_v46 = vpop.f32.mrb[95].mxu1 }
 0x1d1   :  { %v1220_v19 = vmax.f32 %v1161_v28, 0.0  ;;  %v1164_v7 = vadd.f32 %v2724_v55, %v932_v33 }
 0x1d3   :  { %v1688_v21 = vpack.c.bf16 %v1220_v19, %v1220_v19  ;;  %v1221_v9 = vmax.f32 %v1164_v7, 0.0 }
 0x1d4   :  { %v936_v11 = vpop.f32.mrb[96].mxu1 }
 0x1d5   :  { %1467 = vst.msk [vmem:[%s2817_s3 + $0xb8] sm:$0xf] %vm1420_vm2, %v1688_v21  ;;  %v1689_v22 = vpack.c.bf16 %v1221_v9, %v1221_v9  ;;  %v937_v23 = vadd.f32 %v2445_v52, %v936_v11  ;;  %v938_v25 = vpop.f32.mrb[97].mxu1 }
 0x1d6   :  { %v939_v14 = vpop.f32.mrb[98].mxu1 }
 0x1d7   :  { %1468 = vst.msk [vmem:[%s2817_s3 + $0xbc] sm:$0xf] %vm1420_vm2, %v1689_v22  ;;  %v1169_v47 = vadd.f32 %v2738_v4, %v937_v23  ;;  %v940_v55 = vpop.f32.mrb[99].mxu1 }
 0x1d9   :  { %v1222_v27 = vmax.f32 %v1169_v47, 0.0 }
 0x1db   :  { %v1690_v48 = vpack.c.bf16 %v1222_v27, %v1222_v27 }
 0x1dd   :  { %1469 = vst.msk [vmem:[%s2817_s3 + $0xc0] sm:$0xf] %vm1420_vm2, %v1690_v48 }

// kernel: simple_cnn_forward.8
= control target key start
LH: loop header
LB: loop body
LE: loop exit
PB: predicated region body
PF: predicated region fallthrough
CT: control target
= control target key end

     0   :  { %vm46_vm0 = vcmask 1043456   ;;  %vm47_vm1 = vcmask 523268   ;;  %vm51_vm3 = vcmask 1042432   ;;  %vm52_vm4 = vcmask 522244   ;;  %s152_s0 = inlined_call_operand.vmem [shape: bf16[14,448], index: 0, kind: input, shape index: {}]   ;;  %s153_s1 = inlined_call_operand.vmem [shape: bf16[14,448], index: 1, kind: input, shape index: {}]   ;;  %s154_s2 = inlined_call_operand.vmem [shape: bf16[14,448], index: 2, kind: input, shape index: {}]   ;;  %s155_s3 = inlined_call_operand.vmem [shape: bf16[14,448], index: 3, kind: input, shape index: {}]   ;;  %s156_s4 = inlined_call_operand.vmem [shape: bf16[14,448], index: 4, kind: output, shape index: {}]  }
   0x1   :  { %v17_v0 = vld [vmem:[%s152_s0] sm:$0xff]  ;;  %v18_v5 = vld [vmem:[%s152_s0 + $0x8] sm:$0xff]  ;;  %vm108_vm2 = vmor %vm47_vm1, %vm46_vm0 }
   0x2   :  { %v21_v1 = vld [vmem:[%s153_s1] sm:$0xff]  ;;  %v22_v6 = vld [vmem:[%s153_s1 + $0x8] sm:$0xff]  ;;  %v19_v13 = vld [vmem:[%s152_s0 + $0x10] sm:$0x77] }
   0x3   :  { %v29_v2 = vld [vmem:[%s154_s2] sm:$0xff]  ;;  %v25_v3 = vmax.bf16 %v21_v1, %v17_v0  ;;  %v26_v8 = vmax.bf16 %v22_v6, %v18_v5  ;;  %v30_v9 = vld [vmem:[%s154_s2 + $0x8] sm:$0xff]  ;;  %v23_v14 = vld [vmem:[%s153_s1 + $0x10] sm:$0x77] }
   0x4   :  { %v33_v4 = vld [vmem:[%s155_s3] sm:$0xff]  ;;  %v34_v10 = vld [vmem:[%s155_s3 + $0x8] sm:$0xff]  ;;  %v31_v15 = vld [vmem:[%s154_s2 + $0x10] sm:$0x77]  ;;  %v27_v17 = vmax.bf16 %v23_v14, %v19_v13 }
   0x5   :  { %v37_v7 = vmax.bf16 %v33_v4, %v29_v2  ;;  %v38_v12 = vmax.bf16 %v34_v10, %v30_v9  ;;  %v35_v18 = vld [vmem:[%s155_s3 + $0x10] sm:$0x77]  ;;  %v20_v19 = vld [vmem:[%s152_s0 + $0x18] sm:$0x77]  ;;  %vm53_vm5 = vmor %vm52_vm4, %vm51_vm3 }
   0x6   :  { %v24_v20 = vld [vmem:[%s153_s1 + $0x18] sm:$0x77]  ;;  %v39_v22 = vmax.bf16 %v35_v18, %v31_v15 }
   0x7   :  { %v41_v16 = vmax.bf16 %v37_v7, %v25_v3  ;;  %v42_v21 = vmax.bf16 %v38_v12, %v26_v8  ;;  %v28_v23 = vmax.bf16 %v24_v20, %v20_v19  ;;  %v32_v24 = vld [vmem:[%s154_s2 + $0x18] sm:$0x77] }
   0x8   :  { %v36_v25 = vld [vmem:[%s155_s3 + $0x18] sm:$0x77]  ;;  %v43_v27 = vmax.bf16 %v39_v22, %v27_v17 }
   0x9   :  { %45 = vst [vmem:[%s156_s4] sm:$0xff] %v41_v16  ;;  %v40_v26 = vmax.bf16 %v36_v25, %v32_v24  ;;  %49 = vst.msk [vmem:[%s156_s4 + $0x8] sm:$0xff] %vm108_vm2, %v42_v21 }
   0xa   :  { %50 = vst [vmem:[%s156_s4 + $0x10] sm:$0x77] %v43_v27 }
   0xb   :  { %v44_v28 = vmax.bf16 %v40_v26, %v28_v23 }
   0xd   :  { %54 = vst.msk [vmem:[%s156_s4 + $0x18] sm:$0x77] %vm53_vm5, %v44_v28 }

// kernel: simple_cnn_forward.9
= control target key start
LH: loop header
LB: loop body
LE: loop exit
PB: predicated region body
PF: predicated region fallthrough
CT: control target
= control target key end

     0   :  { %v433_v27 = vlaneseq  ;;  %v3196_v35 = vmov 1966171168   ;;  %s3922_s0 = inlined_call_operand.vmem [shape: bf16[2,3136], index: 0, kind: input, shape index: {}]   ;;  %s3923_s1 = inlined_call_operand.vmem [shape: bf16[3136,128], index: 1, kind: input, shape index: {}]   ;;  %s3924_s2 = inlined_call_operand.vmem [shape: f32[1,128], index: 2, kind: input, shape index: {}]   ;;  %s3925_s3 = inlined_call_operand.vmem [shape: bf16[128,10], index: 3, kind: input, shape index: {}]   ;;  %s3926_s4 = inlined_call_operand.vmem [shape: f32[1,10], index: 4, kind: input, shape index: {}]   ;;  %s3927_s5 = inlined_call_operand.hbm [shape: f32[2,10], index: 5, kind: output, shape index: {}]  }
   0x1   :  { %v2965_v0 = vld [vmem:[%s3923_s1 + $0x40] sm:$0xff]   ;;  %v2969_v4 = vld [vmem:[%s3923_s1 + $0x48] sm:$0xff]   ;;  %v2973_v8 = vld [vmem:[%s3923_s1 + $0x50] sm:$0xff]   ;;  %v431_v36 = vunpack.c.l.s4 %v3196_v35 }
   0x2   :  { %v2966_v1 = vld [vmem:[%s3923_s1] sm:$0xff]   ;;  %2651 = vmatprep.subr.bf16.mxu0 %v2965_v0  ;;  %v2970_v5 = vld [vmem:[%s3923_s1 + $0x8] sm:$0xff]   ;;  %v2974_v9 = vld [vmem:[%s3923_s1 + $0x10] sm:$0xff]   ;;  %v434_v32 = vshrl.u32 %v433_v27, 7 }
   0x3   :  { %v2967_v2 = vld [vmem:[%s3923_s1 + $0xc0] sm:$0xff]   ;;  %2652 = vmatpush3.bf16.msra.mxu0 %v2966_v1  ;;  %v2971_v6 = vld [vmem:[%s3923_s1 + $0xc8] sm:$0xff]   ;;  %v2975_v10 = vld [vmem:[%s3923_s1 + $0xd0] sm:$0xff]   ;;  %v432_v39 = vunpack.c.0.s8 %v431_v36 }
   0x4   :  { %v2968_v3 = vld [vmem:[%s3923_s1 + $0x80] sm:$0xff]   ;;  %2673 = vmatprep.subr.bf16.mxu1 %v2967_v2  ;;  %2653 = vmatprep.subr.bf16.mxu0 %v2969_v4  ;;  %v2972_v7 = vld [vmem:[%s3923_s1 + $0x88] sm:$0xff]   ;;  %v2976_v11 = vld [vmem:[%s3923_s1 + $0x90] sm:$0xff]  }
   0x5   :  { %2674 = vmatpush3.bf16.msra.mxu1 %v2968_v3  ;;  %v2977_v12 = vld [vmem:[%s3923_s1 + $0x58] sm:$0xff]   ;;  %v2981_v16 = vld [vmem:[%s3923_s1 + $0x60] sm:$0xff]   ;;  %v2985_v20 = vld [vmem:[%s3923_s1 + $0x68] sm:$0xff]   ;;  %v3335_v41 = vsub.s32 %v432_v39, %v434_v32 }
   0x6   :  { %2675 = vmatprep.subr.bf16.mxu1 %v2971_v6  ;;  %v2978_v13 = vld [vmem:[%s3923_s1 + $0x18] sm:$0xff]   ;;  %v2982_v17 = vld [vmem:[%s3923_s1 + $0x20] sm:$0xff]   ;;  %v2986_v21 = vld [vmem:[%s3923_s1 + $0x28] sm:$0xff]  }
   0x7   :  { %2654 = vmatpush3.bf16.msra.mxu0 %v2970_v5  ;;  %v2979_v14 = vld [vmem:[%s3923_s1 + $0xd8] sm:$0xff]   ;;  %v2983_v18 = vld [vmem:[%s3923_s1 + $0xe0] sm:$0xff]   ;;  %v2987_v22 = vld [vmem:[%s3923_s1 + $0xe8] sm:$0xff]  }
   0x8   :  { %2655 = vmatprep.subr.bf16.mxu0 %v2973_v8  ;;  %v2980_v15 = vld [vmem:[%s3923_s1 + $0x98] sm:$0xff]   ;;  %v2984_v19 = vld [vmem:[%s3923_s1 + $0xa0] sm:$0xff]   ;;  %v2988_v23 = vld [vmem:[%s3923_s1 + $0xa8] sm:$0xff]  }
   0x9   :  { %2676 = vmatpush3.bf16.msra.mxu1 %v2972_v7  ;;  %v2989_v24 = vld [vmem:[%s3923_s1 + $0x70] sm:$0xff]   ;;  %v2993_v29 = vld [vmem:[%s3923_s1 + $0x78] sm:$0xff]   ;;  %v22_v33 = vld [vmem:[%s3922_s0] sm:$0xff] }
   0xa   :  { %2677 = vmatprep.subr.bf16.mxu1 %v2975_v10  ;;  %v2990_v25 = vld [vmem:[%s3923_s1 + $0x30] sm:$0xff]   ;;  %v2994_v30 = vld [vmem:[%s3923_s1 + $0x38] sm:$0xff]   ;;  %v2998_v37 = vld [vmem:[%s3923_s1 + $0x140] sm:$0xff]   ;;  %v429_v38 = vcombine.high %v22_v33, %v22_v33  ;;  %v436_v42 = vrot.slane %v22_v33, %v3335_v41 }
   0xb   :  { %2656 = vmatpush3.bf16.msra.mxu0 %v2974_v9  ;;  %v2991_v26 = vld [vmem:[%s3923_s1 + $0xf0] sm:$0xff]   ;;  %v2995_v31 = vld [vmem:[%s3923_s1 + $0xf8] sm:$0xff]   ;;  %v3000_v40 = vld [vmem:[%s3923_s1 + $0x1c0] sm:$0xff]  }
   0xc   :  { %2657 = vmatprep.subr.bf16.mxu0 %v2977_v12  ;;  %v2992_v28 = vld [vmem:[%s3923_s1 + $0xb0] sm:$0xff]   ;;  %v2997_v34 = vld [vmem:[%s3923_s1 + $0xb8] sm:$0xff]   ;;  %v3339_v43 = vrot.slane %v429_v38, %v3335_v41  ;;  %v444_v44 = vcombine.high %v436_v42, %v436_v42  ;;  %v452_v45 = vrot.slane %v436_v42, %v3335_v41  ;;  %v2999_v48 = vld [vmem:[%s3923_s1 + $0x100] sm:$0xff]  }
   0xd   :  { %2678 = vmatpush3.bf16.msra.mxu1 %v2976_v11  ;;  %v3002_v51 = vld [vmem:[%s3923_s1 + $0x148] sm:$0xff]   ;;  %v3001_v53 = vld [vmem:[%s3923_s1 + $0x180] sm:$0xff]   ;;  %v3006_v57 = vld [vmem:[%s3923_s1 + $0x150] sm:$0xff]  }
   0xe   :  { %2679 = vmatprep.subr.bf16.mxu1 %v2979_v14  ;;  %v445_v46 = vcombine.high %v3339_v43, %v3339_v43  ;;  %v466_v47 = vrot.slane %v444_v44, %v3335_v41  ;;  %v474_v50 = vcombine.high %v452_v45, %v452_v45  ;;  %v3004_v54 = vld [vmem:[%s3923_s1 + $0x1c8] sm:$0xff]   ;;  %v3008_v59 = vld [vmem:[%s3923_s1 + $0x1d0] sm:$0xff]   ;;  %v3010_v61 = vld [vmem:[%s3923_s1 + $0x158] sm:$0xff]  }
   0xf   :  { %2658 = vmatpush3.bf16.msra.mxu0 %v2978_v13  ;;  %v3003_v56 = vld [vmem:[%s3923_s1 + $0x108] sm:$0xff]   ;;  %v3007_v60 = vld [vmem:[%s3923_s1 + $0x110] sm:$0xff]   ;;  %v3012_v63 = vld [vmem:[%s3923_s1 + $0x1d8] sm:$0xff]  }
  0x10   :  { %2659 = vmatprep.subr.bf16.mxu0 %v2981_v16  ;;  %v473_v49 = vrot.slane %v445_v46, %v3335_v41  ;;  %1826 = vmatprep.mubr.bf16.mxu0 %v466_v47  ;;  %v476_v52 = vcombine.high %v466_v47, %v466_v47  ;;  %v3005_v58 = vld [vmem:[%s3923_s1 + $0x188] sm:$0xff]   ;;  %v3009_v62 = vld [vmem:[%s3923_s1 + $0x190] sm:$0xff]   ;;  %v3011_v0 = vld [vmem:[%s3923_s1 + $0x118] sm:$0xff]  }
  0x11   :  { %2680 = vmatpush3.bf16.msra.mxu1 %v2980_v15  ;;  %v3014_v1 = vld [vmem:[%s3923_s1 + $0x160] sm:$0xff]   ;;  %v3013_v2 = vld [vmem:[%s3923_s1 + $0x198] sm:$0xff]   ;;  %v3018_v5 = vld [vmem:[%s3923_s1 + $0x168] sm:$0xff]  }
  0x12   :  { %2681 = vmatprep.subr.bf16.mxu1 %v2983_v18  ;;  %v477_v55 = vcombine.high %v473_v49, %v473_v49  ;;  %1866 = vmatprep.mubr.bf16.mxu1 %v476_v52  ;;  %v3016_v3 = vld [vmem:[%s3923_s1 + $0x1e0] sm:$0xff]   ;;  %v3020_v7 = vld [vmem:[%s3923_s1 + $0x1e8] sm:$0xff]   ;;  %v3022_v9 = vld [vmem:[%s3923_s1 + $0x170] sm:$0xff]  }
  0x13   :  { %2660 = vmatpush3.bf16.msra.mxu0 %v2982_v17  ;;  %v3015_v4 = vld [vmem:[%s3923_s1 + $0x120] sm:$0xff]   ;;  %v3019_v8 = vld [vmem:[%s3923_s1 + $0x128] sm:$0xff]   ;;  %v3024_v11 = vld [vmem:[%s3923_s1 + $0x1f0] sm:$0xff]   ;;  %v459_v17 = vrot.slane %v3339_v43, %v3335_v41 }
  0x14   :  { %2661 = vmatprep.subr.bf16.mxu0 %v2985_v20  ;;  %v3017_v6 = vld [vmem:[%s3923_s1 + $0x1a0] sm:$0xff]   ;;  %v3021_v10 = vld [vmem:[%s3923_s1 + $0x1a8] sm:$0xff]   ;;  %v3023_v12 = vld [vmem:[%s3923_s1 + $0x130] sm:$0xff]  }
  0x15   :  { %2682 = vmatpush3.bf16.msra.mxu1 %v2984_v19  ;;  %v3026_v13 = vld [vmem:[%s3923_s1 + $0x178] sm:$0xff]   ;;  %v3025_v14 = vld [vmem:[%s3923_s1 + $0x1b0] sm:$0xff]   ;;  %v3030_v18 = vld [vmem:[%s3923_s1 + $0x240] sm:$0xff]  }
  0x16   :  { %2683 = vmatprep.subr.bf16.mxu1 %v2987_v22  ;;  %v3028_v15 = vld [vmem:[%s3923_s1 + $0x1f8] sm:$0xff]   ;;  %v3032_v20 = vld [vmem:[%s3923_s1 + $0x2c0] sm:$0xff]   ;;  %v475_v22 = vcombine.high %v459_v17, %v459_v17  ;;  %v3038_v27 = vld [vmem:[%s3923_s1 + $0x250] sm:$0xff]  }
  0x17   :  { %2662 = vmatpush3.bf16.msra.mxu0 %v2986_v21  ;;  %v3027_v16 = vld [vmem:[%s3923_s1 + $0x138] sm:$0xff]   ;;  %v3031_v21 = vld [vmem:[%s3923_s1 + $0x200] sm:$0xff]   ;;  %v3041_v32 = vld [vmem:[%s3923_s1 + $0x290] sm:$0xff]  }
  0x18   :  { %2663 = vmatprep.subr.bf16.mxu0 %v2989_v24  ;;  %v3029_v19 = vld [vmem:[%s3923_s1 + $0x1b8] sm:$0xff]   ;;  %v3033_v24 = vld [vmem:[%s3923_s1 + $0x280] sm:$0xff]   ;;  %v3050_v39 = vld [vmem:[%s3923_s1 + $0x268] sm:$0xff]  }
  0x19   :  { %2684 = vmatpush3.bf16.msra.mxu1 %v2988_v23  ;;  %v3034_v23 = vld [vmem:[%s3923_s1 + $0x248] sm:$0xff]   ;;  %v3044_v33 = vld [vmem:[%s3923_s1 + $0x2d8] sm:$0xff]   ;;  %v3046_v35 = vld [vmem:[%s3923_s1 + $0x260] sm:$0xff]  }
  0x1a   :  { %2685 = vmatprep.subr.bf16.mxu1 %v2991_v26  ;;  %v3035_v26 = vld [vmem:[%s3923_s1 + $0x208] sm:$0xff]   ;;  %v3045_v36 = vld [vmem:[%s3923_s1 + $0x298] sm:$0xff]   ;;  %v3047_v38 = vld [vmem:[%s3923_s1 + $0x220] sm:$0xff]  }
  0x1b   :  { %2664 = vmatpush3.bf16.msra.mxu0 %v2990_v25  ;;  %v3036_v25 = vld [vmem:[%s3923_s1 + $0x2c8] sm:$0xff]   ;;  %v3054_v44 = vld [vmem:[%s3923_s1 + $0x270] sm:$0xff]  }
  0x1c   :  { %2665 = vmatprep.subr.bf16.mxu0 %v2993_v29  ;;  %v3040_v29 = vld [vmem:[%s3923_s1 + $0x2d0] sm:$0xff]   ;;  %v3052_v42 = vld [vmem:[%s3923_s1 + $0x2e8] sm:$0xff]  }
  0x1d   :  { %2686 = vmatpush3.bf16.msra.mxu1 %v2992_v28  ;;  %v3037_v28 = vld [vmem:[%s3923_s1 + $0x288] sm:$0xff]  }
  0x1e   :  { %2687 = vmatprep.subr.bf16.mxu1 %v2995_v31  ;;  %v3042_v31 = vld [vmem:[%s3923_s1 + $0x258] sm:$0xff]   ;;  %v3051_v43 = vld [vmem:[%s3923_s1 + $0x228] sm:$0xff]  }
  0x1f   :  { %2666 = vmatpush3.bf16.msra.mxu0 %v2994_v30  ;;  %v3039_v30 = vld [vmem:[%s3923_s1 + $0x210] sm:$0xff]   ;;  %v3053_v46 = vld [vmem:[%s3923_s1 + $0x2a8] sm:$0xff]  }
  0x20   :  { %2695 = vmatprep.subr.bf16.mxu0 %v2998_v37  ;;  %v3048_v37 = vld [vmem:[%s3923_s1 + $0x2e0] sm:$0xff]  }
  0x21   :  { %2688 = vmatpush3.bf16.msra.mxu1 %v2997_v34  ;;  %v3043_v34 = vld [vmem:[%s3923_s1 + $0x218] sm:$0xff]  }
  0x22   :  { %2717 = vmatprep.subr.bf16.mxu1 %v3000_v40  ;;  %1827 = vmatmul.mubr.bf16.vlgmr.msra.gmra.mrb[0].mxu0 %v452_v45  ;;  %v3049_v40 = vld [vmem:[%s3923_s1 + $0x2a0] sm:$0xff]   ;;  %v23_v45 = vld [vmem:[%s3922_s0 + $0x8] sm:$0xff] }
  0x23   :  { %2696 = vmatpush3.bf16.msra.mxu0 %v2999_v48  ;;  %1906 = vmatprep.mubr.bf16.mxu0 %v473_v49  ;;  %v485_v47 = vrot.slane %v23_v45, %v3335_v41  ;;  %v478_v48 = vcombine.high %v23_v45, %v23_v45  ;;  %v3056_v49 = vld [vmem:[%s3923_s1 + $0x2f0] sm:$0xff]  }
  0x24   :  { %1867 = vmatmul.mubr.bf16.vlgmr.msra.gmra.mrb[0].mxu1 %v474_v50  ;;  %2697 = vmatprep.subr.bf16.mxu0 %v3002_v51  ;;  %v3055_v50 = vld [vmem:[%s3923_s1 + $0x230] sm:$0xff]  }
  0x25   :  { %2718 = vmatpush3.bf16.msra.mxu1 %v3001_v53  ;;  %1946 = vmatprep.mubr.bf16.mxu1 %v477_v55  ;;  %v493_v51 = vcombine.high %v485_v47, %v485_v47  ;;  %v3524_v52 = vrot.slane %v478_v48, %v3335_v41  ;;  %v3058_v53 = vld [vmem:[%s3923_s1 + $0x278] sm:$0xff]   ;;  %v3105_v45 = vld [vmem:[%s3923_s1 + $0x4d0] sm:$0xff]  }
  0x26   :  { %2719 = vmatprep.subr.bf16.mxu1 %v3004_v54  ;;  %v3057_v54 = vld [vmem:[%s3923_s1 + $0x2b0] sm:$0xff]  }
  0x27   :  { %2698 = vmatpush3.bf16.msra.mxu0 %v3003_v56  ;;  %v515_v55 = vrot.slane %v493_v51, %v3335_v41  ;;  %v494_v56 = vcombine.high %v3524_v52, %v3524_v52  ;;  %v3106_v48 = vld [vmem:[%s3923_s1 + $0x490] sm:$0xff]   ;;  %v3111_v51 = vld [vmem:[%s3923_s1 + $0x460] sm:$0xff]  }
  0x28   :  { %2699 = vmatprep.subr.bf16.mxu0 %v3006_v57  ;;  %v3060_v57 = vld [vmem:[%s3923_s1 + $0x2f8] sm:$0xff]  }
  0x29   :  { %2720 = vmatpush3.bf16.msra.mxu1 %v3005_v58  ;;  %v3059_v58 = vld [vmem:[%s3923_s1 + $0x238] sm:$0xff]  }
  0x2a   :  { %2721 = vmatprep.subr.bf16.mxu1 %v3008_v59  ;;  %v525_v59 = vcombine.high %v515_v55, %v515_v55 }
  0x2b   :  { %2700 = vmatpush3.bf16.msra.mxu0 %v3007_v60  ;;  %v501_v60 = vrot.slane %v485_v47, %v3335_v41  ;;  %v3107_v47 = vld [vmem:[%s3923_s1 + $0x458] sm:$0xff]  }
  0x2c   :  { %2701 = vmatprep.subr.bf16.mxu0 %v3010_v61  ;;  %v3062_v61 = vld [vmem:[%s3923_s1 + $0x340] sm:$0xff]  }
  0x2d   :  { %2722 = vmatpush3.bf16.msra.mxu1 %v3009_v62  ;;  %v3061_v62 = vld [vmem:[%s3923_s1 + $0x2b8] sm:$0xff]  }
  0x2e   :  { %2723 = vmatprep.subr.bf16.mxu1 %v3012_v63  ;;  %v522_v63 = vrot.slane %v494_v56, %v3335_v41  ;;  %v3114_v56 = vld [vmem:[%s3923_s1 + $0x4a0] sm:$0xff]  }
  0x2f   :  { %2702 = vmatpush3.bf16.msra.mxu0 %v3011_v0  ;;  %v3064_v0 = vld [vmem:[%s3923_s1 + $0x3c0] sm:$0xff]  }
  0x30   :  { %2703 = vmatprep.subr.bf16.mxu0 %v3014_v1  ;;  %v3063_v1 = vld [vmem:[%s3923_s1 + $0x300] sm:$0xff]  }
  0x31   :  { %2724 = vmatpush3.bf16.msra.mxu1 %v3013_v2  ;;  %v523_v2 = vcombine.high %v501_v60, %v501_v60 }
  0x32   :  { %2725 = vmatprep.subr.bf16.mxu1 %v3016_v3  ;;  %v3066_v3 = vld [vmem:[%s3923_s1 + $0x348] sm:$0xff]  }
  0x33   :  { %2704 = vmatpush3.bf16.msra.mxu0 %v3015_v4  ;;  %v3065_v4 = vld [vmem:[%s3923_s1 + $0x380] sm:$0xff]  }
  0x34   :  { %2705 = vmatprep.subr.bf16.mxu0 %v3018_v5  ;;  %v526_v5 = vcombine.high %v522_v63, %v522_v63 }
  0x35   :  { %2726 = vmatpush3.bf16.msra.mxu1 %v3017_v6  ;;  %v3068_v6 = vld [vmem:[%s3923_s1 + $0x3c8] sm:$0xff]  }
  0x36   :  { %2727 = vmatprep.subr.bf16.mxu1 %v3020_v7  ;;  %v3067_v7 = vld [vmem:[%s3923_s1 + $0x308] sm:$0xff]  }
  0x37   :  { %2706 = vmatpush3.bf16.msra.mxu0 %v3019_v8  ;;  %v3070_v8 = vld [vmem:[%s3923_s1 + $0x350] sm:$0xff]  }
  0x38   :  { %2707 = vmatprep.subr.bf16.mxu0 %v3022_v9  ;;  %v3069_v9 = vld [vmem:[%s3923_s1 + $0x388] sm:$0xff]  }
  0x39   :  { %2728 = vmatpush3.bf16.msra.mxu1 %v3021_v10  ;;  %v3072_v10 = vld [vmem:[%s3923_s1 + $0x3d0] sm:$0xff]  }
  0x3a   :  { %2729 = vmatprep.subr.bf16.mxu1 %v3024_v11  ;;  %v3071_v11 = vld [vmem:[%s3923_s1 + $0x310] sm:$0xff]  }
  0x3b   :  { %2708 = vmatpush3.bf16.msra.mxu0 %v3023_v12  ;;  %v3074_v12 = vld [vmem:[%s3923_s1 + $0x358] sm:$0xff]  }
  0x3c   :  { %2709 = vmatprep.subr.bf16.mxu0 %v3026_v13  ;;  %v3073_v13 = vld [vmem:[%s3923_s1 + $0x390] sm:$0xff]  }
  0x3d   :  { %2730 = vmatpush3.bf16.msra.mxu1 %v3025_v14  ;;  %v3076_v14 = vld [vmem:[%s3923_s1 + $0x3d8] sm:$0xff]  }
  0x3e   :  { %2731 = vmatprep.subr.bf16.mxu1 %v3028_v15  ;;  %v3075_v15 = vld [vmem:[%s3923_s1 + $0x318] sm:$0xff]  }
  0x3f   :  { %2710 = vmatpush3.bf16.msra.mxu0 %v3027_v16  ;;  %v3078_v16 = vld [vmem:[%s3923_s1 + $0x360] sm:$0xff]  }
  0x40   :  { %2739 = vmatprep.subr.bf16.mxu0 %v3030_v18  ;;  %v3080_v18 = vld [vmem:[%s3923_s1 + $0x3e0] sm:$0xff]  }
  0x41   :  { %2732 = vmatpush3.bf16.msra.mxu1 %v3029_v19  ;;  %v3079_v19 = vld [vmem:[%s3923_s1 + $0x320] sm:$0xff]  }
  0x42   :  { %1907 = vmatmul.mubr.bf16.vlgmr.msra.gmra.mrb[4].mxu0 %v459_v17  ;;  %2761 = vmatprep.subr.bf16.mxu1 %v3032_v20  ;;  %v3077_v17 = vld [vmem:[%s3923_s1 + $0x398] sm:$0xff]   ;;  %v3082_v20 = vld [vmem:[%s3923_s1 + $0x368] sm:$0xff]  }
  0x43   :  { %2740 = vmatpush3.bf16.msra.mxu0 %v3031_v21  ;;  %1986 = vmatprep.mubr.bf16.mxu0 %v515_v55  ;;  %v3081_v21 = vld [vmem:[%s3923_s1 + $0x3a0] sm:$0xff]   ;;  %v3115_v55 = vld [vmem:[%s3923_s1 + $0x468] sm:$0xff]  }
  0x44   :  { %1947 = vmatmul.mubr.bf16.vlgmr.msra.gmra.mrb[4].mxu1 %v475_v22  ;;  %2741 = vmatprep.subr.bf16.mxu0 %v3034_v23  ;;  %v3084_v22 = vld [vmem:[%s3923_s1 + $0x3e8] sm:$0xff]  }
  0x45   :  { %2762 = vmatpush3.bf16.msra.mxu1 %v3033_v24  ;;  %2026 = vmatprep.mubr.bf16.mxu1 %v525_v59  ;;  %v3083_v23 = vld [vmem:[%s3923_s1 + $0x328] sm:$0xff]   ;;  %v3086_v24 = vld [vmem:[%s3923_s1 + $0x370] sm:$0xff]  }
  0x46   :  { %2763 = vmatprep.subr.bf16.mxu1 %v3036_v25  ;;  %v3085_v25 = vld [vmem:[%s3923_s1 + $0x3a8] sm:$0xff]   ;;  %v3119_v59 = vld [vmem:[%s3923_s1 + $0x470] sm:$0xff]  }
  0x47   :  { %2742 = vmatpush3.bf16.msra.mxu0 %v3035_v26  ;;  %v3088_v26 = vld [vmem:[%s3923_s1 + $0x3f0] sm:$0xff]  }
  0x48   :  { %2743 = vmatprep.subr.bf16.mxu0 %v3038_v27  ;;  %v3087_v27 = vld [vmem:[%s3923_s1 + $0x330] sm:$0xff]  }
  0x49   :  { %2764 = vmatpush3.bf16.msra.mxu1 %v3037_v28  ;;  %v3090_v28 = vld [vmem:[%s3923_s1 + $0x378] sm:$0xff]  }
  0x4a   :  { %2765 = vmatprep.subr.bf16.mxu1 %v3040_v29  ;;  %v3089_v29 = vld [vmem:[%s3923_s1 + $0x3b0] sm:$0xff]  }
  0x4b   :  { %2744 = vmatpush3.bf16.msra.mxu0 %v3039_v30  ;;  %v3092_v30 = vld [vmem:[%s3923_s1 + $0x3f8] sm:$0xff]  }
  0x4c   :  { %2745 = vmatprep.subr.bf16.mxu0 %v3042_v31  ;;  %v3091_v31 = vld [vmem:[%s3923_s1 + $0x338] sm:$0xff]  }
  0x4d   :  { %2766 = vmatpush3.bf16.msra.mxu1 %v3041_v32  ;;  %v508_v32 = vrot.slane %v3524_v52, %v3335_v41  ;;  %v3110_v52 = vld [vmem:[%s3923_s1 + $0x498] sm:$0xff]  }
  0x4e   :  { %2767 = vmatprep.subr.bf16.mxu1 %v3044_v33  ;;  %v3095_v33 = vld [vmem:[%s3923_s1 + $0x440] sm:$0xff]  }
  0x4f   :  { %2746 = vmatpush3.bf16.msra.mxu0 %v3043_v34  ;;  %v3094_v34 = vld [vmem:[%s3923_s1 + $0x3b8] sm:$0xff]  }
  0x50   :  { %2747 = vmatprep.subr.bf16.mxu0 %v3046_v35  ;;  %v3097_v35 = vld [vmem:[%s3923_s1 + $0x4c0] sm:$0xff]  }
  0x51   :  { %2768 = vmatpush3.bf16.msra.mxu1 %v3045_v36  ;;  %v3096_v36 = vld [vmem:[%s3923_s1 + $0x400] sm:$0xff]  }
  0x52   :  { %2769 = vmatprep.subr.bf16.mxu1 %v3048_v37  ;;  %v524_v37 = vcombine.high %v508_v32, %v508_v32 }
  0x53   :  { %2748 = vmatpush3.bf16.msra.mxu0 %v3047_v38  ;;  %v3099_v38 = vld [vmem:[%s3923_s1 + $0x448] sm:$0xff]  }
  0x54   :  { %2749 = vmatprep.subr.bf16.mxu0 %v3050_v39  ;;  %v3098_v39 = vld [vmem:[%s3923_s1 + $0x480] sm:$0xff]  }
  0x55   :  { %2770 = vmatpush3.bf16.msra.mxu1 %v3049_v40  ;;  %v3101_v40 = vld [vmem:[%s3923_s1 + $0x4c8] sm:$0xff]  }
  0x56   :  { %2771 = vmatprep.subr.bf16.mxu1 %v3052_v42  ;;  %v3100_v42 = vld [vmem:[%s3923_s1 + $0x408] sm:$0xff]  }
  0x57   :  { %2750 = vmatpush3.bf16.msra.mxu0 %v3051_v43  ;;  %v3103_v43 = vld [vmem:[%s3923_s1 + $0x450] sm:$0xff]  }
  0x58   :  { %2751 = vmatprep.subr.bf16.mxu0 %v3054_v44  ;;  %v3102_v44 = vld [vmem:[%s3923_s1 + $0x488] sm:$0xff]  }
  0x59   :  { %2772 = vmatpush3.bf16.msra.mxu1 %v3053_v46  ;;  %v3104_v46 = vld [vmem:[%s3923_s1 + $0x410] sm:$0xff]  }
  0x5a   :  { %2773 = vmatprep.subr.bf16.mxu1 %v3056_v49  ;;  %v3109_v49 = vld [vmem:[%s3923_s1 + $0x4d8] sm:$0xff]  }
  0x5b   :  { %2752 = vmatpush3.bf16.msra.mxu0 %v3055_v50  ;;  %v3108_v50 = vld [vmem:[%s3923_s1 + $0x418] sm:$0xff]  }
  0x5c   :  { %2753 = vmatprep.subr.bf16.mxu0 %v3058_v53  ;;  %v3113_v53 = vld [vmem:[%s3923_s1 + $0x4e0] sm:$0xff]  }
  0x5d   :  { %2774 = vmatpush3.bf16.msra.mxu1 %v3057_v54  ;;  %v3112_v54 = vld [vmem:[%s3923_s1 + $0x420] sm:$0xff]  }
  0x5e   :  { %2775 = vmatprep.subr.bf16.mxu1 %v3060_v57  ;;  %v3117_v57 = vld [vmem:[%s3923_s1 + $0x4e8] sm:$0xff]  }
  0x5f   :  { %2754 = vmatpush3.bf16.msra.mxu0 %v3059_v58  ;;  %v3116_v58 = vld [vmem:[%s3923_s1 + $0x428] sm:$0xff]  }
  0x60   :  { %2783 = vmatprep.subr.bf16.mxu0 %v3062_v61  ;;  %v3118_v61 = vld [vmem:[%s3923_s1 + $0x4a8] sm:$0xff]  }
  0x61   :  { %2776 = vmatpush3.bf16.msra.mxu1 %v3061_v62 }
  0x62   :  { %1987 = vmatmul.mubr.bf16.vlgmr.msra.gmra.mrb[8].mxu0 %v501_v60  ;;  %2805 = vmatprep.subr.bf16.mxu1 %v3064_v0  ;;  %v24_v60 = vld [vmem:[%s3922_s0 + $0x10] sm:$0xff] }
  0x63   :  { %2784 = vmatpush3.bf16.msra.mxu0 %v3063_v1  ;;  %2066 = vmatprep.mubr.bf16.mxu0 %v522_v63  ;;  %v534_v62 = vrot.slane %v24_v60, %v3335_v41  ;;  %v527_v63 = vcombine.high %v24_v60, %v24_v60  ;;  %v3121_v0 = vld [vmem:[%s3923_s1 + $0x4f0] sm:$0xff]  }
  0x64   :  { %2027 = vmatmul.mubr.bf16.vlgmr.msra.gmra.mrb[8].mxu1 %v523_v2  ;;  %2785 = vmatprep.subr.bf16.mxu0 %v3066_v3  ;;  %v3120_v1 = vld [vmem:[%s3923_s1 + $0x430] sm:$0xff]  }
  0x65   :  { %2806 = vmatpush3.bf16.msra.mxu1 %v3065_v4  ;;  %2106 = vmatprep.mubr.bf16.mxu1 %v526_v5  ;;  %v542_v2 = vcombine.high %v534_v62, %v534_v62  ;;  %v3730_v3 = vrot.slane %v527_v63, %v3335_v41  ;;  %v3123_v4 = vld [vmem:[%s3923_s1 + $0x478] sm:$0xff]   ;;  %v3122_v5 = vld [vmem:[%s3923_s1 + $0x4b0] sm:$0xff]  }
  0x66   :  { %2807 = vmatprep.subr.bf16.mxu1 %v3068_v6 }
  0x67   :  { %2786 = vmatpush3.bf16.msra.mxu0 %v3067_v7  ;;  %v564_v6 = vrot.slane %v542_v2, %v3335_v41  ;;  %v543_v7 = vcombine.high %v3730_v3, %v3730_v3 }
  0x68   :  { %2787 = vmatprep.subr.bf16.mxu0 %v3070_v8  ;;  %v3125_v8 = vld [vmem:[%s3923_s1 + $0x4f8] sm:$0xff]  }
  0x69   :  { %2808 = vmatpush3.bf16.msra.mxu1 %v3069_v9  ;;  %v3124_v9 = vld [vmem:[%s3923_s1 + $0x438] sm:$0xff]  }
  0x6a   :  { %2809 = vmatprep.subr.bf16.mxu1 %v3072_v10  ;;  %v574_v10 = vcombine.high %v564_v6, %v564_v6 }
  0x6b   :  { %2788 = vmatpush3.bf16.msra.mxu0 %v3071_v11  ;;  %v550_v11 = vrot.slane %v534_v62, %v3335_v41 }
  0x6c   :  { %2789 = vmatprep.subr.bf16.mxu0 %v3074_v12  ;;  %v3127_v12 = vld [vmem:[%s3923_s1 + $0x540] sm:$0xff]  }
  0x6d   :  { %2810 = vmatpush3.bf16.msra.mxu1 %v3073_v13  ;;  %v3126_v13 = vld [vmem:[%s3923_s1 + $0x4b8] sm:$0xff]  }
  0x6e   :  { %2811 = vmatprep.subr.bf16.mxu1 %v3076_v14  ;;  %v571_v14 = vrot.slane %v543_v7, %v3335_v41 }
  0x6f   :  { %2790 = vmatpush3.bf16.msra.mxu0 %v3075_v15  ;;  %v3129_v15 = vld [vmem:[%s3923_s1 + $0x5c0] sm:$0xff]  }
  0x70   :  { %2791 = vmatprep.subr.bf16.mxu0 %v3078_v16  ;;  %v3128_v16 = vld [vmem:[%s3923_s1 + $0x500] sm:$0xff]  }
  0x71   :  { %2812 = vmatpush3.bf16.msra.mxu1 %v3077_v17  ;;  %v572_v17 = vcombine.high %v550_v11, %v550_v11 }
  0x72   :  { %2813 = vmatprep.subr.bf16.mxu1 %v3080_v18  ;;  %v3131_v18 = vld [vmem:[%s3923_s1 + $0x548] sm:$0xff]  }
  0x73   :  { %2792 = vmatpush3.bf16.msra.mxu0 %v3079_v19  ;;  %v3130_v19 = vld [vmem:[%s3923_s1 + $0x580] sm:$0xff]  }
  0x74   :  { %2793 = vmatprep.subr.bf16.mxu0 %v3082_v20  ;;  %v575_v20 = vcombine.high %v571_v14, %v571_v14 }
  0x75   :  { %2814 = vmatpush3.bf16.msra.mxu1 %v3081_v21  ;;  %v3133_v21 = vld [vmem:[%s3923_s1 + $0x5c8] sm:$0xff]  }
  0x76   :  { %2815 = vmatprep.subr.bf16.mxu1 %v3084_v22  ;;  %v3132_v22 = vld [vmem:[%s3923_s1 + $0x508] sm:$0xff]  }
  0x77   :  { %2794 = vmatpush3.bf16.msra.mxu0 %v3083_v23  ;;  %v3135_v23 = vld [vmem:[%s3923_s1 + $0x550] sm:$0xff]  }
  0x78   :  { %2795 = vmatprep.subr.bf16.mxu0 %v3086_v24  ;;  %v3134_v24 = vld [vmem:[%s3923_s1 + $0x588] sm:$0xff]  }
  0x79   :  { %2816 = vmatpush3.bf16.msra.mxu1 %v3085_v25  ;;  %v3137_v25 = vld [vmem:[%s3923_s1 + $0x5d0] sm:$0xff]  }
  0x7a   :  { %2817 = vmatprep.subr.bf16.mxu1 %v3088_v26  ;;  %v3136_v26 = vld [vmem:[%s3923_s1 + $0x510] sm:$0xff]  }
  0x7b   :  { %2796 = vmatpush3.bf16.msra.mxu0 %v3087_v27  ;;  %v3139_v27 = vld [vmem:[%s3923_s1 + $0x558] sm:$0xff]  }
  0x7c   :  { %2797 = vmatprep.subr.bf16.mxu0 %v3090_v28  ;;  %v3138_v28 = vld [vmem:[%s3923_s1 + $0x590] sm:$0xff]  }
  0x7d   :  { %2818 = vmatpush3.bf16.msra.mxu1 %v3089_v29  ;;  %v3141_v29 = vld [vmem:[%s3923_s1 + $0x5d8] sm:$0xff]  }
  0x7e   :  { %2819 = vmatprep.subr.bf16.mxu1 %v3092_v30  ;;  %v3140_v30 = vld [vmem:[%s3923_s1 + $0x518] sm:$0xff]  }
  0x7f   :  { %2798 = vmatpush3.bf16.msra.mxu0 %v3091_v31  ;;  %v3143_v31 = vld [vmem:[%s3923_s1 + $0x560] sm:$0xff]  }
  0x80   :  { %2827 = vmatprep.subr.bf16.mxu0 %v3095_v33  ;;  %v3145_v33 = vld [vmem:[%s3923_s1 + $0x5e0] sm:$0xff]  }
  0x81   :  { %2820 = vmatpush3.bf16.msra.mxu1 %v3094_v34  ;;  %v3144_v34 = vld [vmem:[%s3923_s1 + $0x520] sm:$0xff]  }
  0x82   :  { %2067 = vmatmul.mubr.bf16.vlgmr.msra.gmra.mrb[12].mxu0 %v508_v32  ;;  %2849 = vmatprep.subr.bf16.mxu1 %v3097_v35  ;;  %v3142_v32 = vld [vmem:[%s3923_s1 + $0x598] sm:$0xff]   ;;  %v3147_v35 = vld [vmem:[%s3923_s1 + $0x568] sm:$0xff]  }
  0x83   :  { %2828 = vmatpush3.bf16.msra.mxu0 %v3096_v36  ;;  %2146 = vmatprep.mubr.bf16.mxu0 %v564_v6  ;;  %v3146_v36 = vld [vmem:[%s3923_s1 + $0x5a0] sm:$0xff]  }
  0x84   :  { %2107 = vmatmul.mubr.bf16.vlgmr.msra.gmra.mrb[12].mxu1 %v524_v37  ;;  %2829 = vmatprep.subr.bf16.mxu0 %v3099_v38  ;;  %v3149_v37 = vld [vmem:[%s3923_s1 + $0x5e8] sm:$0xff]  }
  0x85   :  { %2850 = vmatpush3.bf16.msra.mxu1 %v3098_v39  ;;  %2186 = vmatprep.mubr.bf16.mxu1 %v574_v10  ;;  %v3148_v38 = vld [vmem:[%s3923_s1 + $0x528] sm:$0xff]   ;;  %v3151_v39 = vld [vmem:[%s3923_s1 + $0x570] sm:$0xff]  }
  0x86   :  { %2851 = vmatprep.subr.bf16.mxu1 %v3101_v40  ;;  %v3150_v40 = vld [vmem:[%s3923_s1 + $0x5a8] sm:$0xff]  }
  0x87   :  { %2830 = vmatpush3.bf16.msra.mxu0 %v3100_v42  ;;  %v3153_v42 = vld [vmem:[%s3923_s1 + $0x5f0] sm:$0xff]  }
  0x88   :  { %2831 = vmatprep.subr.bf16.mxu0 %v3103_v43  ;;  %v3152_v43 = vld [vmem:[%s3923_s1 + $0x530] sm:$0xff]  }
  0x89   :  { %2852 = vmatpush3.bf16.msra.mxu1 %v3102_v44  ;;  %v3155_v44 = vld [vmem:[%s3923_s1 + $0x578] sm:$0xff]  }
  0x8a   :  { %2853 = vmatprep.subr.bf16.mxu1 %v3105_v45  ;;  %v3154_v45 = vld [vmem:[%s3923_s1 + $0x5b0] sm:$0xff]  }
  0x8b   :  { %2832 = vmatpush3.bf16.msra.mxu0 %v3104_v46  ;;  %v3156_v46 = vld [vmem:[%s3923_s1 + $0x538] sm:$0xff]  }
  0x8c   :  { %2833 = vmatprep.subr.bf16.mxu0 %v3107_v47  ;;  %v3157_v47 = vld [vmem:[%s3923_s1 + $0x5f8] sm:$0xff]  }
  0x8d   :  { %2854 = vmatpush3.bf16.msra.mxu1 %v3106_v48  ;;  %v3159_v48 = vld [vmem:[%s3923_s1 + $0x5b8] sm:$0xff]  }
  0x8e   :  { %2855 = vmatprep.subr.bf16.mxu1 %v3109_v49  ;;  %v557_v49 = vrot.slane %v3730_v3, %v3335_v41 }
  0x8f   :  { %2834 = vmatpush3.bf16.msra.mxu0 %v3108_v50  ;;  %v3160_v50 = vld [vmem:[%s3923_s1 + $0x600] sm:$0xff]  }
  0x90   :  { %2835 = vmatprep.subr.bf16.mxu0 %v3111_v51  ;;  %v3197_v51 = vmov 0.0  }
  0x91   :  { %2856 = vmatpush3.bf16.msra.mxu1 %v3110_v52  ;;  %v573_v52 = vcombine.high %v557_v49, %v557_v49 }
  0x92   :  { %2857 = vmatprep.subr.bf16.mxu1 %v3113_v53 }
  0x93   :  { %2836 = vmatpush3.bf16.msra.mxu0 %v3112_v54 }
  0x94   :  { %2837 = vmatprep.subr.bf16.mxu0 %v3115_v55 }
  0x95   :  { %2858 = vmatpush3.bf16.msra.mxu1 %v3114_v56 }
  0x96   :  { %2859 = vmatprep.subr.bf16.mxu1 %v3117_v57 }
  0x97   :  { %2838 = vmatpush3.bf16.msra.mxu0 %v3116_v58 }
  0x98   :  { %2839 = vmatprep.subr.bf16.mxu0 %v3119_v59 }
  0x99   :  { %2860 = vmatpush3.bf16.msra.mxu1 %v3118_v61 }
  0x9a   :  { %2861 = vmatprep.subr.bf16.mxu1 %v3121_v0 }
  0x9b   :  { %2840 = vmatpush3.bf16.msra.mxu0 %v3120_v1 }
  0x9c   :  { %2841 = vmatprep.subr.bf16.mxu0 %v3123_v4 }
  0x9d   :  { %2862 = vmatpush3.bf16.msra.mxu1 %v3122_v5 }
  0x9e   :  { %2863 = vmatprep.subr.bf16.mxu1 %v3125_v8 }
  0x9f   :  { %2842 = vmatpush3.bf16.msra.mxu0 %v3124_v9 }
  0xa0   :  { %2871 = vmatprep.subr.bf16.mxu0 %v3127_v12 }
  0xa1   :  { %2864 = vmatpush3.bf16.msra.mxu1 %v3126_v13 }
  0xa2   :  { %2147 = vmatmul.mubr.bf16.vlgmr.msra.gmra.mrb[16].mxu0 %v550_v11  ;;  %2893 = vmatprep.subr.bf16.mxu1 %v3129_v15 }
  0xa3   :  { %2872 = vmatpush3.bf16.msra.mxu0 %v3128_v16  ;;  %2226 = vmatprep.mubr.bf16.mxu0 %v571_v14 }
  0xa4   :  { %2187 = vmatmul.mubr.bf16.vlgmr.msra.gmra.mrb[16].mxu1 %v572_v17  ;;  %2873 = vmatprep.subr.bf16.mxu0 %v3131_v18 }
  0xa5   :  { %2894 = vmatpush3.bf16.msra.mxu1 %v3130_v19  ;;  %2266 = vmatprep.mubr.bf16.mxu1 %v575_v20 }
  0xa6   :  { %2895 = vmatprep.subr.bf16.mxu1 %v3133_v21 }
  0xa7   :  { %2874 = vmatpush3.bf16.msra.mxu0 %v3132_v22 }
  0xa8   :  { %2875 = vmatprep.subr.bf16.mxu0 %v3135_v23 }
  0xa9   :  { %2896 = vmatpush3.bf16.msra.mxu1 %v3134_v24 }
  0xaa   :  { %2897 = vmatprep.subr.bf16.mxu1 %v3137_v25 }
  0xab   :  { %2876 = vmatpush3.bf16.msra.mxu0 %v3136_v26 }
  0xac   :  { %2877 = vmatprep.subr.bf16.mxu0 %v3139_v27 }
  0xad   :  { %2898 = vmatpush3.bf16.msra.mxu1 %v3138_v28 }
  0xae   :  { %2899 = vmatprep.subr.bf16.mxu1 %v3141_v29 }
  0xaf   :  { %2878 = vmatpush3.bf16.msra.mxu0 %v3140_v30 }
  0xb0   :  { %2879 = vmatprep.subr.bf16.mxu0 %v3143_v31 }
  0xb1   :  { %2900 = vmatpush3.bf16.msra.mxu1 %v3142_v32 }
  0xb2   :  { %2901 = vmatprep.subr.bf16.mxu1 %v3145_v33 }
  0xb3   :  { %2880 = vmatpush3.bf16.msra.mxu0 %v3144_v34 }
  0xb4   :  { %2881 = vmatprep.subr.bf16.mxu0 %v3147_v35 }
  0xb5   :  { %2902 = vmatpush3.bf16.msra.mxu1 %v3146_v36 }
  0xb6   :  { %2903 = vmatprep.subr.bf16.mxu1 %v3149_v37 }
  0xb7   :  { %2882 = vmatpush3.bf16.msra.mxu0 %v3148_v38 }
  0xb8   :  { %2883 = vmatprep.subr.bf16.mxu0 %v3151_v39 }
  0xb9   :  { %2904 = vmatpush3.bf16.msra.mxu1 %v3150_v40 }
  0xba   :  { %2905 = vmatprep.subr.bf16.mxu1 %v3153_v42 }
  0xbb   :  { %2884 = vmatpush3.bf16.msra.mxu0 %v3152_v43 }
  0xbc   :  { %2885 = vmatprep.subr.bf16.mxu0 %v3155_v44 }
  0xbd   :  { %2906 = vmatpush3.bf16.msra.mxu1 %v3154_v45 }
  0xbe   :  { %2907 = vmatprep.subr.bf16.mxu1 %v3157_v47 }
  0xbf   :  { %2886 = vmatpush3.bf16.msra.mxu0 %v3156_v46 }
  0xc0   :  { %2929 = vmatprep.subr.bf16.mxu0 %v3197_v51 }
  0xc1   :  { %10 = vsyncpa [#allocation3], 0  ;;  %2908 = vmatpush3.bf16.msra.mxu1 %v3159_v48  ;;  %v3161_v53 = vld [vmem:[%s3923_s1 + $0x608] sm:$0xff]   ;;  %vm3198_vm0 = vmmov 0   ;;  %v3162_v54 = vld [vmem:[%s3923_s1 + $0x610] sm:$0xff]   ;;  %vm1790_vm1 = vcmask 523264  }
  0xc2   :  { %2227 = vmatmul.mubr.bf16.vlgmr.msra.gmra.mrb[20].mxu0 %v557_v49  ;;  %2941 = vmatprep.subr.bf16.mxu1 %v3197_v51  ;;  %v3163_v55 = vld [vmem:[%s3923_s1 + $0x618] sm:$0xff]   ;;  %v2443_v59 = vld [vmem:[%s3924_s2] ss:$0 sm:$0xff]  ;;  %v3165_v7 = vld [vmem:[%s3925_s3 + $0x8] sm:$0xff]   ;;  %s3199_s9 = smov [#allocation2]   ;;  %vm2427_vm2 = vcmask 74752  }
  0xc3   :  { %2930 = vmatpush3.bf16.msra.mxu0 %v3160_v50  ;;  %2937 = vmatprep.mubr.msk.bf16.mxu0 %vm3198_vm0, %v3197_v51  ;;  %v2444_v56 = vld.sshfl [vmem:[%s3922_s0 + $0x18] sm:$0x1 pattern:$0x75316420]  ;;  %v3166_v8 = vld [vmem:[%s3925_s3 + $0x10] sm:$0xff]   ;;  %v3168_v20 = vld [vmem:[%s3925_s3 + $0x20] sm:$0xff]  }
  0xc4   :  { %2267 = vmatmul.mubr.bf16.vlgmr.msra.gmra.mrb[20].mxu1 %v573_v52  ;;  %2931 = vmatprep.subr.bf16.mxu0 %v3197_v51  ;;  %v589_v57 = vrot.slane %v2444_v56, %v3335_v41  ;;  %v3164_v41 = vld [vmem:[%s3925_s3] sm:$0xff]   ;;  %v3167_v14 = vld [vmem:[%s3925_s3 + $0x18] sm:$0xff]   ;;  %v3169_v23 = vld [vmem:[%s3925_s3 + $0x28] sm:$0xff]   ;;  %s2435_s10 = sshll.u32 %s3199_s9, 4  ;;  %s2436_s10 = int_to_ptr.vmem [resolvable:$true] %s2435_s10 }
  0xc5   :  { %2957 = vmatprep.mubr.msk.bf16.mxu1 %vm3198_vm0, %v3197_v51  ;;  %2942 = vmatpush3.bf16.msra.mxu1 %v3164_v41  ;;  %v3170_v24 = vld [vmem:[%s3925_s3 + $0x30] sm:$0xff]   ;;  %v3171_v25 = vld [vmem:[%s3925_s3 + $0x38] sm:$0xff]   ;;  %s3172_s11 = scalar_lea.vmem %s2436_s10, 32  ;;  %p3177_p1 = scmp.lt.s32.totalorder %s2436_s10, %s2436_s10 }
  0xc6   :  { %2943 = vmatprep.subr.bf16.mxu1 %v3197_v51  ;;  %p3173_p0 = scmp.ne.s32.totalorder %s2436_s10, %s3172_s11  ;;  %p3178_p2 = scmp.lt.s32.totalorder %s3172_s11, %s3172_s11 }
  0xc7   :  { %2932 = vmatpush3.bf16.msra.mxu0 %v3161_v53 }
  0xc8   :  { %2933 = vmatprep.subr.bf16.mxu0 %v3197_v51  ;;  %p3179_p3 = por %p3178_p2, %p3177_p1 }
  0xc9   :  { %2944 = vmatpush3.bf16.msra.mxu1 %v3165_v7 }
  0xca   :  { %2945 = vmatprep.subr.bf16.mxu1 %v3197_v51  ;;  %p3180_p4 = pnand %p3179_p3, %p3173_p0 }
  0xcb   :  { %2934 = vmatpush3.bf16.msra.mxu0 %v3162_v54 }
  0xcc   :  { %2935 = vmatprep.subr.bf16.mxu0 %v3197_v51 }
  0xcd   :  { %2946 = vmatpush3.bf16.msra.mxu1 %v3166_v8 }
  0xce   :  { %2947 = vmatprep.subr.bf16.mxu1 %v3197_v51 }
  0xcf   :  { %2936 = vmatpush3.bf16.msra.mxu0 %v3163_v55 }
  0xd1   :  { %2948 = vmatpush3.bf16.msra.mxu1 %v3167_v14 }
  0xd2   :  { %2938 = vmatmul.mubr.msk.bf16.vlgmr.msra.gmra.mrb[24].mxu0 %vm1790_vm1, %v589_v57  ;;  %2949 = vmatprep.subr.bf16.mxu1 %v3197_v51 }
  0xd5   :  { %2950 = vmatpush3.bf16.msra.mxu1 %v3168_v20 }
  0xd6   :  { %2951 = vmatprep.subr.bf16.mxu1 %v3197_v51 }
  0xd9   :  { %2952 = vmatpush3.bf16.msra.mxu1 %v3169_v23 }
  0xda   :  { %2953 = vmatprep.subr.bf16.mxu1 %v3197_v51 }
  0xdd   :  { %2954 = vmatpush3.bf16.msra.mxu1 %v3170_v24 }
  0xde   :  { %2955 = vmatprep.subr.bf16.mxu1 %v3197_v51 }
  0xe1   :  { %2956 = vmatpush3.bf16.msra.mxu1 %v3171_v25 }
  0xf5   :  { %v2667_v58 = vpop.f32.mrb[0].mxu0 }
  0xf6   :  { %v2668_v60 = vpop.f32.mrb[1].mxu0 }
  0xf7   :  { %v2669_v61 = vadd.f32 %v2668_v60, %v2667_v58  ;;  %v2670_v62 = vpop.f32.mrb[2].mxu0  ;;  %v2689_v63 = vpop.f32.mrb[0].mxu1 }
  0xf8   :  { %v2671_v0 = vpop.f32.mrb[3].mxu0  ;;  %v2690_v1 = vpop.f32.mrb[1].mxu1 }
  0xf9   :  { %v1829_v2 = vadd.f32 %v2669_v61, %v2443_v59  ;;  %v2691_v3 = vadd.f32 %v2690_v1, %v2689_v63  ;;  %v2692_v4 = vpop.f32.mrb[2].mxu1 }
  0xfa   :  { %v2693_v5 = vpop.f32.mrb[3].mxu1 }
  0xfb   :  { %v1869_v6 = vadd.f32 %v2691_v3, %v1829_v2 }
 0x115   :  { %v2711_v9 = vpop.f32.mrb[4].mxu0 }
 0x116   :  { %v2712_v10 = vpop.f32.mrb[5].mxu0 }
 0x117   :  { %v2713_v11 = vadd.f32 %v2712_v10, %v2711_v9  ;;  %v2714_v12 = vpop.f32.mrb[6].mxu0  ;;  %v2733_v13 = vpop.f32.mrb[4].mxu1 }
 0x118   :  { %v2715_v15 = vpop.f32.mrb[7].mxu0  ;;  %v2734_v16 = vpop.f32.mrb[5].mxu1 }
 0x119   :  { %v1909_v17 = vadd.f32 %v2713_v11, %v1869_v6  ;;  %v2735_v18 = vadd.f32 %v2734_v16, %v2733_v13  ;;  %v2736_v19 = vpop.f32.mrb[6].mxu1 }
 0x11a   :  { %v2737_v21 = vpop.f32.mrb[7].mxu1 }
 0x11b   :  { %v1949_v22 = vadd.f32 %v2735_v18, %v1909_v17  ;;  %v2642_v17 = vld [vmem:[%s3926_s4] ss:$0 sm:$0xff] }
 0x135   :  { %v2755_v26 = vpop.f32.mrb[8].mxu0 }
 0x136   :  { %v2756_v27 = vpop.f32.mrb[9].mxu0 }
 0x137   :  { %v2757_v28 = vadd.f32 %v2756_v27, %v2755_v26  ;;  %v2758_v29 = vpop.f32.mrb[10].mxu0  ;;  %v2777_v30 = vpop.f32.mrb[8].mxu1 }
 0x138   :  { %v2759_v31 = vpop.f32.mrb[11].mxu0  ;;  %v2778_v32 = vpop.f32.mrb[9].mxu1 }
 0x139   :  { %v1989_v33 = vadd.f32 %v2757_v28, %v1949_v22  ;;  %v2779_v34 = vadd.f32 %v2778_v32, %v2777_v30  ;;  %v2780_v35 = vpop.f32.mrb[10].mxu1 }
 0x13a   :  { %v2781_v36 = vpop.f32.mrb[11].mxu1 }
 0x13b   :  { %v2029_v37 = vadd.f32 %v2779_v34, %v1989_v33 }
 0x155   :  { %v2799_v38 = vpop.f32.mrb[12].mxu0 }
 0x156   :  { %v2800_v39 = vpop.f32.mrb[13].mxu0 }
 0x157   :  { %v2801_v40 = vadd.f32 %v2800_v39, %v2799_v38  ;;  %v2802_v42 = vpop.f32.mrb[14].mxu0  ;;  %v2821_v43 = vpop.f32.mrb[12].mxu1 }
 0x158   :  { %v2803_v44 = vpop.f32.mrb[15].mxu0  ;;  %v2822_v45 = vpop.f32.mrb[13].mxu1 }
 0x159   :  { %v2069_v46 = vadd.f32 %v2801_v40, %v2029_v37  ;;  %v2823_v47 = vadd.f32 %v2822_v45, %v2821_v43  ;;  %v2824_v48 = vpop.f32.mrb[14].mxu1 }
 0x15a   :  { %v2825_v49 = vpop.f32.mrb[15].mxu1 }
 0x15b   :  { %v2109_v50 = vadd.f32 %v2823_v47, %v2069_v46 }
 0x175   :  { %v2843_v51 = vpop.f32.mrb[16].mxu0 }
 0x176   :  { %v2844_v52 = vpop.f32.mrb[17].mxu0 }
 0x177   :  { %v2845_v53 = vadd.f32 %v2844_v52, %v2843_v51  ;;  %v2846_v54 = vpop.f32.mrb[18].mxu0  ;;  %v2865_v55 = vpop.f32.mrb[16].mxu1 }
 0x178   :  { %v2847_v56 = vpop.f32.mrb[19].mxu0  ;;  %v2866_v57 = vpop.f32.mrb[17].mxu1 }
 0x179   :  { %v2149_v58 = vadd.f32 %v2845_v53, %v2109_v50  ;;  %v2867_v59 = vadd.f32 %v2866_v57, %v2865_v55  ;;  %v2868_v60 = vpop.f32.mrb[18].mxu1 }
 0x17a   :  { %v2869_v61 = vpop.f32.mrb[19].mxu1 }
 0x17b   :  { %v2189_v62 = vadd.f32 %v2867_v59, %v2149_v58 }
 0x195   :  { %v2887_v63 = vpop.f32.mrb[20].mxu0 }
 0x196   :  { %v2888_v0 = vpop.f32.mrb[21].mxu0 }
 0x197   :  { %v2889_v1 = vadd.f32 %v2888_v0, %v2887_v63  ;;  %v2890_v2 = vpop.f32.mrb[22].mxu0  ;;  %v2909_v3 = vpop.f32.mrb[20].mxu1 }
 0x198   :  { %v2891_v4 = vpop.f32.mrb[23].mxu0  ;;  %v2910_v5 = vpop.f32.mrb[21].mxu1 }
 0x199   :  { %v2229_v6 = vadd.f32 %v2889_v1, %v2189_v62  ;;  %v2911_v41 = vadd.f32 %v2910_v5, %v2909_v3  ;;  %v2912_v7 = vpop.f32.mrb[22].mxu1 }
 0x19a   :  { %v2913_v8 = vpop.f32.mrb[23].mxu1 }
 0x19b   :  { %v2269_v9 = vadd.f32 %v2911_v41, %v2229_v6 }
 0x1a5   :  { %v2308_v10 = vpop.f32.mrb[24].mxu0 }
 0x1a6   :  { %v2309_v11 = vadd.f32 %v2308_v10, %v2269_v9  ;;  %v2939_v12 = vpop.f32.mrb[25].mxu0 }
 0x1a7   :  { %v2311_v13 = vpop.f32.mrb[26].mxu0 }
 0x1a8   :  { %v2314_v14 = vmax.f32 %v2309_v11, 0.0  ;;  %v2940_v15 = vpop.f32.mrb[27].mxu0 }
 0x1aa   :  { %v2315_v16 = vpack.c.bf16 %v2314_v14, %v2314_v14 }
 0x1ac   :  { %2958 = vmatmul.mubr.bf16.vlgmr.msra.gmra.mrb[24].mxu1 %v2315_v16 }
 0x27f   :  { %v2421_v18 = vpop.f32.mrb[24].mxu1 }
 0x280   :  { %v2422_v19 = vadd.f32 %v2642_v17, %v2421_v18  ;;  %v2959_v20 = vpop.f32.mrb[25].mxu1 }
 0x281   :  { %v2424_v21 = vpop.f32.mrb[26].mxu1 }
 0x282   :  { %v2960_v22 = vpop.f32.mrb[27].mxu1  ;;  %2428 = vst.msk [vmem:[#allocation2] sm:$0x3] %vm2427_vm2, %v2422_v19 }
 0x283   :  { %3183 = shalt.err (!%p3180_p4)
}
 0x284   :  { %s3184_s4 = scalar_lea.hbm %s3927_s5, 32 }
 0x285   :  { %p3185_p5 = scmp.ne.s32.totalorder %s3927_s5, %s3184_s4  ;;  %p3188_p6 = scmp.lt.u32.totalorder %s3184_s4, %s3927_s5 }
 0x287   :  { %p3190_p7 = pnand %p3188_p6, %p3185_p5 }
 0x289   :  { %3193 = shalt.err (!%p3190_p7)
}
 0x28a   :  { %2438 = dma.vmem_to_hbm [thread:$0]  %s2436_s10, 32, %s3927_s5, [#allocation3]  }
 0x28b   :  { %3194 = dma.done.wait [#allocation3], 32  }
 0x28c   :  { %3195 = vsyncadd [#allocation3], 4294967264 }
 0x28d   :  { %2442 = vsyncpa [#allocation3], 1 }

</bundles_post_ra>
